<compile_context>
chip_gen: v7x
topology: tpu7x:2x2x1
jax: 0.10.0
libtpu: 0.0.40
codegen_flags: <defaults>
</compile_context>

<pallas_src>
import functools

import jax
import jax.numpy as jnp
from jax.experimental import pallas as pl
from jax.experimental.pallas import tpu as pltpu


# ----------------------------------------------------------------------------
# Fused DenseBlock kernel (all layers, one image per grid step)
# ----------------------------------------------------------------------------
def dense_block_kernel(*refs, depth, C0, G, Cmid, W, HW, base):
    # refs layout:
    #   refs[0]                      x_ref   (HW, C0)   channels-last image
    #   refs[1+6l .. 6+6l]           layer l params:
    #       s1 (1,Cin) b1 (1,Cin)    folded BN1 scale/bias (f32)
    #       w1 (Cin, Cmid)           1x1 conv weight
    #       s2 (1,Cmid) b2 (1,Cmid)  folded BN2 scale/bias (f32)
    #       w2 (3, 3*Cmid, G)        3x3 weight, [kx, ky*Cmid+c, g]
    #   refs[1+6*depth]              o_ref   (HW, C0 + depth*G)
    #   refs[2+6*depth]              hp_ref  (base+W+HW+8, 3*Cmid) VMEM scratch
    x_ref = refs[0]
    o_ref = refs[1 + 6 * depth]
    hp_ref = refs[2 + 6 * depth]
    dt = hp_ref.dtype

    # --- zero only the halo rows that are read but never rewritten -----------
    # Column block ky holds h2 shifted by (ky-1)*W rows; reads span
    # [base-1, base+1+HW) so the unwritten halo is (W+1) rows above the image
    # for ky=0, (W+1) rows below for ky=2, and one row each side for ky=1.
    zhalo = jnp.zeros((W + 1, Cmid), dt)
    zrow = jnp.zeros((1, Cmid), dt)
    hp_ref[base - 1:base + W, 0:Cmid] = zhalo
    hp_ref[base - 1:base, Cmid:2 * Cmid] = zrow
    hp_ref[base + HW:base + HW + 1, Cmid:2 * Cmid] = zrow
    hp_ref[base - W + HW:base + HW + 1, 2 * Cmid:3 * Cmid] = zhalo

    # --- pass-through half of the final concat --------------------------------
    o_ref[:, 0:C0] = x_ref[...]

    # width-wraparound masks (shared by every layer)
    col = jax.lax.broadcasted_iota(jnp.int32, (HW, 1), 0) % W
    not_first_col = col != 0
    not_last_col = col != W - 1

    for l in range(depth):
        s1_ref, b1_ref, w1_ref, s2_ref, b2_ref, w2_ref = refs[1 + 6 * l:7 + 6 * l]
        Cin = C0 + l * G

        # ---- BN1 (folded) + ReLU + 1x1 conv (MXU) ----------------------------
        feat = o_ref[:, 0:Cin].astype(jnp.float32)              # (HW, Cin)
        h1 = jnp.maximum(feat * s1_ref[...] + b1_ref[...], 0.0)
        mid = jnp.dot(h1.astype(w1_ref.dtype), w1_ref[...],
                      preferred_element_type=jnp.float32)        # (HW, Cmid)

        # ---- BN2 (folded) + ReLU ---------------------------------------------
        h2 = jnp.maximum(mid * s2_ref[...] + b2_ref[...], 0.0).astype(dt)

        # ---- write h2 three times, ky-stacked along the contraction dim ------
        # column block ky stores h2 at row offset base - (ky-1)*W so that a
        # single (HW, 3*Cmid) row-window read yields all three ky taps at once.
        hp_ref[base + W:base + W + HW, 0:Cmid] = h2              # ky = 0
        hp_ref[base:base + HW, Cmid:2 * Cmid] = h2               # ky = 1
        hp_ref[base - W:base - W + HW, 2 * Cmid:3 * Cmid] = h2   # ky = 2

        # ---- 3x3 conv (padding=1) as 3 matmuls (one per kx), K = 3*Cmid ------
        acc = None
        for kx in range(3):
            s = base + kx - 1
            tap = hp_ref[s:s + HW, :]                            # (HW, 3*Cmid)
            part = jnp.dot(tap, w2_ref[kx],
                           preferred_element_type=jnp.float32)   # (HW, G)
            if kx == 0:
                part = jnp.where(not_first_col, part, 0.0)
            elif kx == 2:
                part = jnp.where(not_last_col, part, 0.0)
            acc = part if acc is None else acc + part

        # ---- append the G new channels (feeds the next layer from VMEM) ------
        o_ref[:, Cin:Cin + G] = acc.astype(o_ref.dtype)


# ----------------------------------------------------------------------------
# Wrapper
# ----------------------------------------------------------------------------
def _fold_bn(gamma, beta, mean, var, eps):
    inv = jax.lax.rsqrt(var.astype(jnp.float32) + eps)
    scale = gamma.astype(jnp.float32) * inv
    bias = beta.astype(jnp.float32) - mean.astype(jnp.float32) * scale
    return scale.reshape(1, -1), bias.reshape(1, -1)


def dense_block_forward(x_nchw, params, *, eps=1e-5):
    """DenseBlock forward. x_nchw: (N, C0, H, W); params: per-layer dicts."""
    N, C0, H, W = x_nchw.shape
    HW = H * W
    depth = len(params)
    dtype = x_nchw.dtype
    itemsize = jnp.dtype(dtype).itemsize
    Cmid = params[0]["conv1_w"].shape[0]      # = growth_rate * widen (widen=1)
    G = params[0]["conv2_w"].shape[0]
    Ctot = C0 + depth * G
    base = W + 8                              # first real-data row in scratch
    hp_rows = base + W + HW + 8               # = HW + 2W + 16

    # NCHW -> (N, HW, C) channels-last, once for the whole block.
    feat = jnp.transpose(x_nchw, (0, 2, 3, 1)).reshape(N, HW, C0)

    inputs = [feat]
    in_specs = [pl.BlockSpec((None, HW, C0), lambda n: (n, 0, 0))]
    flops = 0
    wbytes = 0
    for l, lp in enumerate(params):
        Cin = C0 + l * G
        s1, b1 = _fold_bn(lp["bn1_gamma"], lp["bn1_beta"],
                          lp["bn1_mean"], lp["bn1_var"], eps)
        s2, b2 = _fold_bn(lp["bn2_gamma"], lp["bn2_beta"],
                          lp["bn2_mean"], lp["bn2_var"], eps)
        w1 = lp["conv1_w"].reshape(Cmid, Cin).T.astype(dtype)            # (Cin, Cmid)
        # conv2_w (G, Cmid, 3, 3) -> (kx, ky*Cmid + c, g)
        w2 = jnp.transpose(lp["conv2_w"], (3, 2, 1, 0)).reshape(
            3, 3 * Cmid, G).astype(dtype)

        inputs += [s1, b1, w1, s2, b2, w2]
        in_specs += [
            pl.BlockSpec((1, Cin), lambda n: (0, 0)),
            pl.BlockSpec((1, Cin), lambda n: (0, 0)),
            pl.BlockSpec((Cin, Cmid), lambda n: (0, 0)),
            pl.BlockSpec((1, Cmid), lambda n: (0, 0)),
            pl.BlockSpec((1, Cmid), lambda n: (0, 0)),
            pl.BlockSpec((3, 3 * Cmid, G), lambda n: (0, 0, 0)),
        ]
        flops += 2 * N * HW * Cin * Cmid + 2 * N * HW * (3 * Cmid) * G * 3
        wbytes += (Cin * Cmid + 9 * Cmid * G) * itemsize + (2 * Cin + 2 * Cmid) * 4

    bytes_accessed = int(N * HW * (C0 + Ctot) * itemsize + wbytes)

    # VMEM budget: double-buffered image in/out blocks + params + scratch.
    vmem_needed = (2 * HW * (C0 + Ctot) * itemsize + 2 * wbytes
                   + hp_rows * 3 * Cmid * itemsize)
    vmem_limit = int(min(64 * 1024 * 1024, max(32 * 1024 * 1024, 2 * vmem_needed)))

    kernel = functools.partial(dense_block_kernel, depth=depth, C0=C0, G=G,
                               Cmid=Cmid, W=W, HW=HW, base=base)

    out = pl.pallas_call(
        kernel,
        out_shape=jax.ShapeDtypeStruct((N, HW, Ctot), dtype),
        grid_spec=pltpu.PrefetchScalarGridSpec(
            num_scalar_prefetch=0,
            grid=(N,),
            in_specs=in_specs,
            out_specs=pl.BlockSpec((None, HW, Ctot), lambda n: (n, 0, 0)),
            scratch_shapes=[pltpu.VMEM((hp_rows, 3 * Cmid), dtype)],
        ),
        compiler_params=pltpu.CompilerParams(
            dimension_semantics=("parallel",),
            vmem_limit_bytes=vmem_limit,
        ),
        cost_estimate=pl.CostEstimate(
            flops=flops, transcendentals=0, bytes_accessed=bytes_accessed),
    )(*inputs)

    # (N, HW, Ctot) channels-last -> NCHW
    return jnp.transpose(out.reshape(N, H, W, Ctot), (0, 3, 1, 2))


# ----------------------------------------------------------------------------
# Pure-JAX reference (inference-mode BN with running stats)
# ----------------------------------------------------------------------------
def _bn_relu_ref(x, gamma, beta, mean, var, eps):
    inv = 1.0 / jnp.sqrt(var.astype(jnp.float32) + eps)
    h = (x - mean[None, :, None, None]) * inv[None, :, None, None]
    h = h * gamma[None, :, None, None] + beta[None, :, None, None]
    return jnp.maximum(h, 0.0)


def dense_block_reference(x_nchw, params, *, eps=1e-5):
    feat = x_nchw.astype(jnp.float32)
    dn = ("NCHW", "OIHW", "NCHW")
    for lp in params:
        h = _bn_relu_ref(feat, lp["bn1_gamma"], lp["bn1_beta"],
                         lp["bn1_mean"], lp["bn1_var"], eps)
        h = jax.lax.conv_general_dilated(
            h, lp["conv1_w"].astype(jnp.float32), (1, 1), "VALID",
            dimension_numbers=dn, precision=jax.lax.Precision.HIGHEST)
        h = _bn_relu_ref(h, lp["bn2_gamma"], lp["bn2_beta"],
                         lp["bn2_mean"], lp["bn2_var"], eps)
        h = jax.lax.conv_general_dilated(
            h, lp["conv2_w"].astype(jnp.float32), (1, 1), ((1, 1), (1, 1)),
            dimension_numbers=dn, precision=jax.lax.Precision.HIGHEST)
        feat = jnp.concatenate([feat, h], axis=1)
    return feat


def make_dense_block_params(key, in_channels, block_depth, growth_rate):
    params = []
    cin = in_channels
    for _ in range(block_depth):
        cmid = growth_rate  # widen = 1 in DenseBlock
        key, *ks = jax.random.split(key, 11)
        params.append(dict(
            bn1_gamma=jax.random.uniform(ks[0], (cin,), minval=0.5, maxval=1.5),
            bn1_beta=jax.random.normal(ks[1], (cin,)) * 0.1,
            bn1_mean=jax.random.normal(ks[2], (cin,)) * 0.1,
            bn1_var=jax.random.uniform(ks[3], (cin,), minval=0.5, maxval=1.5),
            conv1_w=jax.random.normal(ks[4], (cmid, cin, 1, 1)) * 0.2,
            bn2_gamma=jax.random.uniform(ks[5], (cmid,), minval=0.5, maxval=1.5),
            bn2_beta=jax.random.normal(ks[6], (cmid,)) * 0.1,
            bn2_mean=jax.random.normal(ks[7], (cmid,)) * 0.1,
            bn2_var=jax.random.uniform(ks[8], (cmid,), minval=0.5, maxval=1.5),
            conv2_w=jax.random.normal(ks[9], (growth_rate, cmid, 3, 3)) * 0.2,
        ))
        cin += growth_rate
    return params


if __name__ == "__main__":
    # DenseBlock(in_channels=8, block_depth=2, growth_rate=8) on (2, 8, 16, 16)
    N, C0, H, W = 2, 8, 16, 16
    block_depth, growth = 2, 8

    key = jax.random.PRNGKey(0)
    kx, kp = jax.random.split(key)
    x = jax.random.normal(kx, (N, C0, H, W), dtype=jnp.float32)
    params = make_dense_block_params(kp, C0, block_depth, growth)

    # TODO(synk): training-mode dropout (p>0) and batch-stat BN not implemented;
    # DenseBlock constructs DenseLayer with dropout=0.0 so both are no-ops here.
    out = dense_block_forward(x, params)
    out = jax.block_until_ready(out)

    ref = dense_block_reference(x, params)
    assert out.shape == (N, C0 + block_depth * growth, H, W), out.shape
    max_err = float(jnp.max(jnp.abs(out - ref)))
    assert jnp.allclose(out, ref, atol=1e-3, rtol=1e-3), max_err

    print("KERNEL_OK")
</pallas_src>

<mosaic_0001>
module attributes {stable_mosaic.version = 11 : i64} {
  func.func @dense_block_kernel(%arg0: i32, %arg1: memref<1x256x8xf32, #tpu.memory_space<vmem>>, %arg2: memref<1x8xf32, #tpu.memory_space<vmem>>, %arg3: memref<1x8xf32, #tpu.memory_space<vmem>>, %arg4: memref<8x8xf32, #tpu.memory_space<vmem>>, %arg5: memref<1x8xf32, #tpu.memory_space<vmem>>, %arg6: memref<1x8xf32, #tpu.memory_space<vmem>>, %arg7: memref<3x24x8xf32, #tpu.memory_space<vmem>>, %arg8: memref<1x16xf32, #tpu.memory_space<vmem>>, %arg9: memref<1x16xf32, #tpu.memory_space<vmem>>, %arg10: memref<16x8xf32, #tpu.memory_space<vmem>>, %arg11: memref<1x8xf32, #tpu.memory_space<vmem>>, %arg12: memref<1x8xf32, #tpu.memory_space<vmem>>, %arg13: memref<3x24x8xf32, #tpu.memory_space<vmem>>, %arg14: memref<1x256x24xf32, #tpu.memory_space<vmem>>, %arg15: memref<304x24xf32, #tpu.memory_space<vmem>>) attributes {dimension_semantics = [#tpu.dimension_semantics<parallel>], iteration_bounds = array<i64: 2>, scalar_prefetch = 0 : i64, scratch_operands = 1 : i64, tpu.core_type = #tpu.core_type<tc>, window_params = [{transform_indices = @transform_0, window_bounds = array<i64: 1, 256, 8>}, {pipeline_mode = #tpu.pipeline_mode<synchronous>, transform_indices = @transform_1, window_bounds = array<i64: 1, 8>}, {pipeline_mode = #tpu.pipeline_mode<synchronous>, transform_indices = @transform_2, window_bounds = array<i64: 1, 8>}, {pipeline_mode = #tpu.pipeline_mode<synchronous>, transform_indices = @transform_3, window_bounds = array<i64: 8, 8>}, {pipeline_mode = #tpu.pipeline_mode<synchronous>, transform_indices = @transform_4, window_bounds = array<i64: 1, 8>}, {pipeline_mode = #tpu.pipeline_mode<synchronous>, transform_indices = @transform_5, window_bounds = array<i64: 1, 8>}, {pipeline_mode = #tpu.pipeline_mode<synchronous>, transform_indices = @transform_6, window_bounds = array<i64: 3, 24, 8>}, {pipeline_mode = #tpu.pipeline_mode<synchronous>, transform_indices = @transform_7, window_bounds = array<i64: 1, 16>}, {pipeline_mode = #tpu.pipeline_mode<synchronous>, transform_indices = @transform_8, window_bounds = array<i64: 1, 16>}, {pipeline_mode = #tpu.pipeline_mode<synchronous>, transform_indices = @transform_9, window_bounds = array<i64: 16, 8>}, {pipeline_mode = #tpu.pipeline_mode<synchronous>, transform_indices = @transform_10, window_bounds = array<i64: 1, 8>}, {pipeline_mode = #tpu.pipeline_mode<synchronous>, transform_indices = @transform_11, window_bounds = array<i64: 1, 8>}, {pipeline_mode = #tpu.pipeline_mode<synchronous>, transform_indices = @transform_12, window_bounds = array<i64: 3, 24, 8>}, {transform_indices = @transform_13, window_bounds = array<i64: 1, 256, 24>}]} {
    %cst = arith.constant 0.000000e+00 : f32
    %0 = vector.broadcast %cst : f32 to vector<17x8xf32>
    %cst_0 = arith.constant 0.000000e+00 : f32
    %1 = vector.broadcast %cst_0 : f32 to vector<1x8xf32>
    %c23 = arith.constant 23 : index
    %c0 = arith.constant 0 : index
    %2 = vector.load %arg15[%c23, %c0] : memref<304x24xf32, #tpu.memory_space<vmem>>, vector<17x8xf32>
    tpu.vector_store %arg15[%c23, %c0], %0 {strides = array<i32>} : memref<304x24xf32, #tpu.memory_space<vmem>>, vector<17x8xf32>,
    %c23_1 = arith.constant 23 : index
    %c8 = arith.constant 8 : index
    %3 = vector.load %arg15[%c23_1, %c8] : memref<304x24xf32, #tpu.memory_space<vmem>>, vector<1x8xf32>
    tpu.vector_store %arg15[%c23_1, %c8], %1 {strides = array<i32>} : memref<304x24xf32, #tpu.memory_space<vmem>>, vector<1x8xf32>,
    %c280 = arith.constant 280 : index
    %c8_2 = arith.constant 8 : index
    %4 = vector.load %arg15[%c280, %c8_2] : memref<304x24xf32, #tpu.memory_space<vmem>>, vector<1x8xf32>
    tpu.vector_store %arg15[%c280, %c8_2], %1 {strides = array<i32>} : memref<304x24xf32, #tpu.memory_space<vmem>>, vector<1x8xf32>,
    %c264 = arith.constant 264 : index
    %c16 = arith.constant 16 : index
    %5 = vector.load %arg15[%c264, %c16] : memref<304x24xf32, #tpu.memory_space<vmem>>, vector<17x8xf32>
    tpu.vector_store %arg15[%c264, %c16], %0 {strides = array<i32>} : memref<304x24xf32, #tpu.memory_space<vmem>>, vector<17x8xf32>,
    %c0_3 = arith.constant 0 : index
    %c0_4 = arith.constant 0 : index
    %c0_5 = arith.constant 0 : index
    %6 = vector.load %arg1[%c0_3, %c0_4, %c0_5] : memref<1x256x8xf32, #tpu.memory_space<vmem>>, vector<1x256x8xf32>
    %7 = vector.shape_cast %6 : vector<1x256x8xf32> to vector<256x8xf32>
    %c0_6 = arith.constant 0 : index
    %c0_7 = arith.constant 0 : index
    %c0_8 = arith.constant 0 : index
    %8 = vector.load %arg14[%c0_6, %c0_7, %c0_8] : memref<1x256x24xf32, #tpu.memory_space<vmem>>, vector<1x256x8xf32>
    %9 = vector.shape_cast %8 : vector<1x256x8xf32> to vector<256x8xf32>
    %10 = vector.shape_cast %7 : vector<256x8xf32> to vector<1x256x8xf32>
    tpu.vector_store %arg14[%c0_6, %c0_7, %c0_8], %10 {strides = array<i32>} : memref<1x256x24xf32, #tpu.memory_space<vmem>>, vector<1x256x8xf32>,
    %11 = tpu.iota {dimensions = array<i32: 0>} : vector<256x1xi32>
    %c16_i32 = arith.constant 16 : i32
    %c0_i32 = arith.constant 0 : i32
    %12 = arith.cmpi eq, %c16_i32, %c0_i32 : i32
    %c1_i32 = arith.constant 1 : i32
    %13 = arith.select %12, %c1_i32, %c16_i32 : i32
    %14 = vector.broadcast %13 : i32 to vector<256x1xi32>
    %15 = arith.remsi %11, %14 : vector<256x1xi32>
    %c0_i32_9 = arith.constant 0 : i32
    %16 = vector.broadcast %c0_i32_9 : i32 to vector<256x1xi32>
    %17 = arith.cmpi ne, %15, %16 : vector<256x1xi32>
    %c0_i32_10 = arith.constant 0 : i32
    %18 = vector.broadcast %c0_i32_10 : i32 to vector<256x1xi32>
    %19 = arith.cmpi slt, %15, %18 : vector<256x1xi32>
    %c0_i32_11 = arith.constant 0 : i32
    %20 = arith.cmpi slt, %13, %c0_i32_11 : i32
    %21 = vector.broadcast %20 : i1 to vector<256x1xi1>
    %22 = vector.broadcast %21 : vector<256x1xi1> to vector<256x1xi1>
    %23 = arith.xori %19, %22 : vector<256x1xi1>
    %24 = arith.andi %23, %17 : vector<256x1xi1>
    %25 = vector.broadcast %13 : i32 to vector<256x1xi32>
    %26 = arith.addi %15, %25 : vector<256x1xi32>
    %27 = arith.select %24, %26, %15 : vector<256x1xi1>, vector<256x1xi32>
    %c0_i32_12 = arith.constant 0 : i32
    %28 = vector.broadcast %c0_i32_12 : i32 to vector<256x1xi32>
    %29 = arith.cmpi ne, %27, %28 : vector<256x1xi32>
    %c15_i32 = arith.constant 15 : i32
    %30 = vector.broadcast %c15_i32 : i32 to vector<256x1xi32>
    %31 = arith.cmpi ne, %27, %30 : vector<256x1xi32>
    %c0_13 = arith.constant 0 : index
    %c0_14 = arith.constant 0 : index
    %c0_15 = arith.constant 0 : index
    %32 = vector.load %arg14[%c0_13, %c0_14, %c0_15] : memref<1x256x24xf32, #tpu.memory_space<vmem>>, vector<1x256x8xf32>
    %33 = vector.shape_cast %32 : vector<1x256x8xf32> to vector<256x8xf32>
    %c0_16 = arith.constant 0 : index
    %c0_17 = arith.constant 0 : index
    %34 = vector.load %arg2[%c0_16, %c0_17] : memref<1x8xf32, #tpu.memory_space<vmem>>, vector<1x8xf32>
    %35 = vector.broadcast %34 : vector<1x8xf32> to vector<256x8xf32>
    %36 = arith.mulf %33, %35 : vector<256x8xf32>
    %c0_18 = arith.constant 0 : index
    %c0_19 = arith.constant 0 : index
    %37 = vector.load %arg3[%c0_18, %c0_19] : memref<1x8xf32, #tpu.memory_space<vmem>>, vector<1x8xf32>
    %38 = vector.broadcast %37 : vector<1x8xf32> to vector<256x8xf32>
    %39 = arith.addf %36, %38 : vector<256x8xf32>
    %cst_20 = arith.constant 0.000000e+00 : f32
    %40 = vector.broadcast %cst_20 : f32 to vector<256x8xf32>
    %41 = arith.maximumf %39, %40 : vector<256x8xf32>
    %c0_21 = arith.constant 0 : index
    %c0_22 = arith.constant 0 : index
    %42 = vector.load %arg4[%c0_21, %c0_22] : memref<8x8xf32, #tpu.memory_space<vmem>>, vector<8x8xf32>
    %cst_23 = arith.constant dense<0.000000e+00> : vector<256x8xf32>
    %43 = tpu.matmul %41, %42, %cst_23 {dimension_numbers = #tpu.dot_dimension_numbers<[1], [0], [0], [1], [0, 0, 1, 1], [], []>} : vector<256x8xf32>, vector<8x8xf32>, vector<256x8xf32> -> vector<256x8xf32>
    %c0_24 = arith.constant 0 : index
    %c0_25 = arith.constant 0 : index
    %44 = vector.load %arg5[%c0_24, %c0_25] : memref<1x8xf32, #tpu.memory_space<vmem>>, vector<1x8xf32>
    %45 = vector.broadcast %44 : vector<1x8xf32> to vector<256x8xf32>
    %46 = arith.mulf %43, %45 : vector<256x8xf32>
    %c0_26 = arith.constant 0 : index
    %c0_27 = arith.constant 0 : index
    %47 = vector.load %arg6[%c0_26, %c0_27] : memref<1x8xf32, #tpu.memory_space<vmem>>, vector<1x8xf32>
    %48 = vector.broadcast %47 : vector<1x8xf32> to vector<256x8xf32>
    %49 = arith.addf %46, %48 : vector<256x8xf32>
    %cst_28 = arith.constant 0.000000e+00 : f32
    %50 = vector.broadcast %cst_28 : f32 to vector<256x8xf32>
    %51 = arith.maximumf %49, %50 : vector<256x8xf32>
    %c40 = arith.constant 40 : index
    %c0_29 = arith.constant 0 : index
    %52 = vector.load %arg15[%c40, %c0_29] : memref<304x24xf32, #tpu.memory_space<vmem>>, vector<256x8xf32>
    tpu.vector_store %arg15[%c40, %c0_29], %51 {strides = array<i32>} : memref<304x24xf32, #tpu.memory_space<vmem>>, vector<256x8xf32>,
    %c24 = arith.constant 24 : index
    %c8_30 = arith.constant 8 : index
    %53 = vector.load %arg15[%c24, %c8_30] : memref<304x24xf32, #tpu.memory_space<vmem>>, vector<256x8xf32>
    tpu.vector_store %arg15[%c24, %c8_30], %51 {strides = array<i32>} : memref<304x24xf32, #tpu.memory_space<vmem>>, vector<256x8xf32>,
    %c8_31 = arith.constant 8 : index
    %c16_32 = arith.constant 16 : index
    %54 = vector.load %arg15[%c8_31, %c16_32] : memref<304x24xf32, #tpu.memory_space<vmem>>, vector<256x8xf32>
    tpu.vector_store %arg15[%c8_31, %c16_32], %51 {strides = array<i32>} : memref<304x24xf32, #tpu.memory_space<vmem>>, vector<256x8xf32>,
    %c23_33 = arith.constant 23 : index
    %c0_34 = arith.constant 0 : index
    %55 = vector.load %arg15[%c23_33, %c0_34] : memref<304x24xf32, #tpu.memory_space<vmem>>, vector<256x24xf32>
    %c0_35 = arith.constant 0 : index
    %c0_36 = arith.constant 0 : index
    %c0_37 = arith.constant 0 : index
    %56 = vector.load %arg7[%c0_35, %c0_36, %c0_37] : memref<3x24x8xf32, #tpu.memory_space<vmem>>, vector<1x24x8xf32>
    %57 = vector.shape_cast %56 : vector<1x24x8xf32> to vector<24x8xf32>
    %cst_38 = arith.constant dense<0.000000e+00> : vector<256x8xf32>
    %58 = tpu.matmul %55, %57, %cst_38 {dimension_numbers = #tpu.dot_dimension_numbers<[1], [0], [0], [1], [0, 0, 1, 1], [], []>} : vector<256x24xf32>, vector<24x8xf32>, vector<256x8xf32> -> vector<256x8xf32>
    %cst_39 = arith.constant 0.000000e+00 : f32
    %59 = vector.shape_cast %29 : vector<256x1xi1> to vector<256x1xi1>
    %60 = vector.broadcast %59 : vector<256x1xi1> to vector<256x8xi1>
    %61 = vector.broadcast %cst_39 : f32 to vector<256x8xf32>
    %62 = arith.select %60, %58, %61 : vector<256x8xi1>, vector<256x8xf32>
    %c24_40 = arith.constant 24 : index
    %c0_41 = arith.constant 0 : index
    %63 = vector.load %arg15[%c24_40, %c0_41] : memref<304x24xf32, #tpu.memory_space<vmem>>, vector<256x24xf32>
    %c1 = arith.constant 1 : index
    %c0_42 = arith.constant 0 : index
    %c0_43 = arith.constant 0 : index
    %64 = vector.load %arg7[%c1, %c0_42, %c0_43] : memref<3x24x8xf32, #tpu.memory_space<vmem>>, vector<1x24x8xf32>
    %65 = vector.shape_cast %64 : vector<1x24x8xf32> to vector<24x8xf32>
    %cst_44 = arith.constant dense<0.000000e+00> : vector<256x8xf32>
    %66 = tpu.matmul %63, %65, %cst_44 {dimension_numbers = #tpu.dot_dimension_numbers<[1], [0], [0], [1], [0, 0, 1, 1], [], []>} : vector<256x24xf32>, vector<24x8xf32>, vector<256x8xf32> -> vector<256x8xf32>
    %67 = arith.addf %62, %66 : vector<256x8xf32>
    %c25 = arith.constant 25 : index
    %c0_45 = arith.constant 0 : index
    %68 = vector.load %arg15[%c25, %c0_45] : memref<304x24xf32, #tpu.memory_space<vmem>>, vector<256x24xf32>
    %c2 = arith.constant 2 : index
    %c0_46 = arith.constant 0 : index
    %c0_47 = arith.constant 0 : index
    %69 = vector.load %arg7[%c2, %c0_46, %c0_47] : memref<3x24x8xf32, #tpu.memory_space<vmem>>, vector<1x24x8xf32>
    %70 = vector.shape_cast %69 : vector<1x24x8xf32> to vector<24x8xf32>
    %cst_48 = arith.constant dense<0.000000e+00> : vector<256x8xf32>
    %71 = tpu.matmul %68, %70, %cst_48 {dimension_numbers = #tpu.dot_dimension_numbers<[1], [0], [0], [1], [0, 0, 1, 1], [], []>} : vector<256x24xf32>, vector<24x8xf32>, vector<256x8xf32> -> vector<256x8xf32>
    %cst_49 = arith.constant 0.000000e+00 : f32
    %72 = vector.shape_cast %31 : vector<256x1xi1> to vector<256x1xi1>
    %73 = vector.broadcast %72 : vector<256x1xi1> to vector<256x8xi1>
    %74 = vector.broadcast %cst_49 : f32 to vector<256x8xf32>
    %75 = arith.select %73, %71, %74 : vector<256x8xi1>, vector<256x8xf32>
    %76 = arith.addf %67, %75 : vector<256x8xf32>
    %c0_50 = arith.constant 0 : index
    %c0_51 = arith.constant 0 : index
    %c8_52 = arith.constant 8 : index
    %77 = vector.load %arg14[%c0_50, %c0_51, %c8_52] : memref<1x256x24xf32, #tpu.memory_space<vmem>>, vector<1x256x8xf32>
    %78 = vector.shape_cast %77 : vector<1x256x8xf32> to vector<256x8xf32>
    %79 = vector.shape_cast %76 : vector<256x8xf32> to vector<1x256x8xf32>
    tpu.vector_store %arg14[%c0_50, %c0_51, %c8_52], %79 {strides = array<i32>} : memref<1x256x24xf32, #tpu.memory_space<vmem>>, vector<1x256x8xf32>,
    %c0_53 = arith.constant 0 : index
    %c0_54 = arith.constant 0 : index
    %c0_55 = arith.constant 0 : index
    %80 = vector.load %arg14[%c0_53, %c0_54, %c0_55] : memref<1x256x24xf32, #tpu.memory_space<vmem>>, vector<1x256x16xf32>
    %81 = vector.shape_cast %80 : vector<1x256x16xf32> to vector<256x16xf32>
    %c0_56 = arith.constant 0 : index
    %c0_57 = arith.constant 0 : index
    %82 = vector.load %arg8[%c0_56, %c0_57] : memref<1x16xf32, #tpu.memory_space<vmem>>, vector<1x16xf32>
    %83 = vector.broadcast %82 : vector<1x16xf32> to vector<256x16xf32>
    %84 = arith.mulf %81, %83 : vector<256x16xf32>
    %c0_58 = arith.constant 0 : index
    %c0_59 = arith.constant 0 : index
    %85 = vector.load %arg9[%c0_58, %c0_59] : memref<1x16xf32, #tpu.memory_space<vmem>>, vector<1x16xf32>
    %86 = vector.broadcast %85 : vector<1x16xf32> to vector<256x16xf32>
    %87 = arith.addf %84, %86 : vector<256x16xf32>
    %cst_60 = arith.constant 0.000000e+00 : f32
    %88 = vector.broadcast %cst_60 : f32 to vector<256x16xf32>
    %89 = arith.maximumf %87, %88 : vector<256x16xf32>
    %c0_61 = arith.constant 0 : index
    %c0_62 = arith.constant 0 : index
    %90 = vector.load %arg10[%c0_61, %c0_62] : memref<16x8xf32, #tpu.memory_space<vmem>>, vector<16x8xf32>
    %cst_63 = arith.constant dense<0.000000e+00> : vector<256x8xf32>
    %91 = tpu.matmul %89, %90, %cst_63 {dimension_numbers = #tpu.dot_dimension_numbers<[1], [0], [0], [1], [0, 0, 1, 1], [], []>} : vector<256x16xf32>, vector<16x8xf32>, vector<256x8xf32> -> vector<256x8xf32>
    %c0_64 = arith.constant 0 : index
    %c0_65 = arith.constant 0 : index
    %92 = vector.load %arg11[%c0_64, %c0_65] : memref<1x8xf32, #tpu.memory_space<vmem>>, vector<1x8xf32>
    %93 = vector.broadcast %92 : vector<1x8xf32> to vector<256x8xf32>
    %94 = arith.mulf %91, %93 : vector<256x8xf32>
    %c0_66 = arith.constant 0 : index
    %c0_67 = arith.constant 0 : index
    %95 = vector.load %arg12[%c0_66, %c0_67] : memref<1x8xf32, #tpu.memory_space<vmem>>, vector<1x8xf32>
    %96 = vector.broadcast %95 : vector<1x8xf32> to vector<256x8xf32>
    %97 = arith.addf %94, %96 : vector<256x8xf32>
    %cst_68 = arith.constant 0.000000e+00 : f32
    %98 = vector.broadcast %cst_68 : f32 to vector<256x8xf32>
    %99 = arith.maximumf %97, %98 : vector<256x8xf32>
    %c40_69 = arith.constant 40 : index
    %c0_70 = arith.constant 0 : index
    %100 = vector.load %arg15[%c40_69, %c0_70] : memref<304x24xf32, #tpu.memory_space<vmem>>, vector<256x8xf32>
    tpu.vector_store %arg15[%c40_69, %c0_70], %99 {strides = array<i32>} : memref<304x24xf32, #tpu.memory_space<vmem>>, vector<256x8xf32>,
    %c24_71 = arith.constant 24 : index
    %c8_72 = arith.constant 8 : index
    %101 = vector.load %arg15[%c24_71, %c8_72] : memref<304x24xf32, #tpu.memory_space<vmem>>, vector<256x8xf32>
    tpu.vector_store %arg15[%c24_71, %c8_72], %99 {strides = array<i32>} : memref<304x24xf32, #tpu.memory_space<vmem>>, vector<256x8xf32>,
    %c8_73 = arith.constant 8 : index
    %c16_74 = arith.constant 16 : index
    %102 = vector.load %arg15[%c8_73, %c16_74] : memref<304x24xf32, #tpu.memory_space<vmem>>, vector<256x8xf32>
    tpu.vector_store %arg15[%c8_73, %c16_74], %99 {strides = array<i32>} : memref<304x24xf32, #tpu.memory_space<vmem>>, vector<256x8xf32>,
    %c23_75 = arith.constant 23 : index
    %c0_76 = arith.constant 0 : index
    %103 = vector.load %arg15[%c23_75, %c0_76] : memref<304x24xf32, #tpu.memory_space<vmem>>, vector<256x24xf32>
    %c0_77 = arith.constant 0 : index
    %c0_78 = arith.constant 0 : index
    %c0_79 = arith.constant 0 : index
    %104 = vector.load %arg13[%c0_77, %c0_78, %c0_79] : memref<3x24x8xf32, #tpu.memory_space<vmem>>, vector<1x24x8xf32>
    %105 = vector.shape_cast %104 : vector<1x24x8xf32> to vector<24x8xf32>
    %cst_80 = arith.constant dense<0.000000e+00> : vector<256x8xf32>
    %106 = tpu.matmul %103, %105, %cst_80 {dimension_numbers = #tpu.dot_dimension_numbers<[1], [0], [0], [1], [0, 0, 1, 1], [], []>} : vector<256x24xf32>, vector<24x8xf32>, vector<256x8xf32> -> vector<256x8xf32>
    %cst_81 = arith.constant 0.000000e+00 : f32
    %107 = vector.shape_cast %29 : vector<256x1xi1> to vector<256x1xi1>
    %108 = vector.broadcast %107 : vector<256x1xi1> to vector<256x8xi1>
    %109 = vector.broadcast %cst_81 : f32 to vector<256x8xf32>
    %110 = arith.select %108, %106, %109 : vector<256x8xi1>, vector<256x8xf32>
    %c24_82 = arith.constant 24 : index
    %c0_83 = arith.constant 0 : index
    %111 = vector.load %arg15[%c24_82, %c0_83] : memref<304x24xf32, #tpu.memory_space<vmem>>, vector<256x24xf32>
    %c1_84 = arith.constant 1 : index
    %c0_85 = arith.constant 0 : index
    %c0_86 = arith.constant 0 : index
    %112 = vector.load %arg13[%c1_84, %c0_85, %c0_86] : memref<3x24x8xf32, #tpu.memory_space<vmem>>, vector<1x24x8xf32>
    %113 = vector.shape_cast %112 : vector<1x24x8xf32> to vector<24x8xf32>
    %cst_87 = arith.constant dense<0.000000e+00> : vector<256x8xf32>
    %114 = tpu.matmul %111, %113, %cst_87 {dimension_numbers = #tpu.dot_dimension_numbers<[1], [0], [0], [1], [0, 0, 1, 1], [], []>} : vector<256x24xf32>, vector<24x8xf32>, vector<256x8xf32> -> vector<256x8xf32>
    %115 = arith.addf %110, %114 : vector<256x8xf32>
    %c25_88 = arith.constant 25 : index
    %c0_89 = arith.constant 0 : index
    %116 = vector.load %arg15[%c25_88, %c0_89] : memref<304x24xf32, #tpu.memory_space<vmem>>, vector<256x24xf32>
    %c2_90 = arith.constant 2 : index
    %c0_91 = arith.constant 0 : index
    %c0_92 = arith.constant 0 : index
    %117 = vector.load %arg13[%c2_90, %c0_91, %c0_92] : memref<3x24x8xf32, #tpu.memory_space<vmem>>, vector<1x24x8xf32>
    %118 = vector.shape_cast %117 : vector<1x24x8xf32> to vector<24x8xf32>
    %cst_93 = arith.constant dense<0.000000e+00> : vector<256x8xf32>
    %119 = tpu.matmul %116, %118, %cst_93 {dimension_numbers = #tpu.dot_dimension_numbers<[1], [0], [0], [1], [0, 0, 1, 1], [], []>} : vector<256x24xf32>, vector<24x8xf32>, vector<256x8xf32> -> vector<256x8xf32>
    %cst_94 = arith.constant 0.000000e+00 : f32
    %120 = vector.shape_cast %31 : vector<256x1xi1> to vector<256x1xi1>
    %121 = vector.broadcast %120 : vector<256x1xi1> to vector<256x8xi1>
    %122 = vector.broadcast %cst_94 : f32 to vector<256x8xf32>
    %123 = arith.select %121, %119, %122 : vector<256x8xi1>, vector<256x8xf32>
    %124 = arith.addf %115, %123 : vector<256x8xf32>
    %c0_95 = arith.constant 0 : index
    %c0_96 = arith.constant 0 : index
    %c16_97 = arith.constant 16 : index
    %125 = vector.load %arg14[%c0_95, %c0_96, %c16_97] : memref<1x256x24xf32, #tpu.memory_space<vmem>>, vector<1x256x8xf32>
    %126 = vector.shape_cast %125 : vector<1x256x8xf32> to vector<256x8xf32>
    %127 = vector.shape_cast %124 : vector<256x8xf32> to vector<1x256x8xf32>
    tpu.vector_store %arg14[%c0_95, %c0_96, %c16_97], %127 {strides = array<i32>} : memref<1x256x24xf32, #tpu.memory_space<vmem>>, vector<1x256x8xf32>,
    return
  }
  func.func @transform_0(%arg0: i32) -> (i32, i32, i32) {
    %c0_i32 = arith.constant 0 : i32
    %c0_i32_0 = arith.constant 0 : i32
    %c0_i32_1 = arith.constant 0 : i32
    return %arg0, %c0_i32, %c0_i32_0 : i32, i32, i32
  }
  func.func @transform_1(%arg0: i32) -> (i32, i32) {
    %c0_i32 = arith.constant 0 : i32
    %c0_i32_0 = arith.constant 0 : i32
    %c0_i32_1 = arith.constant 0 : i32
    return %c0_i32, %c0_i32_0 : i32, i32
  }
  func.func @transform_2(%arg0: i32) -> (i32, i32) {
    %c0_i32 = arith.constant 0 : i32
    %c0_i32_0 = arith.constant 0 : i32
    %c0_i32_1 = arith.constant 0 : i32
    return %c0_i32, %c0_i32_0 : i32, i32
  }
  func.func @transform_3(%arg0: i32) -> (i32, i32) {
    %c0_i32 = arith.constant 0 : i32
    %c0_i32_0 = arith.constant 0 : i32
    %c0_i32_1 = arith.constant 0 : i32
    return %c0_i32, %c0_i32_0 : i32, i32
  }
  func.func @transform_4(%arg0: i32) -> (i32, i32) {
    %c0_i32 = arith.constant 0 : i32
    %c0_i32_0 = arith.constant 0 : i32
    %c0_i32_1 = arith.constant 0 : i32
    return %c0_i32, %c0_i32_0 : i32, i32
  }
  func.func @transform_5(%arg0: i32) -> (i32, i32) {
    %c0_i32 = arith.constant 0 : i32
    %c0_i32_0 = arith.constant 0 : i32
    %c0_i32_1 = arith.constant 0 : i32
    return %c0_i32, %c0_i32_0 : i32, i32
  }
  func.func @transform_6(%arg0: i32) -> (i32, i32, i32) {
    %c0_i32 = arith.constant 0 : i32
    %c0_i32_0 = arith.constant 0 : i32
    %c0_i32_1 = arith.constant 0 : i32
    %c0_i32_2 = arith.constant 0 : i32
    return %c0_i32, %c0_i32_0, %c0_i32_1 : i32, i32, i32
  }
  func.func @transform_7(%arg0: i32) -> (i32, i32) {
    %c0_i32 = arith.constant 0 : i32
    %c0_i32_0 = arith.constant 0 : i32
    %c0_i32_1 = arith.constant 0 : i32
    return %c0_i32, %c0_i32_0 : i32, i32
  }
  func.func @transform_8(%arg0: i32) -> (i32, i32) {
    %c0_i32 = arith.constant 0 : i32
    %c0_i32_0 = arith.constant 0 : i32
    %c0_i32_1 = arith.constant 0 : i32
    return %c0_i32, %c0_i32_0 : i32, i32
  }
  func.func @transform_9(%arg0: i32) -> (i32, i32) {
    %c0_i32 = arith.constant 0 : i32
    %c0_i32_0 = arith.constant 0 : i32
    %c0_i32_1 = arith.constant 0 : i32
    return %c0_i32, %c0_i32_0 : i32, i32
  }
  func.func @transform_10(%arg0: i32) -> (i32, i32) {
    %c0_i32 = arith.constant 0 : i32
    %c0_i32_0 = arith.constant 0 : i32
    %c0_i32_1 = arith.constant 0 : i32
    return %c0_i32, %c0_i32_0 : i32, i32
  }
  func.func @transform_11(%arg0: i32) -> (i32, i32) {
    %c0_i32 = arith.constant 0 : i32
    %c0_i32_0 = arith.constant 0 : i32
    %c0_i32_1 = arith.constant 0 : i32
    return %c0_i32, %c0_i32_0 : i32, i32
  }
  func.func @transform_12(%arg0: i32) -> (i32, i32, i32) {
    %c0_i32 = arith.constant 0 : i32
    %c0_i32_0 = arith.constant 0 : i32
    %c0_i32_1 = arith.constant 0 : i32
    %c0_i32_2 = arith.constant 0 : i32
    return %c0_i32, %c0_i32_0, %c0_i32_1 : i32, i32, i32
  }
  func.func @transform_13(%arg0: i32) -> (i32, i32, i32) {
    %c0_i32 = arith.constant 0 : i32
    %c0_i32_0 = arith.constant 0 : i32
    %c0_i32_1 = arith.constant 0 : i32
    return %arg0, %c0_i32, %c0_i32_0 : i32, i32, i32
  }
}

</mosaic_0001>

<bundles_post_ra>
// kernel: tpu_custom_call.1
= control target key start
LH: loop header
LB: loop body
LE: loop exit
PB: predicated region body
PF: predicated region fallthrough
CT: control target
= control target key end

     0   :  { %s6802_s25 = smov 0   ;;  %s8760_s0 = inlined_call_operand.vmem [shape: f32[2,256,8], index: 0, kind: input, shape index: {}]   ;;  %s8761_s1 = inlined_call_operand.vmem [shape: f32[1,8], index: 1, kind: input, shape index: {}]   ;;  %s8762_s2 = inlined_call_operand.vmem [shape: f32[1,8], index: 2, kind: input, shape index: {}]   ;;  %s8763_s3 = inlined_call_operand.vmem [shape: f32[8,8], index: 3, kind: input, shape index: {}]   ;;  %s8764_s4 = inlined_call_operand.vmem [shape: f32[1,8], index: 4, kind: input, shape index: {}]   ;;  %s8765_s5 = inlined_call_operand.vmem [shape: f32[1,8], index: 5, kind: input, shape index: {}]   ;;  %s8766_s6 = inlined_call_operand.vmem [shape: f32[3,24,8], index: 6, kind: input, shape index: {}]   ;;  %s8767_s7 = inlined_call_operand.vmem [shape: f32[1,16], index: 7, kind: input, shape index: {}]   ;;  %s8768_s8 = inlined_call_operand.vmem [shape: f32[1,16], index: 8, kind: input, shape index: {}]   ;;  %s8769_s9 = inlined_call_operand.vmem [shape: f32[16,8], index: 9, kind: input, shape index: {}]   ;;  %s8770_s10 = inlined_call_operand.vmem [shape: f32[1,8], index: 10, kind: input, shape index: {}]   ;;  %s8771_s11 = inlined_call_operand.vmem [shape: f32[1,8], index: 11, kind: input, shape index: {}]   ;;  %s8772_s12 = inlined_call_operand.vmem [shape: f32[3,24,8], index: 12, kind: input, shape index: {}]   ;;  %s8773_s13 = inlined_call_operand.vmem [shape: f32[2,256,24], index: 13, kind: output, shape index: {}]  }
   0x1 LB: > { %s5690_s26 = sadd.s32 4294967295, %s6727_s25   ;;  %p5694_p0 = scmp.ge.s32.totalorder %s6727_s25, 1  ;;  %s6727_s25 = sphi %s6802_s25, %s23_s25  }
   0x2   : > { %p387_p1 = scmp.lt.s32.totalorder %s6727_s25, 3 }
   0x4   : > { %p388_p2 = pnand %p5694_p0, %p387_p1 }
   0x5   : > { %v1141_v0 = vld [vmem:[%s8763_s3] sm:$0xff] (!%p388_p2)  ;;  %p431_p3 = scmp.lt.s32.totalorder (!%p388_p2), %s5690_s26, 1  ;;  %vm8776_vm0 = vcmask (!%p388_p2), 64512   ;;  %vm8775_vm1 = vcmask (!%p388_p2), 195712   ;;  %vm446_vm2 = vcmask (!%p388_p2), 122944   ;;  %vm452_vm3 = vcmask (!%p388_p2), 188544  }
   0x6   : > { %391 = sbr.rel (%p388_p2) target bundleno = 1711 (0x6af), region = 72  ;;  %6256 = vmatprep.subr.mxu0 (!%p388_p2), %v1141_v0  ;;  %v6856_v13 = vld [vmem:[%s8761_s1] ss:$0 sm:$0xff] (!%p388_p2)  ;;  %vm444_vm4 = vcmask (!%p388_p2), 57344   ;;  %s6730_s20 = smov (!%p388_p2), 16   ;;  %vm8777_vm5 = vcmask (!%p388_p2), 130112  }
   0x7   : > { %6257 = vmatpush3.msra.mxu0 (!%p388_p2), %v1141_v0  ;;  %v6879_v20 = vld [vmem:[%s8762_s2] ss:$0 sm:$0xff] (!%p388_p2)  ;;  %s6731_s21 = smov (!%p388_p2), 8   ;;  %vm8774_vm6 = vcmask (!%p388_p2), 195584  }
   0xd   : > { %s9086_s26 = smov (!%p431_p3, %s5690_s26), 1 }
   0xe   : > { %s5977_s29 = sshll.u32 %s9086_s26, 8 }
   0xf   : > { %s6816_s15 = scalar_lea.vmem %s8760_s0, %s5977_s29  ;;  %s6821_s18 = scalar_lea.vmem %s8773_s13, %s5977_s29 }
  0x10   : > { %v454_v1 = vld [vmem:[%s6816_s15] sm:$0xff]  ;;  %v455_v2 = vld [vmem:[%s6816_s15 + $0x8] sm:$0xff]  ;;  %v456_v3 = vld [vmem:[%s6816_s15 + $0x10] sm:$0xff] }
  0x11   : > { %486 = vst.msk [vmem:[%s6821_s18] sm:$0xff] %vm8776_vm0, %v454_v1  ;;  %487 = vst.msk [vmem:[%s6821_s18 + $0x8] sm:$0xff] %vm8776_vm0, %v455_v2  ;;  %v457_v4 = vld [vmem:[%s6816_s15 + $0x18] sm:$0xff]  ;;  %v458_v5 = vld [vmem:[%s6816_s15 + $0x20] sm:$0xff] }
  0x12   : > { %488 = vst.msk [vmem:[%s6821_s18 + $0x10] sm:$0xff] %vm8776_vm0, %v456_v3  ;;  %v459_v6 = vld [vmem:[%s6816_s15 + $0x28] sm:$0xff]  ;;  %489 = vst.msk [vmem:[%s6821_s18 + $0x18] sm:$0xff] %vm8776_vm0, %v457_v4  ;;  %v460_v7 = vld [vmem:[%s6816_s15 + $0x30] sm:$0xff] }
  0x13   : > { %490 = vst.msk [vmem:[%s6821_s18 + $0x20] sm:$0xff] %vm8776_vm0, %v458_v5  ;;  %491 = vst.msk [vmem:[%s6821_s18 + $0x28] sm:$0xff] %vm8776_vm0, %v459_v6  ;;  %v461_v8 = vld [vmem:[%s6816_s15 + $0x38] sm:$0xff]  ;;  %v462_v9 = vld [vmem:[%s6816_s15 + $0x40] sm:$0xff] }
  0x14   : > { %492 = vst.msk [vmem:[%s6821_s18 + $0x30] sm:$0xff] %vm8776_vm0, %v460_v7  ;;  %493 = vst.msk [vmem:[%s6821_s18 + $0x38] sm:$0xff] %vm8776_vm0, %v461_v8  ;;  %v463_v10 = vld [vmem:[%s6816_s15 + $0x48] sm:$0xff]  ;;  %v464_v11 = vld [vmem:[%s6816_s15 + $0x50] sm:$0xff] }
  0x15   : > { %494 = vst.msk [vmem:[%s6821_s18 + $0x40] sm:$0xff] %vm8776_vm0, %v462_v9  ;;  %v465_v12 = vld [vmem:[%s6816_s15 + $0x58] sm:$0xff]  ;;  %495 = vst.msk [vmem:[%s6821_s18 + $0x48] sm:$0xff] %vm8776_vm0, %v463_v10  ;;  %v466_v14 = vld [vmem:[%s6816_s15 + $0x60] sm:$0xff] }
  0x16   : > { %496 = vst.msk [vmem:[%s6821_s18 + $0x50] sm:$0xff] %vm8776_vm0, %v464_v11  ;;  %497 = vst.msk [vmem:[%s6821_s18 + $0x58] sm:$0xff] %vm8776_vm0, %v465_v12  ;;  %v467_v15 = vld [vmem:[%s6816_s15 + $0x68] sm:$0xff]  ;;  %v468_v16 = vld [vmem:[%s6816_s15 + $0x70] sm:$0xff] }
  0x17   : > { %498 = vst.msk [vmem:[%s6821_s18 + $0x60] sm:$0xff] %vm8776_vm0, %v466_v14  ;;  %499 = vst.msk [vmem:[%s6821_s18 + $0x68] sm:$0xff] %vm8776_vm0, %v467_v15  ;;  %v469_v17 = vld [vmem:[%s6816_s15 + $0x78] sm:$0xff]  ;;  %v470_v18 = vld [vmem:[%s6816_s15 + $0x80] sm:$0xff] }
  0x18   : > { %500 = vst.msk [vmem:[%s6821_s18 + $0x70] sm:$0xff] %vm8776_vm0, %v468_v16  ;;  %v471_v19 = vld [vmem:[%s6816_s15 + $0x88] sm:$0xff]  ;;  %501 = vst.msk [vmem:[%s6821_s18 + $0x78] sm:$0xff] %vm8776_vm0, %v469_v17  ;;  %v472_v21 = vld [vmem:[%s6816_s15 + $0x90] sm:$0xff] }
  0x19   : > { %502 = vst.msk [vmem:[%s6821_s18 + $0x80] sm:$0xff] %vm8776_vm0, %v470_v18  ;;  %503 = vst.msk [vmem:[%s6821_s18 + $0x88] sm:$0xff] %vm8776_vm0, %v471_v19  ;;  %v473_v22 = vld [vmem:[%s6816_s15 + $0x98] sm:$0xff]  ;;  %v474_v23 = vld [vmem:[%s6816_s15 + $0xa0] sm:$0xff] }
  0x1a   : > { %504 = vst.msk [vmem:[%s6821_s18 + $0x90] sm:$0xff] %vm8776_vm0, %v472_v21  ;;  %505 = vst.msk [vmem:[%s6821_s18 + $0x98] sm:$0xff] %vm8776_vm0, %v473_v22  ;;  %v475_v24 = vld [vmem:[%s6816_s15 + $0xa8] sm:$0xff]  ;;  %v476_v25 = vld [vmem:[%s6816_s15 + $0xb0] sm:$0xff] }
  0x1b   : > { %506 = vst.msk [vmem:[%s6821_s18 + $0xa0] sm:$0xff] %vm8776_vm0, %v474_v23  ;;  %v477_v26 = vld [vmem:[%s6816_s15 + $0xb8] sm:$0xff]  ;;  %v999_v27 = vld [vmem:[%s6821_s18] sm:$0xff]  ;;  %v1000_v28 = vld [vmem:[%s6821_s18 + $0x8] sm:$0xff] }
  0x1c   : > { %v1001_v29 = vld [vmem:[%s6821_s18 + $0x10] sm:$0xff]  ;;  %507 = vst.msk [vmem:[%s6821_s18 + $0xa8] sm:$0xff] %vm8776_vm0, %v475_v24  ;;  %508 = vst.msk [vmem:[%s6821_s18 + $0xb0] sm:$0xff] %vm8776_vm0, %v476_v25  ;;  %v1038_v30 = vmul.f32 %v6856_v13, %v999_v27  ;;  %v1039_v31 = vmul.f32 %v6856_v13, %v1000_v28  ;;  %v1002_v33 = vld [vmem:[%s6821_s18 + $0x18] sm:$0xff] }
  0x1d   : > { %509 = vst.msk [vmem:[%s6821_s18 + $0xb8] sm:$0xff] %vm8776_vm0, %v477_v26  ;;  %v1040_v32 = vmul.f32 %v6856_v13, %v1001_v29  ;;  %v1003_v34 = vld [vmem:[%s6821_s18 + $0x20] sm:$0xff]  ;;  %v1004_v35 = vld [vmem:[%s6821_s18 + $0x28] sm:$0xff]  ;;  %v1041_v36 = vmul.f32 %v6856_v13, %v1002_v33  ;;  %v1005_v38 = vld [vmem:[%s6821_s18 + $0x30] sm:$0xff] }
  0x1e   : > { %v1042_v37 = vmul.f32 %v6856_v13, %v1003_v34  ;;  %v1077_v39 = vadd.f32 %v6879_v20, %v1038_v30  ;;  %v1078_v40 = vadd.f32 %v6879_v20, %v1039_v31  ;;  %v1043_v43 = vmul.f32 %v6856_v13, %v1004_v35  ;;  %v1006_v49 = vld [vmem:[%s6821_s18 + $0x38] sm:$0xff]  ;;  %v1007_v50 = vld [vmem:[%s6821_s18 + $0x40] sm:$0xff]  ;;  %v1008_v51 = vld [vmem:[%s6821_s18 + $0x48] sm:$0xff] }
  0x1f   : > { %v1079_v41 = vadd.f32 %v6879_v20, %v1040_v32  ;;  %v1080_v42 = vadd.f32 %v6879_v20, %v1041_v36  ;;  %v1044_v44 = vmul.f32 %v6856_v13, %v1005_v38  ;;  %v1045_v54 = vmul.f32 %v6856_v13, %v1006_v49  ;;  %v478_v55 = vld [vmem:[%s6816_s15 + $0xc0] sm:$0xff]  ;;  %v479_v56 = vld [vmem:[%s6816_s15 + $0xc8] sm:$0xff]  ;;  %v480_v57 = vld [vmem:[%s6816_s15 + $0xd0] sm:$0xff] }
  0x20   : > { %v1109_v45 = vmax.f32 %v1077_v39, 0.0  ;;  %v1110_v46 = vmax.f32 %v1078_v40, 0.0  ;;  %v1081_v48 = vadd.f32 %v6879_v20, %v1042_v37  ;;  %v1082_v53 = vadd.f32 %v6879_v20, %v1043_v43  ;;  %510 = vst.msk [vmem:[%s6821_s18 + $0xc0] sm:$0xff] %vm8776_vm0, %v478_v55  ;;  %511 = vst.msk [vmem:[%s6821_s18 + $0xc8] sm:$0xff] %vm8776_vm0, %v479_v56  ;;  %v481_v61 = vld [vmem:[%s6816_s15 + $0xd8] sm:$0xff]  ;;  %v482_v62 = vld [vmem:[%s6816_s15 + $0xe0] sm:$0xff] }
  0x21   : > { %v1111_v47 = vmax.f32 %v1079_v41, 0.0  ;;  %v1112_v52 = vmax.f32 %v1080_v42, 0.0  ;;  %v1083_v59 = vadd.f32 %v6879_v20, %v1044_v44  ;;  %v1046_v60 = vmul.f32 %v6856_v13, %v1007_v50  ;;  %512 = vst.msk [vmem:[%s6821_s18 + $0xd0] sm:$0xff] %vm8776_vm0, %v480_v57  ;;  %v483_v63 = vld [vmem:[%s6816_s15 + $0xe8] sm:$0xff]  ;;  %v1009_v0 = vld [vmem:[%s6821_s18 + $0x50] sm:$0xff]  ;;  %513 = vst.msk [vmem:[%s6821_s18 + $0xd8] sm:$0xff] %vm8776_vm0, %v481_v61 }
  0x22   : > { %6258 = vmatprep.mubr.msk.f32.mxu0 %vm8776_vm0, %v1109_v45  ;;  %v1113_v58 = vmax.f32 %v1081_v48, 0.0  ;;  %514 = vst.msk [vmem:[%s6821_s18 + $0xe0] sm:$0xff] %vm8776_vm0, %v482_v62  ;;  %515 = vst.msk [vmem:[%s6821_s18 + $0xe8] sm:$0xff] %vm8776_vm0, %v483_v63  ;;  %v484_v1 = vld [vmem:[%s6816_s15 + $0xf0] sm:$0xff]  ;;  %v485_v2 = vld [vmem:[%s6816_s15 + $0xf8] sm:$0xff]  ;;  %v1114_v3 = vmax.f32 %v1082_v53, 0.0  ;;  %v1084_v4 = vadd.f32 %v6879_v20, %v1045_v54  ;;  %v1047_v5 = vmul.f32 %v6856_v13, %v1008_v51 }
  0x23   : > { %6259 = vmatmul.mubr.msk.f32.vlgmr.msra.gmra.mrb[0].mxu0 %vm8776_vm0, %v1110_v46  ;;  %516 = vst.msk [vmem:[%s6821_s18 + $0xf0] sm:$0xff] %vm8776_vm0, %v484_v1  ;;  %517 = vst.msk [vmem:[%s6821_s18 + $0xf8] sm:$0xff] %vm8776_vm0, %v485_v2  ;;  %v1115_v6 = vmax.f32 %v1083_v59, 0.0  ;;  %v1085_v7 = vadd.f32 %v6879_v20, %v1046_v60  ;;  %v1048_v8 = vmul.f32 %v6856_v13, %v1009_v0  ;;  %v1010_v9 = vld [vmem:[%s6821_s18 + $0x58] sm:$0xff]  ;;  %v1011_v10 = vld [vmem:[%s6821_s18 + $0x60] sm:$0xff] }
  0x24   : > { %6261 = vmatprep.mubr.msk.f32.mxu0 %vm8776_vm0, %v1111_v47  ;;  %v1116_v11 = vmax.f32 %v1084_v4, 0.0  ;;  %v1086_v12 = vadd.f32 %v6879_v20, %v1047_v5  ;;  %v1049_v14 = vmul.f32 %v6856_v13, %v1010_v9  ;;  %v1050_v17 = vmul.f32 %v6856_v13, %v1011_v10  ;;  %v1012_v18 = vld [vmem:[%s6821_s18 + $0x68] sm:$0xff]  ;;  %v1013_v19 = vld [vmem:[%s6821_s18 + $0x70] sm:$0xff]  ;;  %v1014_v27 = vld [vmem:[%s6821_s18 + $0x78] sm:$0xff] }
  0x25   : > { %v1117_v15 = vmax.f32 %v1085_v7, 0.0  ;;  %v1087_v16 = vadd.f32 %v6879_v20, %v1048_v8  ;;  %v1051_v23 = vmul.f32 %v6856_v13, %v1012_v18  ;;  %v1052_v26 = vmul.f32 %v6856_v13, %v1013_v19  ;;  %v1015_v28 = vld [vmem:[%s6821_s18 + $0x80] sm:$0xff]  ;;  %v1016_v35 = vld [vmem:[%s6821_s18 + $0x88] sm:$0xff]  ;;  %v1017_v36 = vld [vmem:[%s6821_s18 + $0x90] sm:$0xff] }
  0x26   : > { %v1118_v21 = vmax.f32 %v1086_v12, 0.0  ;;  %v1088_v22 = vadd.f32 %v6879_v20, %v1049_v14  ;;  %v1089_v25 = vadd.f32 %v6879_v20, %v1050_v17  ;;  %v1053_v31 = vmul.f32 %v6856_v13, %v1014_v27  ;;  %v1018_v43 = vld [vmem:[%s6821_s18 + $0x98] sm:$0xff]  ;;  %v1019_v44 = vld [vmem:[%s6821_s18 + $0xa0] sm:$0xff]  ;;  %v1020_v51 = vld [vmem:[%s6821_s18 + $0xa8] sm:$0xff] }
  0x27   : > { %6262 = vmatmul.mubr.msk.f32.gmra.mrb[2].mxu0 %vm8776_vm0, %v1112_v52  ;;  %v1119_v24 = vmax.f32 %v1087_v16, 0.0  ;;  %v1090_v30 = vadd.f32 %v6879_v20, %v1051_v23  ;;  %v1091_v33 = vadd.f32 %v6879_v20, %v1052_v26  ;;  %v1054_v34 = vmul.f32 %v6856_v13, %v1015_v28  ;;  %v1021_v52 = vld [vmem:[%s6821_s18 + $0xb0] sm:$0xff]  ;;  %v1022_v59 = vld [vmem:[%s6821_s18 + $0xb8] sm:$0xff]  ;;  %v1023_v60 = vld [vmem:[%s6821_s18 + $0xc0] sm:$0xff] }
  0x28   : > { %6264 = vmatprep.mubr.msk.f32.mxu0 %vm8776_vm0, %v1113_v58  ;;  %v1120_v29 = vmax.f32 %v1088_v22, 0.0  ;;  %v1121_v32 = vmax.f32 %v1089_v25, 0.0  ;;  %v1092_v38 = vadd.f32 %v6879_v20, %v1053_v31  ;;  %v1055_v39 = vmul.f32 %v6856_v13, %v1016_v35  ;;  %v1025_v4 = vld [vmem:[%s6821_s18 + $0xd0] sm:$0xff] }
  0x29   : > { %v1122_v37 = vmax.f32 %v1090_v30, 0.0  ;;  %v1123_v40 = vmax.f32 %v1091_v33, 0.0  ;;  %v1093_v41 = vadd.f32 %v6879_v20, %v1054_v34  ;;  %v1056_v42 = vmul.f32 %v6856_v13, %v1017_v36  ;;  %v1027_v12 = vld [vmem:[%s6821_s18 + $0xe0] sm:$0xff] }
  0x2a   : > { %v1124_v45 = vmax.f32 %v1092_v38, 0.0  ;;  %v1094_v46 = vadd.f32 %v6879_v20, %v1055_v39  ;;  %v1057_v47 = vmul.f32 %v6856_v13, %v1018_v43  ;;  %v1058_v50 = vmul.f32 %v6856_v13, %v1019_v44  ;;  %v1029_v22 = vld [vmem:[%s6821_s18 + $0xf0] sm:$0xff]  ;;  %v1926_v43 = vld [vmem:[%s8766_s6] sm:$0xff]  ;;  %v1927_v44 = vld [vmem:[%s8766_s6 + $0x8] sm:$0xff] }
  0x2b   : > { %6265 = vmatmul.mubr.msk.f32.gmra.mrb[4].mxu0 %vm8776_vm0, %v1114_v3  ;;  %v1125_v48 = vmax.f32 %v1093_v41, 0.0  ;;  %v1095_v49 = vadd.f32 %v6879_v20, %v1056_v42  ;;  %v1059_v55 = vmul.f32 %v6856_v13, %v1020_v51  ;;  %v1060_v58 = vmul.f32 %v6856_v13, %v1021_v52  ;;  %v1024_v3 = vld [vmem:[%s6821_s18 + $0xc8] sm:$0xff] }
  0x2c   : > { %6267 = vmatprep.mubr.msk.f32.mxu0 %vm8776_vm0, %v1115_v6  ;;  %v1126_v53 = vmax.f32 %v1094_v46, 0.0  ;;  %v1096_v54 = vadd.f32 %v6879_v20, %v1057_v47  ;;  %v1097_v57 = vadd.f32 %v6879_v20, %v1058_v50  ;;  %v1061_v63 = vmul.f32 %v6856_v13, %v1022_v59  ;;  %v1928_v59 = vld [vmem:[%s8766_s6 + $0x10] sm:$0xff] }
  0x2d   : > { %v1127_v56 = vmax.f32 %v1095_v49, 0.0  ;;  %v1098_v62 = vadd.f32 %v6879_v20, %v1059_v55  ;;  %v1099_v1 = vadd.f32 %v6879_v20, %v1060_v58  ;;  %v1062_v2 = vmul.f32 %v6856_v13, %v1023_v60  ;;  %v5769_v60 = vld [vmem:[%s8766_s6 + $0x28] sm:$0xff] }
  0x2e   : > { %v1128_v61 = vmax.f32 %v1096_v54, 0.0  ;;  %v1129_v0 = vmax.f32 %v1097_v57, 0.0  ;;  %v1100_v6 = vadd.f32 %v6879_v20, %v1061_v63  ;;  %v1063_v7 = vmul.f32 %v6856_v13, %v1024_v3 }
  0x2f   : > { %6268 = vmatmul.mubr.msk.f32.gmra.mrb[6].mxu0 %vm8776_vm0, %v1116_v11  ;;  %v1130_v5 = vmax.f32 %v1098_v62, 0.0  ;;  %v1131_v8 = vmax.f32 %v1099_v1, 0.0  ;;  %v1101_v9 = vadd.f32 %v6879_v20, %v1062_v2  ;;  %v1064_v10 = vmul.f32 %v6856_v13, %v1025_v4  ;;  %v1026_v11 = vld [vmem:[%s6821_s18 + $0xd8] sm:$0xff] }
  0x30   : > { %6270 = vmatprep.mubr.msk.f32.mxu0 %vm8776_vm0, %v1117_v15  ;;  %v1132_v14 = vmax.f32 %v1100_v6, 0.0  ;;  %v1102_v15 = vadd.f32 %v6879_v20, %v1063_v7  ;;  %v1065_v16 = vmul.f32 %v6856_v13, %v1026_v11  ;;  %v1066_v19 = vmul.f32 %v6856_v13, %v1027_v12 }
  0x31   : > { %v1133_v17 = vmax.f32 %v1101_v9, 0.0  ;;  %v1103_v18 = vadd.f32 %v6879_v20, %v1064_v10  ;;  %v1068_v28 = vmul.f32 %v6856_v13, %v1029_v22  ;;  %v6682_v47 = vpack.c.bf16 %v1927_v44, %v1926_v43 }
  0x32   : > { %v1134_v23 = vmax.f32 %v1102_v15, 0.0  ;;  %v1105_v27 = vadd.f32 %v6879_v20, %v1066_v19 }
  0x33   : > { %6271 = vmatmul.mubr.msk.f32.gmra.mrb[8].mxu0 %vm8776_vm0, %v1118_v21  ;;  %v1028_v21 = vld [vmem:[%s6821_s18 + $0xe8] sm:$0xff]  ;;  %v1135_v26 = vmax.f32 %v1103_v18, 0.0  ;;  %v1107_v34 = vadd.f32 %v6879_v20, %v1068_v28  ;;  %6683 = vmatprep.subr.bf16.mxu1 %v6682_v47 }
  0x34   : > { %6273 = vmatprep.mubr.msk.f32.mxu0 %vm8776_vm0, %v1119_v24  ;;  %v1104_v24 = vadd.f32 %v6879_v20, %v1065_v16  ;;  %v1067_v25 = vmul.f32 %v6856_v13, %v1028_v21  ;;  %v1137_v33 = vmax.f32 %v1105_v27, 0.0  ;;  %6685 = vmatpush3.bf16.msra.mxu1 %v6682_v47 }
  0x35   : > { %6310 = vmatprep.subr.mxu1 %v1928_v59 }
  0x36   : > { %v1136_v30 = vmax.f32 %v1104_v24, 0.0  ;;  %v1106_v31 = vadd.f32 %v6879_v20, %v1067_v25 }
  0x37   : > { %6274 = vmatmul.mubr.msk.f32.gmra.mrb[10].mxu0 %vm8776_vm0, %v1120_v29  ;;  %v1030_v29 = vld [vmem:[%s6821_s18 + $0xf8] sm:$0xff] }
  0x38   : > { %6276 = vmatprep.mubr.msk.f32.mxu0 %vm8776_vm0, %v1121_v32  ;;  %v1069_v32 = vmul.f32 %v6856_v13, %v1030_v29  ;;  %v1138_v35 = vmax.f32 %v1106_v31, 0.0  ;;  %v6729_v13 = vmov 0.0   ;;  %6311 = vmatpush3.msra.mxu1 %v1928_v59 }
  0x39   : > { %442 = vst.msk [vmem:[#allocation2 + $0x17] sm:$0xff] %vm8776_vm0, %v6729_v13  ;;  %443 = vst.msk [vmem:[#allocation2 + $0x1f] sm:$0xff] %vm8776_vm0, %v6729_v13 }
  0x3a   : > { %v1108_v36 = vadd.f32 %v6879_v20, %v1069_v32  ;;  %450 = vst.msk [vmem:[#allocation2 + $0x108] sm:$0xff] %vm8775_vm1, %v6729_v13  ;;  %451 = vst.msk [vmem:[#allocation2 + $0x110] sm:$0xff] %vm8775_vm1, %v6729_v13  ;;  %v7064_v20 = vld [vmem:[%s8764_s4] ss:$0 sm:$0xff] }
  0x3b   : > { %6277 = vmatmul.mubr.msk.f32.gmra.mrb[12].mxu0 %vm8776_vm0, %v1122_v37  ;;  %v1139_v37 = vmax.f32 %v1107_v34, 0.0  ;;  %447 = vst.msk [vmem:[#allocation2 + $0x17] sm:$0x1] %vm446_vm2, %v6729_v13  ;;  %448 = vst.msk [vmem:[#allocation2 + $0x118] sm:$0x1] %vm446_vm2, %v6729_v13 }
  0x3c   : > { %6279 = vmatprep.mubr.msk.f32.mxu0 %vm8776_vm0, %v1123_v40  ;;  %v1140_v38 = vmax.f32 %v1108_v36, 0.0  ;;  %445 = vst.msk [vmem:[#allocation2 + $0x27] sm:$0x1] %vm444_vm4, %v6729_v13  ;;  %v7069_v40 = vld [vmem:[%s8765_s5] ss:$0 sm:$0xff] }
  0x3d   : > { %453 = vst.msk [vmem:[#allocation2 + $0x118] sm:$0x1] %vm452_vm3, %v6729_v13 }
  0x3f   : > { %6280 = vmatmul.mubr.msk.f32.gmra.mrb[14].mxu0 %vm8776_vm0, %v1124_v45  ;;  %v5767_v45 = vld [vmem:[%s8766_s6 + $0x18] sm:$0xff] }
  0x40   : > { %6282 = vmatprep.mubr.msk.f32.mxu0 %vm8776_vm0, %v1125_v48  ;;  %v5768_v48 = vld [vmem:[%s8766_s6 + $0x20] sm:$0xff] }
  0x41   : > { %v6686_v50 = vpack.c.bf16 %v5768_v48, %v5767_v45 }
  0x43   : > { %6283 = vmatmul.mubr.msk.f32.gmra.mrb[16].mxu0 %vm8776_vm0, %v1126_v53  ;;  %6687 = vmatprep.subr.bf16.mxu0 %v6686_v50 }
  0x44   : > { %6285 = vmatprep.mubr.msk.f32.mxu0 %vm8776_vm0, %v1127_v56  ;;  %6689 = vmatpush3.bf16.msra.mxu0 %v6686_v50 }
  0x45   : > { %6364 = vmatprep.subr.mxu0 %v5769_v60 }
  0x47   : > { %6286 = vmatmul.mubr.msk.f32.gmra.mrb[18].mxu0 %vm8776_vm0, %v1128_v61 }
  0x48   : > { %6288 = vmatprep.mubr.msk.f32.mxu0 %vm8776_vm0, %v1129_v0  ;;  %6365 = vmatpush3.msra.mxu0 %v5769_v60 }
  0x4b   : > { %6289 = vmatmul.mubr.msk.f32.gmra.mrb[20].mxu0 %vm8776_vm0, %v1130_v5 }
  0x4c   : > { %6291 = vmatprep.mubr.msk.f32.mxu0 %vm8776_vm0, %v1131_v8 }
  0x4f   : > { %6292 = vmatmul.mubr.msk.f32.gmra.mrb[22].mxu0 %vm8776_vm0, %v1132_v14 }
  0x50   : > { %6294 = vmatprep.mubr.msk.f32.mxu0 %vm8776_vm0, %v1133_v17 }
  0x53   : > { %6295 = vmatmul.mubr.msk.f32.gmra.mrb[24].mxu0 %vm8776_vm0, %v1134_v23 }
  0x54   : > { %6297 = vmatprep.mubr.msk.f32.mxu0 %vm8776_vm0, %v1135_v26 }
  0x57   : > { %6298 = vmatmul.mubr.msk.f32.gmra.mrb[26].mxu0 %vm8776_vm0, %v1136_v30 }
  0x58   : > { %6300 = vmatprep.mubr.msk.f32.mxu0 %vm8776_vm0, %v1137_v33 }
  0x5b   : > { %6301 = vmatmul.mubr.msk.f32.gmra.mrb[28].mxu0 %vm8776_vm0, %v1138_v35 }
  0x5c   : > { %6303 = vmatprep.mubr.msk.f32.mxu0 %vm8776_vm0, %v1139_v37 }
  0x5f   : > { %6304 = vmatmul.mubr.msk.f32.gmra.mrb[30].mxu0 %vm8776_vm0, %v1140_v38 }
  0xf6   : > { %v6260_v39 = vpop.f32.mrb[0].mxu0 }
  0xf7   : > { %v1471_v41 = vmul.f32 %v6260_v39, %v7064_v20  ;;  %v1304_v42 = vpop.f32.mrb[1].mxu0 }
  0xf8   : > { %v1470_v46 = vmul.f32 %v7064_v20, %v1304_v42 }
  0xf9   : > { %v1510_v49 = vadd.f32 %v7069_v40, %v1471_v41 }
  0xfa   : > { %v1509_v51 = vadd.f32 %v7069_v40, %v1470_v46  ;;  %v6263_v52 = vpop.f32.mrb[2].mxu0 }
  0xfb   : > { %v1542_v53 = vmax.f32 %v1510_v49, 0.0  ;;  %v1473_v54 = vmul.f32 %v6263_v52, %v7064_v20  ;;  %v1314_v55 = vpop.f32.mrb[3].mxu0 }
  0xfc   : > { %v7088_v56 = vmax.f32 %v1509_v51, 0.0  ;;  %v1472_v57 = vmul.f32 %v7064_v20, %v1314_v55 }
  0xfd   : > { %1574 = vst.msk [vmem:[#allocation2 + $0x30] sm:$0xff] %vm8776_vm0, %v1542_v53  ;;  %v1512_v58 = vadd.f32 %v7069_v40, %v1473_v54  ;;  %1768 = vrot.lane.b32.xlu1 %v1542_v53, %s6730_s20  ;;  %1639 = vrot.lane.b32.xlu0 %v1542_v53, %s6731_s21 }
  0xfe   : > { %1573 = vst.msk [vmem:[#allocation2 + $0x28] sm:$0xff] %vm8776_vm0, %v7088_v56  ;;  %v1511_v61 = vadd.f32 %v7069_v40, %v1472_v57  ;;  %v6266_v62 = vpop.f32.mrb[4].mxu0 }
  0xff   : > { %v1544_v63 = vmax.f32 %v1512_v58, 0.0  ;;  %v1475_v0 = vmul.f32 %v6266_v62, %v7064_v20  ;;  %v1324_v1 = vpop.f32.mrb[5].mxu0 }
 0x100   : > { %v1543_v2 = vmax.f32 %v1511_v61, 0.0  ;;  %v1474_v3 = vmul.f32 %v7064_v20, %v1324_v1 }
 0x101   : > { %1576 = vst.msk [vmem:[#allocation2 + $0x40] sm:$0xff] %vm8776_vm0, %v1544_v63  ;;  %1637 = vrot.lane.b32.xlu0 %v7088_v56, %s6731_s21  ;;  %v1514_v4 = vadd.f32 %v7069_v40, %v1475_v0 }
 0x102   : > { %1575 = vst.msk [vmem:[#allocation2 + $0x38] sm:$0xff] %vm8776_vm0, %v1543_v2  ;;  %1770 = vrot.lane.b32.xlu1 %v1543_v2, %s6730_s20  ;;  %v1513_v5 = vadd.f32 %v7069_v40, %v1474_v3  ;;  %v6269_v6 = vpop.f32.mrb[6].mxu0 }
 0x103   : > { %v1546_v7 = vmax.f32 %v1514_v4, 0.0  ;;  %v1477_v8 = vmul.f32 %v6269_v6, %v7064_v20  ;;  %v1334_v9 = vpop.f32.mrb[7].mxu0 }
 0x104   : > { %v1545_v10 = vmax.f32 %v1513_v5, 0.0  ;;  %v1476_v11 = vmul.f32 %v7064_v20, %v1334_v9 }
 0x105   : > { %1578 = vst.msk [vmem:[#allocation2 + $0x50] sm:$0xff] %vm8776_vm0, %v1546_v7  ;;  %1772 = vrot.lane.b32.xlu0 %v1544_v63, %s6730_s20  ;;  %v1516_v12 = vadd.f32 %v7069_v40, %v1477_v8 }
 0x106   : > { %1577 = vst.msk [vmem:[#allocation2 + $0x48] sm:$0xff] %vm8776_vm0, %v1545_v10  ;;  %1641 = vrot.lane.b32.xlu1 %v1543_v2, %s6731_s21  ;;  %v1515_v14 = vadd.f32 %v7069_v40, %v1476_v11  ;;  %v6272_v15 = vpop.f32.mrb[8].mxu0 }
 0x107   : > { %v1548_v16 = vmax.f32 %v1516_v12, 0.0  ;;  %v1479_v17 = vmul.f32 %v6272_v15, %v7064_v20  ;;  %v1344_v18 = vpop.f32.mrb[9].mxu0 }
 0x108   : > { %v1547_v19 = vmax.f32 %v1515_v14, 0.0  ;;  %v1478_v21 = vmul.f32 %v7064_v20, %v1344_v18 }
 0x109   : > { %1643 = vrot.lane.b32.xlu0 %v1544_v63, %s6731_s21  ;;  %1580 = vst.msk [vmem:[#allocation2 + $0x60] sm:$0xff] %vm8776_vm0, %v1548_v16  ;;  %v1518_v22 = vadd.f32 %v7069_v40, %v1479_v17 }
 0x10a   : > { %1774 = vrot.lane.b32.xlu1 %v1545_v10, %s6730_s20  ;;  %1579 = vst.msk [vmem:[#allocation2 + $0x58] sm:$0xff] %vm8776_vm0, %v1547_v19  ;;  %v1517_v23 = vadd.f32 %v7069_v40, %v1478_v21  ;;  %v6275_v24 = vpop.f32.mrb[10].mxu0 }
 0x10b   : > { %v7129_v25 = vmax.f32 %v1518_v22, 0.0  ;;  %v1481_v26 = vmul.f32 %v6275_v24, %v7064_v20  ;;  %v1354_v27 = vpop.f32.mrb[11].mxu0 }
 0x10c   : > { %v1549_v28 = vmax.f32 %v1517_v23, 0.0  ;;  %v1480_v29 = vmul.f32 %v7064_v20, %v1354_v27 }
 0x10d   : > { %1776 = vrot.lane.b32.xlu0 %v1546_v7, %s6730_s20  ;;  %1582 = vst.msk [vmem:[#allocation2 + $0x70] sm:$0xff] %vm8776_vm0, %v7129_v25  ;;  %v1520_v30 = vadd.f32 %v7069_v40, %v1481_v26 }
 0x10e   : > { %1645 = vrot.lane.b32.xlu1 %v1545_v10, %s6731_s21  ;;  %1581 = vst.msk [vmem:[#allocation2 + $0x68] sm:$0xff] %vm8776_vm0, %v1549_v28  ;;  %v1519_v31 = vadd.f32 %v7069_v40, %v1480_v29  ;;  %v6278_v32 = vpop.f32.mrb[12].mxu0 }
 0x10f   : > { %v7140_v33 = vmax.f32 %v1520_v30, 0.0  ;;  %v1483_v34 = vmul.f32 %v6278_v32, %v7064_v20  ;;  %v1364_v35 = vpop.f32.mrb[13].mxu0 }
 0x110   : > { %v7143_v36 = vmax.f32 %v1519_v31, 0.0  ;;  %v1482_v37 = vmul.f32 %v7064_v20, %v1364_v35 }
 0x111   : > { %1647 = vrot.lane.b32.xlu0 %v1546_v7, %s6731_s21  ;;  %1584 = vst.msk [vmem:[#allocation2 + $0x80] sm:$0xff] %vm8776_vm0, %v7140_v33  ;;  %v1522_v38 = vadd.f32 %v7069_v40, %v1483_v34 }
 0x112   : > { %1778 = vrot.lane.b32.xlu1 %v1547_v19, %s6730_s20  ;;  %1583 = vst.msk [vmem:[#allocation2 + $0x78] sm:$0xff] %vm8776_vm0, %v7143_v36  ;;  %v1521_v13 = vadd.f32 %v7069_v40, %v1482_v37  ;;  %v6281_v39 = vpop.f32.mrb[14].mxu0 }
 0x113   : > { %v7154_v41 = vmax.f32 %v1522_v38, 0.0  ;;  %v1485_v42 = vmul.f32 %v6281_v39, %v7064_v20  ;;  %v1374_v43 = vpop.f32.mrb[15].mxu0 }
 0x114   : > { %v7157_v44 = vmax.f32 %v1521_v13, 0.0  ;;  %v1484_v45 = vmul.f32 %v7064_v20, %v1374_v43 }
 0x115   : > { %1780 = vrot.lane.b32.xlu0 %v1548_v16, %s6730_s20  ;;  %1586 = vst.msk [vmem:[#allocation2 + $0x90] sm:$0xff] %vm8776_vm0, %v7154_v41  ;;  %v1524_v46 = vadd.f32 %v7069_v40, %v1485_v42 }
 0x116   : > { %1649 = vrot.lane.b32.xlu1 %v1547_v19, %s6731_s21  ;;  %1585 = vst.msk [vmem:[#allocation2 + $0x88] sm:$0xff] %vm8776_vm0, %v7157_v44  ;;  %v1523_v47 = vadd.f32 %v7069_v40, %v1484_v45  ;;  %v6284_v48 = vpop.f32.mrb[16].mxu0 }
 0x117   : > { %v7168_v49 = vmax.f32 %v1524_v46, 0.0  ;;  %v1487_v50 = vmul.f32 %v6284_v48, %v7064_v20  ;;  %v1384_v51 = vpop.f32.mrb[17].mxu0 }
 0x118   : > { %v7171_v52 = vmax.f32 %v1523_v47, 0.0  ;;  %v1486_v53 = vmul.f32 %v7064_v20, %v1384_v51  ;;  %v5802_v51 = vld [vmem:[%s8766_s6 + $0x30] sm:$0xff] }
 0x119   : > { %1651 = vrot.lane.b32.xlu0 %v1548_v16, %s6731_s21  ;;  %1588 = vst.msk [vmem:[#allocation2 + $0xa0] sm:$0xff] %vm8776_vm0, %v7168_v49  ;;  %v1526_v54 = vadd.f32 %v7069_v40, %v1487_v50 }
 0x11a   : > { %1782 = vrot.lane.b32.xlu1 %v1549_v28, %s6730_s20  ;;  %1587 = vst.msk [vmem:[#allocation2 + $0x98] sm:$0xff] %vm8776_vm0, %v7171_v52  ;;  %v1525_v55 = vadd.f32 %v7069_v40, %v1486_v53  ;;  %v6287_v57 = vpop.f32.mrb[18].mxu0  ;;  %v5803_v53 = vld [vmem:[%s8766_s6 + $0x38] sm:$0xff] }
 0x11b   : > { %v7182_v58 = vmax.f32 %v1526_v54, 0.0  ;;  %v1489_v59 = vmul.f32 %v6287_v57, %v7064_v20  ;;  %v1394_v60 = vpop.f32.mrb[19].mxu0  ;;  %v7281_v54 = vpack.c.bf16 %v5803_v53, %v5802_v51 }
 0x11c   : > { %v7185_v61 = vmax.f32 %v1525_v55, 0.0  ;;  %v1488_v62 = vmul.f32 %v7064_v20, %v1394_v60 }
 0x11d   : > { %1784 = vrot.lane.b32.xlu0 %v7129_v25, %s6730_s20  ;;  %1590 = vst.msk [vmem:[#allocation2 + $0xb0] sm:$0xff] %vm8776_vm0, %v7182_v58  ;;  %v1528_v63 = vadd.f32 %v7069_v40, %v1489_v59  ;;  %6691 = vmatprep.subr.bf16.mxu1 %v7281_v54 }
 0x11e   : > { %1653 = vrot.lane.b32.xlu1 %v1549_v28, %s6731_s21  ;;  %1589 = vst.msk [vmem:[#allocation2 + $0xa8] sm:$0xff] %vm8776_vm0, %v7185_v61  ;;  %v1527_v0 = vadd.f32 %v7069_v40, %v1488_v62  ;;  %v6290_v1 = vpop.f32.mrb[20].mxu0 }
 0x11f   : > { %v7197_v2 = vmax.f32 %v1528_v63, 0.0  ;;  %v1491_v3 = vmul.f32 %v6290_v1, %v7064_v20  ;;  %v1404_v4 = vpop.f32.mrb[21].mxu0 }
 0x120   : > { %v7200_v5 = vmax.f32 %v1527_v0, 0.0  ;;  %v1490_v6 = vmul.f32 %v7064_v20, %v1404_v4  ;;  %v5804_v4 = vld [vmem:[%s8766_s6 + $0x40] sm:$0xff] }
 0x121   : > { %1655 = vrot.lane.b32.xlu0 %v7129_v25, %s6731_s21  ;;  %1592 = vst.msk [vmem:[#allocation2 + $0xc0] sm:$0xff] %vm8776_vm0, %v7197_v2  ;;  %v1530_v7 = vadd.f32 %v7069_v40, %v1491_v3 }
 0x122   : > { %1786 = vrot.lane.b32.xlu1 %v7143_v36, %s6730_s20  ;;  %1591 = vst.msk [vmem:[#allocation2 + $0xb8] sm:$0xff] %vm8776_vm0, %v7200_v5  ;;  %v1529_v8 = vadd.f32 %v7069_v40, %v1490_v6  ;;  %v6293_v9 = vpop.f32.mrb[22].mxu0 }
 0x123   : > { %v7213_v10 = vmax.f32 %v1530_v7, 0.0  ;;  %v1493_v11 = vmul.f32 %v6293_v9, %v7064_v20  ;;  %v1414_v12 = vpop.f32.mrb[23].mxu0 }
 0x124   : > { %v7216_v14 = vmax.f32 %v1529_v8, 0.0  ;;  %v1492_v15 = vmul.f32 %v7064_v20, %v1414_v12 }
 0x125   : > { %1788 = vrot.lane.b32.xlu0 %v7140_v33, %s6730_s20  ;;  %1594 = vst.msk [vmem:[#allocation2 + $0xd0] sm:$0xff] %vm8776_vm0, %v7213_v10  ;;  %v1532_v16 = vadd.f32 %v7069_v40, %v1493_v11 }
 0x126   : > { %1657 = vrot.lane.b32.xlu1 %v7143_v36, %s6731_s21  ;;  %1593 = vst.msk [vmem:[#allocation2 + $0xc8] sm:$0xff] %vm8776_vm0, %v7216_v14  ;;  %v1531_v17 = vadd.f32 %v7069_v40, %v1492_v15  ;;  %v6296_v18 = vpop.f32.mrb[24].mxu0 }
 0x127   : > { %v7229_v19 = vmax.f32 %v1532_v16, 0.0  ;;  %v1495_v21 = vmul.f32 %v6296_v18, %v7064_v20  ;;  %v1424_v22 = vpop.f32.mrb[25].mxu0 }
 0x128   : > { %v7232_v23 = vmax.f32 %v1531_v17, 0.0  ;;  %v1494_v24 = vmul.f32 %v7064_v20, %v1424_v22 }
 0x129   : > { %1659 = vrot.lane.b32.xlu0 %v7140_v33, %s6731_s21  ;;  %1596 = vst.msk [vmem:[#allocation2 + $0xe0] sm:$0xff] %vm8776_vm0, %v7229_v19  ;;  %v1534_v25 = vadd.f32 %v7069_v40, %v1495_v21 }
 0x12a   : > { %1790 = vrot.lane.b32.xlu1 %v7157_v44, %s6730_s20  ;;  %1595 = vst.msk [vmem:[#allocation2 + $0xd8] sm:$0xff] %vm8776_vm0, %v7232_v23  ;;  %v1533_v26 = vadd.f32 %v7069_v40, %v1494_v24  ;;  %v6299_v27 = vpop.f32.mrb[26].mxu0 }
 0x12b   : > { %v1566_v28 = vmax.f32 %v1534_v25, 0.0  ;;  %v1497_v29 = vmul.f32 %v6299_v27, %v7064_v20  ;;  %v1434_v30 = vpop.f32.mrb[27].mxu0 }
 0x12c   : > { %v1565_v31 = vmax.f32 %v1533_v26, 0.0  ;;  %v1496_v32 = vmul.f32 %v7064_v20, %v1434_v30 }
 0x12d   : > { %1792 = vrot.lane.b32.xlu0 %v7154_v41, %s6730_s20  ;;  %1598 = vst.msk [vmem:[#allocation2 + $0xf0] sm:$0xff] %vm8776_vm0, %v1566_v28  ;;  %v1536_v33 = vadd.f32 %v7069_v40, %v1497_v29 }
 0x12e   : > { %1661 = vrot.lane.b32.xlu1 %v7157_v44, %s6731_s21  ;;  %1597 = vst.msk [vmem:[#allocation2 + $0xe8] sm:$0xff] %vm8776_vm0, %v1565_v31  ;;  %v1535_v34 = vadd.f32 %v7069_v40, %v1496_v32  ;;  %v6302_v35 = vpop.f32.mrb[28].mxu0 }
 0x12f   : > { %v1568_v36 = vmax.f32 %v1536_v33, 0.0  ;;  %v1499_v37 = vmul.f32 %v6302_v35, %v7064_v20  ;;  %v1444_v38 = vpop.f32.mrb[29].mxu0 }
 0x130   : > { %v1567_v13 = vmax.f32 %v1535_v34, 0.0  ;;  %v1498_v39 = vmul.f32 %v7064_v20, %v1444_v38 }
 0x131   : > { %1663 = vrot.lane.b32.xlu0 %v7154_v41, %s6731_s21  ;;  %1600 = vst.msk [vmem:[#allocation2 + $0x100] sm:$0xff] %vm8776_vm0, %v1568_v36  ;;  %v1538_v42 = vadd.f32 %v7069_v40, %v1499_v37 }
 0x132   : > { %1794 = vrot.lane.b32.xlu1 %v7171_v52, %s6730_s20  ;;  %1599 = vst.msk [vmem:[#allocation2 + $0xf8] sm:$0xff] %vm8776_vm0, %v1567_v13  ;;  %v1537_v43 = vadd.f32 %v7069_v40, %v1498_v39  ;;  %v6305_v44 = vpop.f32.mrb[30].mxu0 }
 0x133   : > { %v1570_v45 = vmax.f32 %v1538_v42, 0.0  ;;  %v1501_v46 = vmul.f32 %v6305_v44, %v7064_v20  ;;  %v1454_v47 = vpop.f32.mrb[31].mxu0 }
 0x134   : > { %v1569_v48 = vmax.f32 %v1537_v43, 0.0  ;;  %v1500_v50 = vmul.f32 %v7064_v20, %v1454_v47 }
 0x135   : > { %1796 = vrot.lane.b32.xlu0 %v7168_v49, %s6730_s20  ;;  %v1540_v41 = vadd.f32 %v7069_v40, %v1501_v46  ;;  %1602 = vst.msk [vmem:[#allocation2 + $0x110] sm:$0xff] %vm8776_vm0, %v1570_v45 }
 0x136   : > { %1665 = vrot.lane.b32.xlu1 %v7171_v52, %s6731_s21  ;;  %v1539_v20 = vadd.f32 %v7069_v40, %v1500_v50  ;;  %1601 = vst.msk [vmem:[#allocation2 + $0x108] sm:$0xff] %vm8776_vm0, %v1569_v48 }
 0x137   : > { %v1572_v55 = vmax.f32 %v1540_v41, 0.0 }
 0x138   : > { %v1571_v57 = vmax.f32 %v1539_v20, 0.0 }
 0x139   : > { %1667 = vrot.lane.b32.xlu0 %v7168_v49, %s6731_s21 }
 0x13a   : > { %1798 = vrot.lane.b32.xlu1 %v7185_v61, %s6730_s20  ;;  %1603 = vst.msk [vmem:[#allocation2 + $0x118] sm:$0xff] %vm8776_vm0, %v1571_v57 }
 0x13d   : > { %1800 = vrot.lane.b32.xlu0 %v7182_v58, %s6730_s20 }
 0x13e   : > { %1669 = vrot.lane.b32.xlu1 %v7185_v61, %s6731_s21 }
 0x141   : > { %1671 = vrot.lane.b32.xlu0 %v7182_v58, %s6731_s21 }
 0x142   : > { %1802 = vrot.lane.b32.xlu1 %v7200_v5, %s6730_s20 }
 0x145   : > { %1804 = vrot.lane.b32.xlu0 %v7197_v2, %s6730_s20 }
 0x146   : > { %1673 = vrot.lane.b32.xlu1 %v7200_v5, %s6731_s21 }
 0x149   : > { %1675 = vrot.lane.b32.xlu0 %v7197_v2, %s6731_s21 }
 0x14a   : > { %1806 = vrot.lane.b32.xlu1 %v7216_v14, %s6730_s20 }
 0x14d   : > { %1808 = vrot.lane.b32.xlu0 %v7213_v10, %s6730_s20 }
 0x14e   : > { %1677 = vrot.lane.b32.xlu1 %v7216_v14, %s6731_s21 }
 0x151   : > { %1679 = vrot.lane.b32.xlu0 %v7213_v10, %s6731_s21 }
 0x152   : > { %1810 = vrot.lane.b32.xlu1 %v7232_v23, %s6730_s20 }
 0x155   : > { %1812 = vrot.lane.b32.xlu0 %v7229_v19, %s6730_s20 }
 0x156   : > { %1681 = vrot.lane.b32.xlu1 %v7232_v23, %s6731_s21 }
 0x159   : > { %1683 = vrot.lane.b32.xlu0 %v7229_v19, %s6731_s21 }
 0x15a   : > { %1814 = vrot.lane.b32.xlu1 %v1565_v31, %s6730_s20 }
 0x15d   : > { %1816 = vrot.lane.b32.xlu0 %v1566_v28, %s6730_s20 }
 0x15e   : > { %1685 = vrot.lane.b32.xlu1 %v1565_v31, %s6731_s21 }
 0x161   : > { %1687 = vrot.lane.b32.xlu0 %v1566_v28, %s6731_s21 }
 0x162   : > { %1818 = vrot.lane.b32.xlu1 %v1567_v13, %s6730_s20 }
 0x165   : > { %1820 = vrot.lane.b32.xlu0 %v1568_v36, %s6730_s20 }
 0x166   : > { %1689 = vrot.lane.b32.xlu1 %v1567_v13, %s6731_s21 }
 0x169   : > { %1691 = vrot.lane.b32.xlu0 %v1568_v36, %s6731_s21 }
 0x16a   : > { %1822 = vrot.lane.b32.xlu1 %v1569_v48, %s6730_s20 }
 0x16d   : > { %1824 = vrot.lane.b32.xlu0 %v1570_v45, %s6730_s20 }
 0x16e   : > { %1693 = vrot.lane.b32.xlu1 %v1569_v48, %s6731_s21 }
 0x16f   : > { %v1769_v40 = vpop.permute.xlu1 %1768  ;;  %v1640_v49 = vpop.permute.xlu0 %1639 }
 0x170   : > { %1863 = vst.msk [vmem:[#allocation2 + $0x10] sm:$0xff] %vm8775_vm1, %v1769_v40 }
 0x171   : > { %1735 = vst.msk [vmem:[#allocation2 + $0x20] sm:$0xff] %vm8777_vm5, %v1640_v49  ;;  %1695 = vrot.lane.b32.xlu0 %v1570_v45, %s6731_s21 }
 0x172   : > { %1826 = vrot.lane.b32.xlu1 %v1571_v57, %s6730_s20 }
 0x173   : > { %v1638_v52 = vpop.permute.xlu0 %1637 }
 0x174   : > { %1734 = vst.msk [vmem:[#allocation2 + $0x18] sm:$0xff] %vm8777_vm5, %v1638_v52  ;;  %v1771_v58 = vpop.permute.xlu1 %1770 }
 0x175   : > { %1864 = vst.msk [vmem:[#allocation2 + $0x18] sm:$0xff] %vm8775_vm1, %v1771_v58  ;;  %1828 = vrot.lane.b32.xlu0 %v1572_v55, %s6730_s20 }
 0x176   : > { %1697 = vrot.lane.b32.xlu1 %v1571_v57, %s6731_s21 }
 0x177   : > { %v1773_v59 = vpop.permute.xlu0 %1772 }
 0x178   : > { %1865 = vst.msk [vmem:[#allocation2 + $0x20] sm:$0xff] %vm8775_vm1, %v1773_v59  ;;  %v1642_v60 = vpop.permute.xlu1 %1641 }
 0x179   : > { %1736 = vst.msk [vmem:[#allocation2 + $0x28] sm:$0xff] %vm8777_vm5, %v1642_v60  ;;  %1699 = vrot.lane.b32.xlu0 %v1572_v55, %s6731_s21 }
 0x17b   : > { %v1644_v61 = vpop.permute.xlu0 %1643 }
 0x17c   : > { %1737 = vst.msk [vmem:[#allocation2 + $0x30] sm:$0xff] %vm8777_vm5, %v1644_v61  ;;  %v1775_v62 = vpop.permute.xlu1 %1774  ;;  %v1894_v63 = vld [vmem:[#allocation2 + $0x17] sm:$0xff] }
 0x17d   : > { %v2347_v0 = vld [vmem:[#allocation2 + $0x18] sm:$0xff]  ;;  %1866 = vst.msk [vmem:[#allocation2 + $0x28] sm:$0xff] %vm8775_vm1, %v1775_v62  ;;  %6312 = vmatprep.mubr.msk.f32.mxu1 %vm8774_vm6, %v1894_v63 }
 0x17e   : > { %6366 = vmatprep.mubr.msk.f32.mxu0 %vm8774_vm6, %v2347_v0 }
 0x17f   : > { %v1777_v1 = vpop.permute.xlu0 %1776  ;;  %v1895_v2 = vld [vmem:[#allocation2 + $0x1f] sm:$0xff] }
 0x180   : > { %v2348_v3 = vld [vmem:[#allocation2 + $0x20] sm:$0xff]  ;;  %1867 = vst.msk [vmem:[#allocation2 + $0x30] sm:$0xff] %vm8775_vm1, %v1777_v1  ;;  %6313 = vmatmul.mubr.msk.f32.vlgmr.msra.gmra.mrb[0].mxu1 %vm8774_vm6, %v1895_v2  ;;  %v1646_v5 = vpop.permute.xlu1 %1645 }
 0x181   : > { %6367 = vmatmul.mubr.msk.f32.vlgmr.msra.gmra.mrb[32].mxu0 %vm8774_vm6, %v2348_v3  ;;  %1738 = vst.msk [vmem:[#allocation2 + $0x38] sm:$0xff] %vm8777_vm5, %v1646_v5  ;;  %6693 = vmatpush3.bf16.msra.mxu1 %v7281_v54 }
 0x182   : > { %6418 = vmatprep.subr.mxu1 %v5804_v4 }
 0x183   : > { %v1648_v6 = vpop.permute.xlu0 %1647 }
 0x184   : > { %1739 = vst.msk [vmem:[#allocation2 + $0x40] sm:$0xff] %vm8777_vm5, %v1648_v6  ;;  %v1779_v7 = vpop.permute.xlu1 %1778  ;;  %v1896_v8 = vld [vmem:[#allocation2 + $0x27] sm:$0xff] }
 0x185   : > { %v2349_v9 = vld [vmem:[#allocation2 + $0x28] sm:$0xff]  ;;  %1868 = vst.msk [vmem:[#allocation2 + $0x38] sm:$0xff] %vm8775_vm1, %v1779_v7  ;;  %6315 = vmatprep.mubr.msk.f32.mxu1 %vm8774_vm6, %v1896_v8  ;;  %6419 = vmatpush3.msra.mxu1 %v5804_v4 }
 0x186   : > { %6369 = vmatprep.mubr.msk.f32.mxu0 %vm8774_vm6, %v2349_v9 }
 0x187   : > { %v1781_v10 = vpop.permute.xlu0 %1780  ;;  %v1897_v11 = vld [vmem:[#allocation2 + $0x2f] sm:$0xff] }
 0x188   : > { %v2350_v12 = vld [vmem:[#allocation2 + $0x30] sm:$0xff]  ;;  %1869 = vst.msk [vmem:[#allocation2 + $0x40] sm:$0xff] %vm8775_vm1, %v1781_v10  ;;  %6316 = vmatmul.mubr.msk.f32.gmra.mrb[2].mxu1 %vm8774_vm6, %v1897_v11  ;;  %v1650_v14 = vpop.permute.xlu1 %1649 }
 0x189   : > { %6370 = vmatmul.mubr.msk.f32.gmra.mrb[34].mxu0 %vm8774_vm6, %v2350_v12  ;;  %1740 = vst.msk [vmem:[#allocation2 + $0x48] sm:$0xff] %vm8777_vm5, %v1650_v14 }
 0x18b   : > { %v1652_v15 = vpop.permute.xlu0 %1651 }
 0x18c   : > { %1741 = vst.msk [vmem:[#allocation2 + $0x50] sm:$0xff] %vm8777_vm5, %v1652_v15  ;;  %v1783_v16 = vpop.permute.xlu1 %1782  ;;  %v1898_v17 = vld [vmem:[#allocation2 + $0x37] sm:$0xff] }
 0x18d   : > { %v2351_v18 = vld [vmem:[#allocation2 + $0x38] sm:$0xff]  ;;  %1870 = vst.msk [vmem:[#allocation2 + $0x48] sm:$0xff] %vm8775_vm1, %v1783_v16  ;;  %6318 = vmatprep.mubr.msk.f32.mxu1 %vm8774_vm6, %v1898_v17 }
 0x18e   : > { %6372 = vmatprep.mubr.msk.f32.mxu0 %vm8774_vm6, %v2351_v18 }
 0x18f   : > { %v1785_v19 = vpop.permute.xlu0 %1784  ;;  %v1899_v21 = vld [vmem:[#allocation2 + $0x3f] sm:$0xff] }
 0x190   : > { %v2352_v22 = vld [vmem:[#allocation2 + $0x40] sm:$0xff]  ;;  %1871 = vst.msk [vmem:[#allocation2 + $0x50] sm:$0xff] %vm8775_vm1, %v1785_v19  ;;  %6319 = vmatmul.mubr.msk.f32.gmra.mrb[4].mxu1 %vm8774_vm6, %v1899_v21  ;;  %v1654_v23 = vpop.permute.xlu1 %1653 }
 0x191   : > { %6373 = vmatmul.mubr.msk.f32.gmra.mrb[36].mxu0 %vm8774_vm6, %v2352_v22  ;;  %1742 = vst.msk [vmem:[#allocation2 + $0x58] sm:$0xff] %vm8777_vm5, %v1654_v23 }
 0x193   : > { %v1656_v24 = vpop.permute.xlu0 %1655 }
 0x194   : > { %1743 = vst.msk [vmem:[#allocation2 + $0x60] sm:$0xff] %vm8777_vm5, %v1656_v24  ;;  %v1787_v25 = vpop.permute.xlu1 %1786  ;;  %v1900_v26 = vld [vmem:[#allocation2 + $0x47] sm:$0xff] }
 0x195   : > { %v2353_v27 = vld [vmem:[#allocation2 + $0x48] sm:$0xff]  ;;  %1872 = vst.msk [vmem:[#allocation2 + $0x58] sm:$0xff] %vm8775_vm1, %v1787_v25  ;;  %6321 = vmatprep.mubr.msk.f32.mxu1 %vm8774_vm6, %v1900_v26 }
 0x196   : > { %6375 = vmatprep.mubr.msk.f32.mxu0 %vm8774_vm6, %v2353_v27 }
 0x197   : > { %v1789_v28 = vpop.permute.xlu0 %1788  ;;  %v1901_v29 = vld [vmem:[#allocation2 + $0x4f] sm:$0xff] }
 0x198   : > { %v2354_v30 = vld [vmem:[#allocation2 + $0x50] sm:$0xff]  ;;  %1873 = vst.msk [vmem:[#allocation2 + $0x60] sm:$0xff] %vm8775_vm1, %v1789_v28  ;;  %6322 = vmatmul.mubr.msk.f32.gmra.mrb[6].mxu1 %vm8774_vm6, %v1901_v29  ;;  %v1658_v31 = vpop.permute.xlu1 %1657 }
 0x199   : > { %6376 = vmatmul.mubr.msk.f32.gmra.mrb[38].mxu0 %vm8774_vm6, %v2354_v30  ;;  %1744 = vst.msk [vmem:[#allocation2 + $0x68] sm:$0xff] %vm8777_vm5, %v1658_v31 }
 0x19b   : > { %v1660_v32 = vpop.permute.xlu0 %1659 }
 0x19c   : > { %1745 = vst.msk [vmem:[#allocation2 + $0x70] sm:$0xff] %vm8777_vm5, %v1660_v32  ;;  %v1791_v33 = vpop.permute.xlu1 %1790  ;;  %v1902_v34 = vld [vmem:[#allocation2 + $0x57] sm:$0xff] }
 0x19d   : > { %v2355_v35 = vld [vmem:[#allocation2 + $0x58] sm:$0xff]  ;;  %1874 = vst.msk [vmem:[#allocation2 + $0x68] sm:$0xff] %vm8775_vm1, %v1791_v33  ;;  %6324 = vmatprep.mubr.msk.f32.mxu1 %vm8774_vm6, %v1902_v34 }
 0x19e   : > { %6378 = vmatprep.mubr.msk.f32.mxu0 %vm8774_vm6, %v2355_v35 }
 0x19f   : > { %v1793_v36 = vpop.permute.xlu0 %1792  ;;  %v1903_v37 = vld [vmem:[#allocation2 + $0x5f] sm:$0xff] }
 0x1a0   : > { %v2356_v38 = vld [vmem:[#allocation2 + $0x60] sm:$0xff]  ;;  %1875 = vst.msk [vmem:[#allocation2 + $0x70] sm:$0xff] %vm8775_vm1, %v1793_v36  ;;  %6325 = vmatmul.mubr.msk.f32.gmra.mrb[8].mxu1 %vm8774_vm6, %v1903_v37  ;;  %v1662_v13 = vpop.permute.xlu1 %1661 }
 0x1a1   : > { %6379 = vmatmul.mubr.msk.f32.gmra.mrb[40].mxu0 %vm8774_vm6, %v2356_v38  ;;  %1746 = vst.msk [vmem:[#allocation2 + $0x78] sm:$0xff] %vm8777_vm5, %v1662_v13 }
 0x1a3   : > { %v1664_v39 = vpop.permute.xlu0 %1663 }
 0x1a4   : > { %1747 = vst.msk [vmem:[#allocation2 + $0x80] sm:$0xff] %vm8777_vm5, %v1664_v39  ;;  %v1795_v42 = vpop.permute.xlu1 %1794  ;;  %v1904_v43 = vld [vmem:[#allocation2 + $0x67] sm:$0xff] }
 0x1a5   : > { %v2357_v44 = vld [vmem:[#allocation2 + $0x68] sm:$0xff]  ;;  %1876 = vst.msk [vmem:[#allocation2 + $0x78] sm:$0xff] %vm8775_vm1, %v1795_v42  ;;  %6327 = vmatprep.mubr.msk.f32.mxu1 %vm8774_vm6, %v1904_v43 }
 0x1a6   : > { %6381 = vmatprep.mubr.msk.f32.mxu0 %vm8774_vm6, %v2357_v44 }
 0x1a7   : > { %v1797_v45 = vpop.permute.xlu0 %1796  ;;  %v1905_v46 = vld [vmem:[#allocation2 + $0x6f] sm:$0xff] }
 0x1a8   : > { %v2358_v47 = vld [vmem:[#allocation2 + $0x70] sm:$0xff]  ;;  %1877 = vst.msk [vmem:[#allocation2 + $0x80] sm:$0xff] %vm8775_vm1, %v1797_v45  ;;  %6328 = vmatmul.mubr.msk.f32.gmra.mrb[10].mxu1 %vm8774_vm6, %v1905_v46  ;;  %v1666_v48 = vpop.permute.xlu1 %1665 }
 0x1a9   : > { %6382 = vmatmul.mubr.msk.f32.gmra.mrb[42].mxu0 %vm8774_vm6, %v2358_v47  ;;  %1748 = vst.msk [vmem:[#allocation2 + $0x88] sm:$0xff] %vm8777_vm5, %v1666_v48 }
 0x1ab   : > { %v1668_v50 = vpop.permute.xlu0 %1667 }
 0x1ac   : > { %1749 = vst.msk [vmem:[#allocation2 + $0x90] sm:$0xff] %vm8777_vm5, %v1668_v50  ;;  %v1799_v41 = vpop.permute.xlu1 %1798  ;;  %v1906_v51 = vld [vmem:[#allocation2 + $0x77] sm:$0xff] }
 0x1ad   : > { %v2359_v53 = vld [vmem:[#allocation2 + $0x78] sm:$0xff]  ;;  %1878 = vst.msk [vmem:[#allocation2 + $0x88] sm:$0xff] %vm8775_vm1, %v1799_v41  ;;  %6330 = vmatprep.mubr.msk.f32.mxu1 %vm8774_vm6, %v1906_v51 }
 0x1ae   : > { %6384 = vmatprep.mubr.msk.f32.mxu0 %vm8774_vm6, %v2359_v53 }
 0x1af   : > { %v1801_v20 = vpop.permute.xlu0 %1800  ;;  %v1907_v54 = vld [vmem:[#allocation2 + $0x7f] sm:$0xff] }
 0x1b0   : > { %v2360_v55 = vld [vmem:[#allocation2 + $0x80] sm:$0xff]  ;;  %1879 = vst.msk [vmem:[#allocation2 + $0x90] sm:$0xff] %vm8775_vm1, %v1801_v20  ;;  %6331 = vmatmul.mubr.msk.f32.gmra.mrb[12].mxu1 %vm8774_vm6, %v1907_v54  ;;  %v1670_v57 = vpop.permute.xlu1 %1669 }
 0x1b1   : > { %6385 = vmatmul.mubr.msk.f32.gmra.mrb[44].mxu0 %vm8774_vm6, %v2360_v55  ;;  %1750 = vst.msk [vmem:[#allocation2 + $0x98] sm:$0xff] %vm8777_vm5, %v1670_v57 }
 0x1b3   : > { %v1672_v40 = vpop.permute.xlu0 %1671 }
 0x1b4   : > { %1751 = vst.msk [vmem:[#allocation2 + $0xa0] sm:$0xff] %vm8777_vm5, %v1672_v40  ;;  %v1803_v49 = vpop.permute.xlu1 %1802  ;;  %v1908_v52 = vld [vmem:[#allocation2 + $0x87] sm:$0xff] }
 0x1b5   : > { %v2361_v58 = vld [vmem:[#allocation2 + $0x88] sm:$0xff]  ;;  %1880 = vst.msk [vmem:[#allocation2 + $0x98] sm:$0xff] %vm8775_vm1, %v1803_v49  ;;  %6333 = vmatprep.mubr.msk.f32.mxu1 %vm8774_vm6, %v1908_v52  ;;  %v2736_v52 = vld [vmem:[#allocation2 + $0x19] sm:$0xff] }
 0x1b6   : > { %6387 = vmatprep.mubr.msk.f32.mxu0 %vm8774_vm6, %v2361_v58  ;;  %v2737_v58 = vld [vmem:[#allocation2 + $0x21] sm:$0xff] }
 0x1b7   : > { %v1805_v59 = vpop.permute.xlu0 %1804  ;;  %v1909_v60 = vld [vmem:[#allocation2 + $0x8f] sm:$0xff] }
 0x1b8   : > { %v2362_v61 = vld [vmem:[#allocation2 + $0x90] sm:$0xff]  ;;  %1881 = vst.msk [vmem:[#allocation2 + $0xa0] sm:$0xff] %vm8775_vm1, %v1805_v59  ;;  %6334 = vmatmul.mubr.msk.f32.gmra.mrb[14].mxu1 %vm8774_vm6, %v1909_v60  ;;  %v1674_v62 = vpop.permute.xlu1 %1673 }
 0x1b9   : > { %6388 = vmatmul.mubr.msk.f32.gmra.mrb[46].mxu0 %vm8774_vm6, %v2362_v61  ;;  %1752 = vst.msk [vmem:[#allocation2 + $0xa8] sm:$0xff] %vm8777_vm5, %v1674_v62  ;;  %v2738_v59 = vld [vmem:[#allocation2 + $0x29] sm:$0xff]  ;;  %v2739_v60 = vld [vmem:[#allocation2 + $0x31] sm:$0xff]  ;;  %v2740_v61 = vld [vmem:[#allocation2 + $0x39] sm:$0xff] }
 0x1ba   : > { %v2741_v62 = vld [vmem:[#allocation2 + $0x41] sm:$0xff] }
 0x1bb   : > { %v1676_v63 = vpop.permute.xlu0 %1675 }
 0x1bc   : > { %1753 = vst.msk [vmem:[#allocation2 + $0xb0] sm:$0xff] %vm8777_vm5, %v1676_v63  ;;  %v1807_v0 = vpop.permute.xlu1 %1806  ;;  %v1910_v1 = vld [vmem:[#allocation2 + $0x97] sm:$0xff]  ;;  %v2742_v63 = vld [vmem:[#allocation2 + $0x49] sm:$0xff] }
 0x1bd   : > { %v2363_v2 = vld [vmem:[#allocation2 + $0x98] sm:$0xff]  ;;  %1882 = vst.msk [vmem:[#allocation2 + $0xa8] sm:$0xff] %vm8775_vm1, %v1807_v0  ;;  %6336 = vmatprep.mubr.msk.f32.mxu1 %vm8774_vm6, %v1910_v1 }
 0x1be   : > { %6390 = vmatprep.mubr.msk.f32.mxu0 %vm8774_vm6, %v2363_v2  ;;  %v2743_v0 = vld [vmem:[#allocation2 + $0x51] sm:$0xff]  ;;  %v2744_v1 = vld [vmem:[#allocation2 + $0x59] sm:$0xff]  ;;  %v2745_v2 = vld [vmem:[#allocation2 + $0x61] sm:$0xff] }
 0x1bf   : > { %v1809_v3 = vpop.permute.xlu0 %1808  ;;  %v1911_v4 = vld [vmem:[#allocation2 + $0x9f] sm:$0xff] }
 0x1c0   : > { %v2364_v5 = vld [vmem:[#allocation2 + $0xa0] sm:$0xff]  ;;  %1883 = vst.msk [vmem:[#allocation2 + $0xb0] sm:$0xff] %vm8775_vm1, %v1809_v3  ;;  %6337 = vmatmul.mubr.msk.f32.gmra.mrb[16].mxu1 %vm8774_vm6, %v1911_v4  ;;  %v1678_v6 = vpop.permute.xlu1 %1677  ;;  %v2746_v3 = vld [vmem:[#allocation2 + $0x69] sm:$0xff]  ;;  %v2747_v4 = vld [vmem:[#allocation2 + $0x71] sm:$0xff] }
 0x1c1   : > { %6391 = vmatmul.mubr.msk.f32.gmra.mrb[48].mxu0 %vm8774_vm6, %v2364_v5  ;;  %1754 = vst.msk [vmem:[#allocation2 + $0xb8] sm:$0xff] %vm8777_vm5, %v1678_v6  ;;  %v2748_v5 = vld [vmem:[#allocation2 + $0x79] sm:$0xff]  ;;  %v2749_v6 = vld [vmem:[#allocation2 + $0x81] sm:$0xff] }
 0x1c3   : > { %v1680_v7 = vpop.permute.xlu0 %1679 }
 0x1c4   : > { %1755 = vst.msk [vmem:[#allocation2 + $0xc0] sm:$0xff] %vm8777_vm5, %v1680_v7  ;;  %v1811_v8 = vpop.permute.xlu1 %1810  ;;  %v1912_v9 = vld [vmem:[#allocation2 + $0xa7] sm:$0xff] }
 0x1c5   : > { %v2365_v10 = vld [vmem:[#allocation2 + $0xa8] sm:$0xff]  ;;  %1884 = vst.msk [vmem:[#allocation2 + $0xb8] sm:$0xff] %vm8775_vm1, %v1811_v8  ;;  %6339 = vmatprep.mubr.msk.f32.mxu1 %vm8774_vm6, %v1912_v9  ;;  %v2751_v8 = vld [vmem:[#allocation2 + $0x91] sm:$0xff]  ;;  %v2752_v9 = vld [vmem:[#allocation2 + $0x99] sm:$0xff] }
 0x1c6   : > { %6393 = vmatprep.mubr.msk.f32.mxu0 %vm8774_vm6, %v2365_v10  ;;  %v2750_v7 = vld [vmem:[#allocation2 + $0x89] sm:$0xff]  ;;  %v2753_v10 = vld [vmem:[#allocation2 + $0xa1] sm:$0xff] }
 0x1c7   : > { %v1813_v11 = vpop.permute.xlu0 %1812  ;;  %v1913_v12 = vld [vmem:[#allocation2 + $0xaf] sm:$0xff] }
 0x1c8   : > { %v2366_v14 = vld [vmem:[#allocation2 + $0xb0] sm:$0xff]  ;;  %1885 = vst.msk [vmem:[#allocation2 + $0xc0] sm:$0xff] %vm8775_vm1, %v1813_v11  ;;  %6340 = vmatmul.mubr.msk.f32.gmra.mrb[18].mxu1 %vm8774_vm6, %v1913_v12  ;;  %v1682_v15 = vpop.permute.xlu1 %1681 }
 0x1c9   : > { %6394 = vmatmul.mubr.msk.f32.gmra.mrb[50].mxu0 %vm8774_vm6, %v2366_v14  ;;  %1756 = vst.msk [vmem:[#allocation2 + $0xc8] sm:$0xff] %vm8777_vm5, %v1682_v15  ;;  %v2754_v11 = vld [vmem:[#allocation2 + $0xa9] sm:$0xff] }
 0x1cb   : > { %v1684_v16 = vpop.permute.xlu0 %1683 }
 0x1cc   : > { %1757 = vst.msk [vmem:[#allocation2 + $0xd0] sm:$0xff] %vm8777_vm5, %v1684_v16  ;;  %v1815_v17 = vpop.permute.xlu1 %1814  ;;  %v1914_v18 = vld [vmem:[#allocation2 + $0xb7] sm:$0xff] }
 0x1cd   : > { %v2367_v19 = vld [vmem:[#allocation2 + $0xb8] sm:$0xff]  ;;  %1886 = vst.msk [vmem:[#allocation2 + $0xc8] sm:$0xff] %vm8775_vm1, %v1815_v17  ;;  %6342 = vmatprep.mubr.msk.f32.mxu1 %vm8774_vm6, %v1914_v18 }
 0x1ce   : > { %6396 = vmatprep.mubr.msk.f32.mxu0 %vm8774_vm6, %v2367_v19  ;;  %v2755_v12 = vld [vmem:[#allocation2 + $0xb1] sm:$0xff] }
 0x1cf   : > { %v1817_v21 = vpop.permute.xlu0 %1816  ;;  %v1915_v22 = vld [vmem:[#allocation2 + $0xbf] sm:$0xff] }
 0x1d0   : > { %v2368_v23 = vld [vmem:[#allocation2 + $0xc0] sm:$0xff]  ;;  %1887 = vst.msk [vmem:[#allocation2 + $0xd0] sm:$0xff] %vm8775_vm1, %v1817_v21  ;;  %6343 = vmatmul.mubr.msk.f32.gmra.mrb[20].mxu1 %vm8774_vm6, %v1915_v22  ;;  %v1686_v24 = vpop.permute.xlu1 %1685 }
 0x1d1   : > { %6397 = vmatmul.mubr.msk.f32.gmra.mrb[52].mxu0 %vm8774_vm6, %v2368_v23  ;;  %1758 = vst.msk [vmem:[#allocation2 + $0xd8] sm:$0xff] %vm8777_vm5, %v1686_v24  ;;  %v2756_v14 = vld [vmem:[#allocation2 + $0xb9] sm:$0xff] }
 0x1d3   : > { %v1688_v25 = vpop.permute.xlu0 %1687 }
 0x1d4   : > { %1759 = vst.msk [vmem:[#allocation2 + $0xe0] sm:$0xff] %vm8777_vm5, %v1688_v25  ;;  %v1819_v26 = vpop.permute.xlu1 %1818  ;;  %v1916_v27 = vld [vmem:[#allocation2 + $0xc7] sm:$0xff] }
 0x1d5   : > { %v2369_v28 = vld [vmem:[#allocation2 + $0xc8] sm:$0xff]  ;;  %1888 = vst.msk [vmem:[#allocation2 + $0xd8] sm:$0xff] %vm8775_vm1, %v1819_v26  ;;  %6345 = vmatprep.mubr.msk.f32.mxu1 %vm8774_vm6, %v1916_v27  ;;  %v518_v27 = vlaneseq }
 0x1d6   : > { %6399 = vmatprep.mubr.msk.f32.mxu0 %vm8774_vm6, %v2369_v28  ;;  %v2757_v15 = vld [vmem:[#allocation2 + $0xc1] sm:$0xff] }
 0x1d7   : > { %v1821_v29 = vpop.permute.xlu0 %1820  ;;  %v1917_v30 = vld [vmem:[#allocation2 + $0xcf] sm:$0xff]  ;;  %v7498_v28 = vshrl.u32 %v518_v27, 7 }
 0x1d8   : > { %v2370_v31 = vld [vmem:[#allocation2 + $0xd0] sm:$0xff]  ;;  %1889 = vst.msk [vmem:[#allocation2 + $0xe0] sm:$0xff] %vm8775_vm1, %v1821_v29  ;;  %6346 = vmatmul.mubr.msk.f32.gmra.mrb[22].mxu1 %vm8774_vm6, %v1917_v30  ;;  %v1690_v32 = vpop.permute.xlu1 %1689 }
 0x1d9   : > { %6400 = vmatmul.mubr.msk.f32.gmra.mrb[54].mxu0 %vm8774_vm6, %v2370_v31  ;;  %1760 = vst.msk [vmem:[#allocation2 + $0xe8] sm:$0xff] %vm8777_vm5, %v1690_v32  ;;  %v2758_v16 = vld [vmem:[#allocation2 + $0xc9] sm:$0xff]  ;;  %v555_v29 = vand.u32 15, %v7498_v28  ;;  %v521_v31 = vadd.s32 16, %v7498_v28 }
 0x1db   : > { %v1692_v33 = vpop.permute.xlu0 %1691  ;;  %vm7501_vm7 = vcmp.ne.s32.totalorder %v555_v29, 0  ;;  %v533_v29 = vadd.s32 112, %v7498_v28 }
 0x1dc   : > { %1761 = vst.msk [vmem:[#allocation2 + $0xf0] sm:$0xff] %vm8777_vm5, %v1692_v33  ;;  %v1823_v34 = vpop.permute.xlu1 %1822  ;;  %v1918_v35 = vld [vmem:[#allocation2 + $0xd7] sm:$0xff] }
 0x1dd   : > { %v2371_v36 = vld [vmem:[#allocation2 + $0xd8] sm:$0xff]  ;;  %1890 = vst.msk [vmem:[#allocation2 + $0xe8] sm:$0xff] %vm8775_vm1, %v1823_v34  ;;  %6348 = vmatprep.mubr.msk.f32.mxu1 %vm8774_vm6, %v1918_v35 }
 0x1de   : > { %6402 = vmatprep.mubr.msk.f32.mxu0 %vm8774_vm6, %v2371_v36  ;;  %v2759_v17 = vld [vmem:[#allocation2 + $0xd1] sm:$0xff] }
 0x1df   : > { %v1825_v37 = vpop.permute.xlu0 %1824  ;;  %v1919_v38 = vld [vmem:[#allocation2 + $0xdf] sm:$0xff] }
 0x1e0   : > { %v2372_v13 = vld [vmem:[#allocation2 + $0xe0] sm:$0xff]  ;;  %1891 = vst.msk [vmem:[#allocation2 + $0xf0] sm:$0xff] %vm8775_vm1, %v1825_v37  ;;  %6349 = vmatmul.mubr.msk.f32.gmra.mrb[24].mxu1 %vm8774_vm6, %v1919_v38  ;;  %v1694_v39 = vpop.permute.xlu1 %1693 }
 0x1e1   : > { %6403 = vmatmul.mubr.msk.f32.gmra.mrb[56].mxu0 %vm8774_vm6, %v2372_v13  ;;  %1762 = vst.msk [vmem:[#allocation2 + $0xf8] sm:$0xff] %vm8777_vm5, %v1694_v39  ;;  %v2760_v18 = vld [vmem:[#allocation2 + $0xd9] sm:$0xff]  ;;  %v569_v13 = vand.u32 15, %v521_v31 }
 0x1e3   : > { %v1696_v42 = vpop.permute.xlu0 %1695  ;;  %vm7512_vm8 = vcmp.ne.s32.totalorder %v569_v13, 0 }
 0x1e4   : > { %1763 = vst.msk [vmem:[#allocation2 + $0x100] sm:$0xff] %vm8777_vm5, %v1696_v42  ;;  %v1827_v43 = vpop.permute.xlu1 %1826  ;;  %v1920_v44 = vld [vmem:[#allocation2 + $0xe7] sm:$0xff]  ;;  %v523_v42 = vadd.s32 32, %v7498_v28 }
 0x1e5   : > { %v2373_v45 = vld [vmem:[#allocation2 + $0xe8] sm:$0xff]  ;;  %1892 = vst.msk [vmem:[#allocation2 + $0xf8] sm:$0xff] %vm8775_vm1, %v1827_v43  ;;  %6351 = vmatprep.mubr.msk.f32.mxu1 %vm8774_vm6, %v1920_v44 }
 0x1e6   : > { %6405 = vmatprep.mubr.msk.f32.mxu0 %vm8774_vm6, %v2373_v45  ;;  %v2761_v19 = vld [vmem:[#allocation2 + $0xe1] sm:$0xff] }
 0x1e7   : > { %v1829_v46 = vpop.permute.xlu0 %1828  ;;  %v1921_v47 = vld [vmem:[#allocation2 + $0xef] sm:$0xff] }
 0x1e8   : > { %v2374_v48 = vld [vmem:[#allocation2 + $0xf0] sm:$0xff]  ;;  %1893 = vst.msk [vmem:[#allocation2 + $0x100] sm:$0xff] %vm8775_vm1, %v1829_v46  ;;  %6352 = vmatmul.mubr.msk.f32.gmra.mrb[26].mxu1 %vm8774_vm6, %v1921_v47  ;;  %v1698_v50 = vpop.permute.xlu1 %1697 }
 0x1e9   : > { %6406 = vmatmul.mubr.msk.f32.gmra.mrb[58].mxu0 %vm8774_vm6, %v2374_v48  ;;  %1764 = vst.msk [vmem:[#allocation2 + $0x108] sm:$0xff] %vm8777_vm5, %v1698_v50  ;;  %v2762_v21 = vld [vmem:[#allocation2 + $0xe9] sm:$0xff] }
 0x1eb   : > { %v1700_v41 = vpop.permute.xlu0 %1699 }
 0x1ec   : > { %1765 = vst.msk [vmem:[#allocation2 + $0x110] sm:$0xff] %vm8777_vm5, %v1700_v41  ;;  %v1922_v51 = vld [vmem:[#allocation2 + $0xf7] sm:$0xff]  ;;  %v583_v41 = vand.u32 15, %v523_v42  ;;  %v653_v42 = vand.u32 15, %v533_v29  ;;  %v541_v29 = vadd.s32 176, %v7498_v28 }
 0x1ed   : > { %v2375_v53 = vld [vmem:[#allocation2 + $0xf8] sm:$0xff]  ;;  %6354 = vmatprep.mubr.msk.f32.mxu1 %vm8774_vm6, %v1922_v51 }
 0x1ee   : > { %6408 = vmatprep.mubr.msk.f32.mxu0 %vm8774_vm6, %v2375_v53  ;;  %v2763_v22 = vld [vmem:[#allocation2 + $0xf1] sm:$0xff]  ;;  %vm7523_vm9 = vcmp.ne.s32.totalorder %v583_v41, 0  ;;  %v525_v53 = vadd.s32 48, %v7498_v28  ;;  %vm7578_vm14 = vcmp.ne.s32.totalorder %v653_v42, 0  ;;  %v3524_v41 = vld [vmem:[%s8769_s9 + $0x8] sm:$0xff] }
 0x1ef   : > { %v1923_v20 = vld [vmem:[#allocation2 + $0xff] sm:$0xff] }
 0x1f0   : > { %v2376_v54 = vld [vmem:[#allocation2 + $0x100] sm:$0xff]  ;;  %6355 = vmatmul.mubr.msk.f32.gmra.mrb[28].mxu1 %vm8774_vm6, %v1923_v20  ;;  %v2377_v57 = vld [vmem:[#allocation2 + $0x108] sm:$0xff] }
 0x1f1   : > { %6409 = vmatmul.mubr.msk.f32.gmra.mrb[60].mxu0 %vm8774_vm6, %v2376_v54  ;;  %v1924_v55 = vld [vmem:[#allocation2 + $0x107] sm:$0xff]  ;;  %v2764_v23 = vld [vmem:[#allocation2 + $0xf9] sm:$0xff] }
 0x1f2   : > { %6357 = vmatprep.mubr.msk.f32.mxu1 %vm8774_vm6, %v1924_v55  ;;  %6411 = vmatprep.mubr.msk.f32.mxu0 %vm8774_vm6, %v2377_v57  ;;  %v2765_v24 = vld [vmem:[#allocation2 + $0x101] sm:$0xff] }
 0x1f3   : > { %v1925_v40 = vld [vmem:[#allocation2 + $0x10f] sm:$0xff] }
 0x1f4   : > { %v2378_v49 = vld [vmem:[#allocation2 + $0x110] sm:$0xff]  ;;  %6358 = vmatmul.mubr.msk.f32.gmra.mrb[30].mxu1 %vm8774_vm6, %v1925_v40 }
 0x1f5   : > { %6412 = vmatmul.mubr.msk.f32.gmra.mrb[62].mxu0 %vm8774_vm6, %v2378_v49  ;;  %6420 = vmatprep.mubr.msk.f32.mxu1 %vm8774_vm6, %v2736_v52  ;;  %v2766_v25 = vld [vmem:[#allocation2 + $0x109] sm:$0xff]  ;;  %v2767_v26 = vld [vmem:[#allocation2 + $0x111] sm:$0xff] }
 0x1f8   : > { %6421 = vmatmul.mubr.msk.f32.vlgmr.msra.gmra.mrb[32].mxu1 %vm8774_vm6, %v2737_v58  ;;  %v597_v58 = vand.u32 15, %v525_v53 }
 0x1f9   : > { %6423 = vmatprep.mubr.msk.f32.mxu1 %vm8774_vm6, %v2738_v59 }
 0x1fa   : > { %vm7534_vm10 = vcmp.ne.s32.totalorder %v597_v58, 0 }
 0x1fc   : > { %6424 = vmatmul.mubr.msk.f32.gmra.mrb[34].mxu1 %vm8774_vm6, %v2739_v60  ;;  %v527_v60 = vadd.s32 64, %v7498_v28 }
 0x1fd   : > { %6426 = vmatprep.mubr.msk.f32.mxu1 %vm8774_vm6, %v2740_v61 }
 0x200   : > { %6427 = vmatmul.mubr.msk.f32.gmra.mrb[36].mxu1 %vm8774_vm6, %v2741_v62 }
 0x201   : > { %6429 = vmatprep.mubr.msk.f32.mxu1 %vm8774_vm6, %v2742_v63 }
 0x204   : > { %6430 = vmatmul.mubr.msk.f32.gmra.mrb[38].mxu1 %vm8774_vm6, %v2743_v0 }
 0x205   : > { %6432 = vmatprep.mubr.msk.f32.mxu1 %vm8774_vm6, %v2744_v1 }
 0x208   : > { %6433 = vmatmul.mubr.msk.f32.gmra.mrb[40].mxu1 %vm8774_vm6, %v2745_v2 }
 0x209   : > { %6435 = vmatprep.mubr.msk.f32.mxu1 %vm8774_vm6, %v2746_v3 }
 0x20c   : > { %6436 = vmatmul.mubr.msk.f32.gmra.mrb[42].mxu1 %vm8774_vm6, %v2747_v4  ;;  %v611_v4 = vand.u32 15, %v527_v60  ;;  %v8818_v60 = vmov 0 }
 0x20d   : > { %6438 = vmatprep.mubr.msk.f32.mxu1 %vm8774_vm6, %v2748_v5 }
 0x20e   : > { %vm7545_vm11 = vcmp.ne.s32.totalorder %v611_v4, 0 }
 0x210   : > { %6439 = vmatmul.mubr.msk.f32.gmra.mrb[44].mxu1 %vm8774_vm6, %v2749_v6  ;;  %v529_v6 = vadd.s32 80, %v7498_v28 }
 0x211   : > { %6441 = vmatprep.mubr.msk.f32.mxu1 %vm8774_vm6, %v2750_v7 }
 0x214   : > { %6442 = vmatmul.mubr.msk.f32.gmra.mrb[46].mxu1 %vm8774_vm6, %v2751_v8 }
 0x215   : > { %6444 = vmatprep.mubr.msk.f32.mxu1 %vm8774_vm6, %v2752_v9 }
 0x218   : > { %6445 = vmatmul.mubr.msk.f32.gmra.mrb[48].mxu1 %vm8774_vm6, %v2753_v10 }
 0x219   : > { %6447 = vmatprep.mubr.msk.f32.mxu1 %vm8774_vm6, %v2754_v11 }
 0x21c   : > { %6448 = vmatmul.mubr.msk.f32.gmra.mrb[50].mxu1 %vm8774_vm6, %v2755_v12 }
 0x21d   : > { %6450 = vmatprep.mubr.msk.f32.mxu1 %vm8774_vm6, %v2756_v14 }
 0x220   : > { %6451 = vmatmul.mubr.msk.f32.gmra.mrb[52].mxu1 %vm8774_vm6, %v2757_v15  ;;  %v625_v15 = vand.u32 15, %v529_v6 }
 0x221   : > { %6453 = vmatprep.mubr.msk.f32.mxu1 %vm8774_vm6, %v2758_v16 }
 0x222   : > { %vm7556_vm12 = vcmp.ne.s32.totalorder %v625_v15, 0 }
 0x224   : > { %6454 = vmatmul.mubr.msk.f32.gmra.mrb[54].mxu1 %vm8774_vm6, %v2759_v17  ;;  %v531_v17 = vadd.s32 96, %v7498_v28 }
 0x225   : > { %6456 = vmatprep.mubr.msk.f32.mxu1 %vm8774_vm6, %v2760_v18 }
 0x228   : > { %6457 = vmatmul.mubr.msk.f32.gmra.mrb[56].mxu1 %vm8774_vm6, %v2761_v19 }
 0x229   : > { %6459 = vmatprep.mubr.msk.f32.mxu1 %vm8774_vm6, %v2762_v21 }
 0x22c   : > { %6460 = vmatmul.mubr.msk.f32.gmra.mrb[58].mxu1 %vm8774_vm6, %v2763_v22 }
 0x22d   : > { %6462 = vmatprep.mubr.msk.f32.mxu1 %vm8774_vm6, %v2764_v23 }
 0x230   : > { %6463 = vmatmul.mubr.msk.f32.gmra.mrb[60].mxu1 %vm8774_vm6, %v2765_v24 }
 0x231   : > { %6465 = vmatprep.mubr.msk.f32.mxu1 %vm8774_vm6, %v2766_v25 }
 0x234   : > { %6466 = vmatmul.mubr.msk.f32.gmra.mrb[62].mxu1 %vm8774_vm6, %v2767_v26  ;;  %v639_v26 = vand.u32 15, %v531_v17 }
 0x236   : > { %vm7567_vm13 = vcmp.ne.s32.totalorder %v639_v26, 0  ;;  %v8822_v26 = vmov 0 }
 0x253   : > { %v6314_v32 = vpop.f32.mrb[0].mxu1 }
 0x254   : > { %v6368_v33 = vpop.f32.mrb[32].mxu0  ;;  %v2092_v35 = vpop.f32.mrb[1].mxu1 }
 0x255   : > { %v7506_v34 = vadd.f32 %v6368_v33, %v6314_v32  ;;  %v2545_v36 = vpop.f32.mrb[33].mxu0  ;;  %v2315_v37 = vsel %vm7501_vm7, %v2092_v35, 0.0 }
 0x256   : > { %v7510_v38 = vadd.f32 %v2545_v36, %v2315_v37 }
 0x25b   : > { %v6317_v43 = vpop.f32.mrb[2].mxu1 }
 0x25c   : > { %v6371_v44 = vpop.f32.mrb[34].mxu0  ;;  %v2102_v46 = vpop.f32.mrb[3].mxu1 }
 0x25d   : > { %v7517_v45 = vadd.f32 %v6371_v44, %v6317_v43  ;;  %v2555_v47 = vpop.f32.mrb[35].mxu0  ;;  %v2317_v48 = vsel %vm7512_vm8, %v2102_v46, 0.0  ;;  %v535_v44 = vadd.s32 128, %v7498_v28 }
 0x25e   : > { %v7521_v50 = vadd.f32 %v2555_v47, %v2317_v48  ;;  %v3523_v48 = vld [vmem:[%s8769_s9] sm:$0xff] }
 0x25f   : > { %v667_v58 = vand.u32 15, %v535_v44 }
 0x261   : > { %vm7595_vm15 = vcmp.ne.s32.totalorder %v667_v58, 0 }
 0x262   : > { %v8819_v60 = vsel %vm7595_vm15, 4294967295, %v8818_v60 }
 0x263   : > { %v6320_v20 = vpop.f32.mrb[4].mxu1 }
 0x264   : > { %v6374_v54 = vpop.f32.mrb[36].mxu0  ;;  %v2112_v57 = vpop.f32.mrb[5].mxu1 }
 0x265   : > { %v7528_v55 = vadd.f32 %v6374_v54, %v6320_v20  ;;  %v2565_v40 = vpop.f32.mrb[37].mxu0  ;;  %v2319_v49 = vsel %vm7523_vm9, %v2112_v57, 0.0  ;;  %v6694_v57 = vpack.c.bf16 %v3524_v41, %v3523_v48  ;;  %v543_v48 = vadd.s32 192, %v7498_v28 }
 0x266   : > { %v7532_v52 = vadd.f32 %v2565_v40, %v2319_v49 }
 0x267   : > { %6695 = vmatprep.subr.bf16.mxu0 %v6694_v57 }
 0x268   : > { %6697 = vmatpush3.bf16.msra.mxu0 %v6694_v57 }
 0x26b   : > { %v6323_v61 = vpop.f32.mrb[6].mxu1 }
 0x26c   : > { %v6377_v62 = vpop.f32.mrb[38].mxu0  ;;  %v2122_v0 = vpop.f32.mrb[7].mxu1 }
 0x26d   : > { %v7539_v63 = vadd.f32 %v6377_v62, %v6323_v61  ;;  %v2575_v1 = vpop.f32.mrb[39].mxu0  ;;  %v2321_v2 = vsel %vm7534_vm10, %v2122_v0, 0.0  ;;  %v537_v61 = vadd.s32 144, %v7498_v28 }
 0x26e   : > { %v7543_v3 = vadd.f32 %v2575_v1, %v2321_v2 }
 0x273   : > { %v6326_v7 = vpop.f32.mrb[8].mxu1 }
 0x274   : > { %v6380_v8 = vpop.f32.mrb[40].mxu0  ;;  %v2132_v10 = vpop.f32.mrb[9].mxu1 }
 0x275   : > { %v7550_v9 = vadd.f32 %v6380_v8, %v6326_v7  ;;  %v2585_v11 = vpop.f32.mrb[41].mxu0  ;;  %v2323_v12 = vsel %vm7545_vm11, %v2132_v10, 0.0  ;;  %v681_v8 = vand.u32 15, %v537_v61  ;;  %v8820_v10 = vmov 0 }
 0x276   : > { %v7554_v14 = vadd.f32 %v2585_v11, %v2323_v12  ;;  %v539_v11 = vadd.s32 160, %v7498_v28 }
 0x277   : > { %vm7606_vm2 = vcmp.ne.s32.totalorder %v681_v8, 0 }
 0x278   : > { %v8821_v10 = vsel %vm7606_vm2, 4294967295, %v8820_v10 }
 0x27b   : > { %v6329_v18 = vpop.f32.mrb[10].mxu1 }
 0x27c   : > { %v6383_v19 = vpop.f32.mrb[42].mxu0  ;;  %v2142_v22 = vpop.f32.mrb[11].mxu1 }
 0x27d   : > { %v7561_v21 = vadd.f32 %v6383_v19, %v6329_v18  ;;  %v2595_v23 = vpop.f32.mrb[43].mxu0  ;;  %v2325_v24 = vsel %vm7556_vm12, %v2142_v22, 0.0 }
 0x27e   : > { %v7565_v25 = vadd.f32 %v2595_v23, %v2325_v24  ;;  %v695_v24 = vand.u32 15, %v539_v11 }
 0x280   : > { %vm7617_vm3 = vcmp.ne.s32.totalorder %v695_v24, 0  ;;  %v547_v24 = vadd.s32 224, %v7498_v28 }
 0x281   : > { %v8823_v26 = vsel %vm7617_vm3, 4294967295, %v8822_v26 }
 0x283   : > { %v6332_v31 = vpop.f32.mrb[12].mxu1 }
 0x284   : > { %v6386_v32 = vpop.f32.mrb[44].mxu0  ;;  %v2152_v35 = vpop.f32.mrb[13].mxu1 }
 0x285   : > { %v7572_v33 = vadd.f32 %v6386_v32, %v6332_v31  ;;  %v2605_v36 = vpop.f32.mrb[45].mxu0  ;;  %v2327_v37 = vsel %vm7567_vm13, %v2152_v35, 0.0 }
 0x286   : > { %v7576_v13 = vadd.f32 %v2605_v36, %v2327_v37 }
 0x28b   : > { %v6335_v46 = vpop.f32.mrb[14].mxu1 }
 0x28c   : > { %v6389_v47 = vpop.f32.mrb[46].mxu0  ;;  %v2162_v20 = vpop.f32.mrb[15].mxu1 }
 0x28d   : > { %v7589_v53 = vadd.f32 %v6389_v47, %v6335_v46  ;;  %v2615_v54 = vpop.f32.mrb[47].mxu0  ;;  %v2329_v40 = vsel %vm7578_vm14, %v2162_v20, 0.0  ;;  %v709_v46 = vand.u32 15, %v541_v29  ;;  %v8824_v47 = vmov 0 }
 0x28e   : > { %v7593_v49 = vadd.f32 %v2615_v54, %v2329_v40 }
 0x28f   : > { %vm7628_vm4 = vcmp.ne.s32.totalorder %v709_v46, 0 }
 0x290   : > { %v8825_v47 = vsel %vm7628_vm4, 4294967295, %v8824_v47 }
 0x293   : > { %v6338_v62 = vpop.f32.mrb[16].mxu1 }
 0x294   : > { %v6392_v0 = vpop.f32.mrb[48].mxu0  ;;  %v2172_v2 = vpop.f32.mrb[17].mxu1 }
 0x295   : > { %v7600_v1 = vadd.f32 %v6392_v0, %v6338_v62  ;;  %v2625_v4 = vpop.f32.mrb[49].mxu0  ;;  %v2331_v6 = vsel %vm7595_vm15, %v2172_v2, 0.0  ;;  %v723_v62 = vand.u32 15, %v543_v48  ;;  %v8826_v0 = vmov 0 }
 0x296   : > { %v7604_v7 = vadd.f32 %v2625_v4, %v2331_v6  ;;  %v545_v2 = vadd.s32 208, %v7498_v28  ;;  %v751_v48 = vand.u32 15, %v547_v24  ;;  %v8832_v24 = vmov 0 }
 0x297   : > { %vm7639_vm6 = vcmp.ne.s32.totalorder %v723_v62, 0 }
 0x298   : > { %v8827_v0 = vsel %vm7639_vm6, 4294967295, %v8826_v0  ;;  %vm7663_vm0 = vcmp.ne.s32.totalorder %v751_v48, 0 }
 0x29b   : > { %v6341_v12 = vpop.f32.mrb[18].mxu1 }
 0x29c   : > { %v6395_v15 = vpop.f32.mrb[50].mxu0  ;;  %v2182_v18 = vpop.f32.mrb[19].mxu1 }
 0x29d   : > { %v7611_v17 = vadd.f32 %v6395_v15, %v6341_v12  ;;  %v2635_v19 = vpop.f32.mrb[51].mxu0  ;;  %v2333_v22 = vsel %vm7606_vm2, %v2182_v18, 0.0 }
 0x29e   : > { %v7615_v23 = vadd.f32 %v2635_v19, %v2333_v22  ;;  %v737_v19 = vand.u32 15, %v545_v2  ;;  %v8828_v22 = vmov 0 }
 0x2a0   : > { %vm7650_vm1 = vcmp.ne.s32.totalorder %v737_v19, 0 }
 0x2a1   : > { %v8829_v22 = vsel %vm7650_vm1, 4294967295, %v8828_v22 }
 0x2a3   : > { %v6344_v31 = vpop.f32.mrb[20].mxu1 }
 0x2a4   : > { %v6398_v32 = vpop.f32.mrb[52].mxu0  ;;  %v2192_v36 = vpop.f32.mrb[21].mxu1 }
 0x2a5   : > { %v7622_v35 = vadd.f32 %v6398_v32, %v6344_v31  ;;  %v2645_v37 = vpop.f32.mrb[53].mxu0  ;;  %v2335_v42 = vsel %vm7617_vm3, %v2192_v36, 0.0  ;;  %vm8925_vm3 = vcmask 130112  }
 0x2a6   : > { %v7626_v44 = vadd.f32 %v2645_v37, %v2335_v42 }
 0x2ab   : > { %v6347_v41 = vpop.f32.mrb[22].mxu1 }
 0x2ac   : > { %v6401_v20 = vpop.f32.mrb[54].mxu0  ;;  %v2202_v57 = vpop.f32.mrb[23].mxu1 }
 0x2ad   : > { %v7633_v54 = vadd.f32 %v6401_v20, %v6347_v41  ;;  %v2655_v40 = vpop.f32.mrb[55].mxu0  ;;  %v2337_v58 = vsel %vm7628_vm4, %v2202_v57, 0.0  ;;  %v549_v41 = vadd.s32 240, %v7498_v28  ;;  %v520_v20 = vadd.s32 8, %v7498_v28 }
 0x2ae   : > { %v7637_v61 = vadd.f32 %v2655_v40, %v2337_v58  ;;  %v8830_v57 = vmov 0 }
 0x2af   : > { %v8831_v57 = vsel %vm7663_vm0, 4294967295, %v8830_v57  ;;  %v765_v40 = vand.u32 15, %v549_v41 }
 0x2b1   : > { %vm7674_vm5 = vcmp.ne.s32.totalorder %v765_v40, 0 }
 0x2b2   : > { %v8833_v24 = vsel %vm7674_vm5, 4294967295, %v8832_v24 }
 0x2b3   : > { %v6350_v4 = vpop.f32.mrb[24].mxu1 }
 0x2b4   : > { %v6404_v6 = vpop.f32.mrb[56].mxu0  ;;  %v2212_v11 = vpop.f32.mrb[25].mxu1 }
 0x2b5   : > { %v7644_v8 = vadd.f32 %v6404_v6, %v6350_v4  ;;  %v2665_v12 = vpop.f32.mrb[57].mxu0  ;;  %v2339_v15 = vsel %vm7639_vm6, %v2212_v11, 0.0  ;;  %v522_v11 = vadd.s32 24, %v7498_v28 }
 0x2b6   : > { %v7648_v18 = vadd.f32 %v2665_v12, %v2339_v15  ;;  %v562_v15 = vand.u32 15, %v520_v20  ;;  %v524_v20 = vadd.s32 40, %v7498_v28 }
 0x2b7   : > { %v576_v48 = vand.u32 15, %v522_v11 }
 0x2bb   : > { %v6353_v29 = vpop.f32.mrb[26].mxu1 }
 0x2bc   : > { %v6407_v31 = vpop.f32.mrb[58].mxu0  ;;  %v2222_v36 = vpop.f32.mrb[27].mxu1 }
 0x2bd   : > { %v7655_v32 = vadd.f32 %v6407_v31, %v6353_v29  ;;  %v2675_v37 = vpop.f32.mrb[59].mxu0  ;;  %v2341_v42 = vsel %vm7650_vm1, %v2222_v36, 0.0  ;;  %vm7682_vm1 = vcmp.ne.s32.totalorder %v562_v15, 15 }
 0x2be   : > { %v7659_v46 = vadd.f32 %v2675_v37, %v2341_v42 }
 0x2c3   : > { %v6356_v58 = vpop.f32.mrb[28].mxu1 }
 0x2c4   : > { %v6410_v62 = vpop.f32.mrb[60].mxu0  ;;  %v2232_v4 = vpop.f32.mrb[29].mxu1 }
 0x2c5   : > { %v7667_v2 = vadd.f32 %v6410_v62, %v6356_v58  ;;  %v2685_v6 = vpop.f32.mrb[61].mxu0  ;;  %v2343_v12 = vsel %vm7663_vm0, %v2232_v4, 0.0  ;;  %v8834_v58 = vmov 0  ;;  %vm7691_vm0 = vcmp.ne.s32.totalorder %v576_v48, 15 }
 0x2c6   : > { %v7672_v19 = vadd.f32 %v2685_v6, %v2343_v12  ;;  %v8835_v58 = vsel %vm7682_vm1, 4294967295, %v8834_v58  ;;  %v8836_v12 = vmov 0  ;;  %v528_v48 = vadd.s32 72, %v7498_v28 }
 0x2c7   : > { %v6359_v29 = vpop.f32.mrb[30].mxu1  ;;  %v8837_v12 = vsel %vm7691_vm0, 4294967295, %v8836_v12 }
 0x2c8   : > { %v6413_v31 = vpop.f32.mrb[62].mxu0  ;;  %v2242_v37 = vpop.f32.mrb[31].mxu1 }
 0x2c9   : > { %v7678_v36 = vadd.f32 %v6413_v31, %v6359_v29  ;;  %v2695_v42 = vpop.f32.mrb[63].mxu0  ;;  %v2345_v41 = vsel %vm7674_vm5, %v2242_v37, 0.0  ;;  %v590_v29 = vand.u32 15, %v524_v20  ;;  %v526_v31 = vadd.s32 56, %v7498_v28 }
 0x2ca   : > { %v7687_v40 = vadd.f32 %v2695_v42, %v2345_v41 }
 0x2cb   : > { %v6422_v62 = vpop.f32.mrb[32].mxu1  ;;  %v604_v20 = vand.u32 15, %v526_v31 }
 0x2cc   : > { %v3158_v4 = vsel %vm7682_vm1, %v6422_v62, 0.0  ;;  %v2934_v6 = vpop.f32.mrb[33].mxu1  ;;  %vm7705_vm1 = vcmp.ne.s32.totalorder %v590_v29, 15  ;;  %v530_v29 = vadd.s32 88, %v7498_v28 }
 0x2cd   : > { %v3190_v11 = vadd.f32 %v3158_v4, %v7506_v34  ;;  %v3189_v15 = vadd.f32 %v2934_v6, %v7510_v38  ;;  %v8838_v38 = vmov 0 }
 0x2ce   : > { %v8839_v38 = vsel %vm7705_vm1, 4294967295, %v8838_v38 }
 0x2cf   : > { %3255 = vrot.lane.b32.xlu0 %v3190_v11, %s6731_s21  ;;  %3253 = vrot.lane.b32.xlu1 %v3189_v15, %s6731_s21  ;;  %v6425_v37 = vpop.f32.mrb[34].mxu1  ;;  %v618_v15 = vand.u32 15, %v528_v48  ;;  %v8842_v48 = vmov 0 }
 0x2d0   : > { %v3160_v42 = vsel %vm7691_vm0, %v6425_v37, 0.0  ;;  %v2944_v41 = vpop.f32.mrb[35].mxu1  ;;  %vm7715_vm0 = vcmp.ne.s32.totalorder %v604_v20, 15 }
 0x2d1   : > { %v3192_v62 = vadd.f32 %v3160_v42, %v7517_v45  ;;  %v3191_v34 = vadd.f32 %v2944_v41, %v7521_v50  ;;  %v8840_v50 = vmov 0 }
 0x2d2   : > { %v8841_v50 = vsel %vm7715_vm0, 4294967295, %v8840_v50 }
 0x2d3   : > { %3259 = vrot.lane.b32.xlu0 %v3192_v62, %s6731_s21  ;;  %3257 = vrot.lane.b32.xlu1 %v3191_v34, %s6731_s21  ;;  %v6428_v4 = vpop.f32.mrb[36].mxu1  ;;  %v632_v62 = vand.u32 15, %v530_v29  ;;  %v532_v34 = vadd.s32 104, %v7498_v28 }
 0x2d4   : > { %v3162_v6 = vsel %vm7705_vm1, %v6428_v4, 0.0  ;;  %v2954_v11 = vpop.f32.mrb[37].mxu1  ;;  %vm7724_vm1 = vcmp.ne.s32.totalorder %v618_v15, 15 }
 0x2d5   : > { %v3194_v37 = vadd.f32 %v3162_v6, %v7528_v55  ;;  %v3193_v45 = vadd.f32 %v2954_v11, %v7532_v52  ;;  %v8843_v48 = vsel %vm7724_vm1, 4294967295, %v8842_v48  ;;  %v534_v11 = vadd.s32 120, %v7498_v28 }
 0x2d7   : > { %3263 = vrot.lane.b32.xlu0 %v3194_v37, %s6731_s21  ;;  %3261 = vrot.lane.b32.xlu1 %v3193_v45, %s6731_s21  ;;  %v6431_v31 = vpop.f32.mrb[38].mxu1  ;;  %v646_v37 = vand.u32 15, %v532_v34 }
 0x2d8   : > { %v3164_v42 = vsel %vm7715_vm0, %v6431_v31, 0.0  ;;  %v2964_v41 = vpop.f32.mrb[39].mxu1  ;;  %vm7738_vm0 = vcmp.ne.s32.totalorder %v632_v62, 15 }
 0x2d9   : > { %v3196_v55 = vadd.f32 %v3164_v42, %v7539_v63  ;;  %v3195_v52 = vadd.f32 %v2964_v41, %v7543_v3  ;;  %v8844_v3 = vmov 0  ;;  %v660_v42 = vand.u32 15, %v534_v11 }
 0x2da   : > { %v8845_v3 = vsel %vm7738_vm0, 4294967295, %v8844_v3 }
 0x2db   : > { %3267 = vrot.lane.b32.xlu0 %v3196_v55, %s6731_s21  ;;  %3265 = vrot.lane.b32.xlu1 %v3195_v52, %s6731_s21  ;;  %v6434_v20 = vpop.f32.mrb[40].mxu1  ;;  %v536_v55 = vadd.s32 136, %v7498_v28 }
 0x2dc   : > { %v3166_v4 = vsel %vm7724_vm1, %v6434_v20, 0.0  ;;  %v2974_v6 = vpop.f32.mrb[41].mxu1  ;;  %vm7748_vm1 = vcmp.ne.s32.totalorder %v646_v37, 15  ;;  %v8848_v20 = vmov 0  ;;  %v540_v37 = vadd.s32 168, %v7498_v28 }
 0x2dd   : > { %v3198_v15 = vadd.f32 %v3166_v4, %v7550_v9  ;;  %v3197_v63 = vadd.f32 %v2974_v6, %v7554_v14  ;;  %v8846_v14 = vmov 0  ;;  %v674_v4 = vand.u32 15, %v536_v55 }
 0x2de   : > { %v8847_v14 = vsel %vm7748_vm1, 4294967295, %v8846_v14  ;;  %v538_v6 = vadd.s32 152, %v7498_v28 }
 0x2df   : > { %3271 = vrot.lane.b32.xlu0 %v3198_v15, %s6731_s21  ;;  %3269 = vrot.lane.b32.xlu1 %v3197_v63, %s6731_s21  ;;  %v6437_v45 = vpop.f32.mrb[42].mxu1 }
 0x2e0   : > { %v3168_v29 = vsel %vm7738_vm0, %v6437_v45, 0.0  ;;  %v2984_v31 = vpop.f32.mrb[43].mxu1  ;;  %vm7757_vm0 = vcmp.ne.s32.totalorder %v660_v42, 15 }
 0x2e1   : > { %v3200_v41 = vadd.f32 %v3168_v29, %v7561_v21  ;;  %v3199_v9 = vadd.f32 %v2984_v31, %v7565_v25  ;;  %v8849_v20 = vsel %vm7757_vm0, 4294967295, %v8848_v20  ;;  %v688_v29 = vand.u32 15, %v538_v6 }
 0x2e2   : > { %v544_v6 = vadd.s32 200, %v7498_v28 }
 0x2e3   : > { %3275 = vrot.lane.b32.xlu0 %v3200_v41, %s6731_s21  ;;  %3273 = vrot.lane.b32.xlu1 %v3199_v9, %s6731_s21  ;;  %v6440_v52 = vpop.f32.mrb[44].mxu1  ;;  %v702_v9 = vand.u32 15, %v540_v37  ;;  %v546_v37 = vadd.s32 216, %v7498_v28 }
 0x2e4   : > { %v3170_v62 = vsel %vm7748_vm1, %v6440_v52, 0.0  ;;  %v2994_v34 = vpop.f32.mrb[45].mxu1  ;;  %vm7771_vm1 = vcmp.ne.s32.totalorder %v674_v4, 15  ;;  %v542_v52 = vadd.s32 184, %v7498_v28 }
 0x2e5   : > { %v3202_v21 = vadd.f32 %v3170_v62, %v7572_v33  ;;  %v3201_v25 = vadd.f32 %v2994_v34, %v7576_v13  ;;  %v8850_v13 = vmov 0 }
 0x2e6   : > { %v8851_v13 = vsel %vm7771_vm1, 4294967295, %v8850_v13  ;;  %v716_v4 = vand.u32 15, %v542_v52 }
 0x2e7   : > { %3279 = vrot.lane.b32.xlu0 %v3202_v21, %s6731_s21  ;;  %3277 = vrot.lane.b32.xlu1 %v3201_v25, %s6731_s21  ;;  %v6443_v11 = vpop.f32.mrb[46].mxu1  ;;  %v8854_v25 = vmov 0 }
 0x2e8   : > { %v3172_v15 = vsel %vm7757_vm0, %v6443_v11, 0.0  ;;  %v3004_v63 = vpop.f32.mrb[47].mxu1  ;;  %vm7781_vm0 = vcmp.ne.s32.totalorder %v688_v29, 15 }
 0x2e9   : > { %v3204_v45 = vadd.f32 %v3172_v15, %v7589_v53  ;;  %v3203_v33 = vadd.f32 %v3004_v63, %v7593_v49  ;;  %v8852_v49 = vmov 0 }
 0x2ea   : > { %v8853_v49 = vsel %vm7781_vm0, 4294967295, %v8852_v49 }
 0x2eb   : > { %3283 = vrot.lane.b32.xlu0 %v3204_v45, %s6731_s21  ;;  %3281 = vrot.lane.b32.xlu1 %v3203_v33, %s6731_s21  ;;  %v6446_v31 = vpop.f32.mrb[48].mxu1  ;;  %v730_v33 = vand.u32 15, %v544_v6 }
 0x2ec   : > { %v3174_v42 = vsel %vm7771_vm1, %v6446_v31, 0.0  ;;  %v3014_v41 = vpop.f32.mrb[49].mxu1  ;;  %vm7790_vm1 = vcmp.ne.s32.totalorder %v702_v9, 15 }
 0x2ed   : > { %v3206_v55 = vadd.f32 %v3174_v42, %v7600_v1  ;;  %v3205_v53 = vadd.f32 %v3014_v41, %v7604_v7  ;;  %v8855_v25 = vsel %vm7790_vm1, 4294967295, %v8854_v25  ;;  %v744_v41 = vand.u32 15, %v546_v37 }
 0x2ef   : > { %3287 = vrot.lane.b32.xlu0 %v3206_v55, %s6731_s21  ;;  %3285 = vrot.lane.b32.xlu1 %v3205_v53, %s6731_s21  ;;  %v6449_v62 = vpop.f32.mrb[50].mxu1  ;;  %v548_v55 = vadd.s32 232, %v7498_v28 }
 0x2f0   : > { %v3176_v34 = vsel %vm7781_vm0, %v6449_v62, 0.0  ;;  %v3024_v21 = vpop.f32.mrb[51].mxu1  ;;  %vm7804_vm0 = vcmp.ne.s32.totalorder %v716_v4, 15 }
 0x2f1   : > { %v3208_v1 = vadd.f32 %v3176_v34, %v7611_v17  ;;  %v3207_v7 = vadd.f32 %v3024_v21, %v7615_v23  ;;  %v8856_v23 = vmov 0  ;;  %v8860_v34 = vmov 0 }
 0x2f2   : > { %v8857_v23 = vsel %vm7804_vm0, 4294967295, %v8856_v23  ;;  %v758_v21 = vand.u32 15, %v548_v55 }
 0x2f3   : > { %3291 = vrot.lane.b32.xlu0 %v3208_v1, %s6731_s21  ;;  %3289 = vrot.lane.b32.xlu1 %v3207_v7, %s6731_s21  ;;  %v6452_v11 = vpop.f32.mrb[52].mxu1  ;;  %v550_v1 = vadd.s32 248, %v7498_v28 }
 0x2f4   : > { %v3178_v15 = vsel %vm7790_vm1, %v6452_v11, 0.0  ;;  %v3034_v63 = vpop.f32.mrb[53].mxu1  ;;  %vm7814_vm1 = vcmp.ne.s32.totalorder %v730_v33, 15 }
 0x2f5   : > { %v3210_v45 = vadd.f32 %v3178_v15, %v7622_v35  ;;  %v3209_v17 = vadd.f32 %v3034_v63, %v7626_v44  ;;  %v8858_v44 = vmov 0 }
 0x2f6   : > { %v8859_v44 = vsel %vm7814_vm1, 4294967295, %v8858_v44 }
 0x2f7   : > { %3295 = vrot.lane.b32.xlu0 %v3210_v45, %s6731_s21  ;;  %3293 = vrot.lane.b32.xlu1 %v3209_v17, %s6731_s21  ;;  %v6455_v29 = vpop.f32.mrb[54].mxu1  ;;  %v8864_v45 = vmov 0 }
 0x2f8   : > { %v3180_v31 = vsel %vm7804_vm0, %v6455_v29, 0.0  ;;  %v3044_v42 = vpop.f32.mrb[55].mxu1  ;;  %vm7823_vm0 = vcmp.ne.s32.totalorder %v744_v41, 15 }
 0x2f9   : > { %v3212_v9 = vadd.f32 %v3180_v31, %v7633_v54  ;;  %v3211_v35 = vadd.f32 %v3044_v42, %v7637_v61  ;;  %v8861_v34 = vsel %vm7823_vm0, 4294967295, %v8860_v34 }
 0x2fb   : > { %3299 = vrot.lane.b32.xlu0 %v3212_v9, %s6731_s21  ;;  %3297 = vrot.lane.b32.xlu1 %v3211_v35, %s6731_s21  ;;  %v6458_v53 = vpop.f32.mrb[56].mxu1 }
 0x2fc   : > { %v3182_v52 = vsel %vm7814_vm1, %v6458_v53, 0.0  ;;  %v3054_v62 = vpop.f32.mrb[57].mxu1  ;;  %vm7836_vm1 = vcmp.ne.s32.totalorder %v758_v21, 15  ;;  %v7875_v53 = vld [vmem:[%s8768_s8] ss:$0 sm:$0xff] }
 0x2fd   : > { %v3214_v54 = vadd.f32 %v3182_v52, %v7644_v8  ;;  %v3213_v61 = vadd.f32 %v3054_v62, %v7648_v18  ;;  %v8862_v8 = vmov 0  ;;  %v772_v18 = vand.u32 15, %v550_v1 }
 0x2fe   : > { %v8863_v8 = vsel %vm7836_vm1, 4294967295, %v8862_v8 }
 0x2ff   : > { %3303 = vrot.lane.b32.xlu0 %v3214_v54, %s6731_s21  ;;  %3301 = vrot.lane.b32.xlu1 %v3213_v61, %s6731_s21  ;;  %v6461_v7 = vpop.f32.mrb[58].mxu1 }
 0x300   : > { %v3184_v4 = vsel %vm7823_vm0, %v6461_v7, 0.0  ;;  %v3064_v6 = vpop.f32.mrb[59].mxu1  ;;  %vm7846_vm0 = vcmp.ne.s32.totalorder %v772_v18, 15 }
 0x301   : > { %v3216_v11 = vadd.f32 %v3184_v4, %v7655_v32  ;;  %v3215_v15 = vadd.f32 %v3064_v6, %v7659_v46  ;;  %v8865_v45 = vsel %vm7846_vm0, 4294967295, %v8864_v45 }
 0x303   : > { %3307 = vrot.lane.b32.xlu0 %v3216_v11, %s6731_s21  ;;  %3305 = vrot.lane.b32.xlu1 %v3215_v15, %s6731_s21  ;;  %v6464_v28 = vpop.f32.mrb[60].mxu1 }
 0x304   : > { %v3186_v63 = vsel %vm7836_vm1, %v6464_v28, 0.0  ;;  %v3074_v37 = vpop.f32.mrb[61].mxu1  ;;  %vm8866_vm1 = vcmask 130112  }
 0x305   : > { %v3218_v32 = vadd.f32 %v3186_v63, %v7667_v2  ;;  %v3217_v46 = vadd.f32 %v3074_v37, %v7672_v19  ;;  %vm8867_vm5 = vmmov %vm8866_vm1 }
 0x307   : > { %3311 = vrot.lane.b32.xlu0 %v3218_v32, %s6731_s21  ;;  %3309 = vrot.lane.b32.xlu1 %v3217_v46, %s6731_s21  ;;  %v6467_v17 = vpop.f32.mrb[62].mxu1 }
 0x308   : > { %v3188_v33 = vsel %vm7846_vm0, %v6467_v17, 0.0  ;;  %v3084_v29 = vpop.f32.mrb[63].mxu1  ;;  %vm8868_vm0 = vmmov %vm8866_vm1 }
 0x309   : > { %v3220_v2 = vadd.f32 %v3188_v33, %v7678_v36  ;;  %v3219_v19 = vadd.f32 %v3084_v29, %v7687_v40  ;;  %vm8869_vm6 = vmmov %vm8868_vm0  ;;  %v7869_v36 = vld [vmem:[%s8767_s7] ss:$0 sm:$0xff] }
 0x30b   : > { %3315 = vrot.lane.b32.xlu0 %v3220_v2, %s6731_s21  ;;  %3313 = vrot.lane.b32.xlu1 %v3219_v19, %s6731_s21 }
 0x341   : > { %v3256_v31 = vpop.permute.xlu0 %3255  ;;  %v3254_v42 = vpop.permute.xlu1 %3253 }
 0x342   : > { %3350 = vst.msk [vmem:[%s6821_s18 + $0x8] sm:$0xff] %vm8866_vm1, %v3256_v31  ;;  %vm8870_vm1 = vmmov %vm8868_vm0 }
 0x343   : > { %3349 = vst.msk [vmem:[%s6821_s18] sm:$0xff] %vm8867_vm5, %v3254_v42  ;;  %vm3525_vm5 = vcmask 130048  }
 0x345   : > { %v3260_v41 = vpop.permute.xlu0 %3259  ;;  %v3258_v9 = vpop.permute.xlu1 %3257 }
 0x346   : > { %3352 = vst.msk [vmem:[%s6821_s18 + $0x18] sm:$0xff] %vm8868_vm0, %v3260_v41 }
 0x347   : > { %3351 = vst.msk [vmem:[%s6821_s18 + $0x10] sm:$0xff] %vm8869_vm6, %v3258_v9  ;;  %vm8871_vm6 = vmmov %vm8868_vm0 }
 0x349   : > { %v3264_v40 = vpop.permute.xlu0 %3263  ;;  %v3262_v35 = vpop.permute.xlu1 %3261  ;;  %v3382_v52 = vld [vmem:[%s6821_s18 + $0x8] sm:$0xff] }
 0x34a   : > { %v3381_v55 = vld [vmem:[%s6821_s18] sm:$0xff]  ;;  %3354 = vst.msk [vmem:[%s6821_s18 + $0x28] sm:$0xff] %vm8868_vm0, %v3264_v40  ;;  %v3421_v54 = vmul.f32 %v7869_v36, %v3382_v52 }
 0x34b   : > { %3353 = vst.msk [vmem:[%s6821_s18 + $0x20] sm:$0xff] %vm8870_vm1, %v3262_v35  ;;  %v3420_v62 = vmul.f32 %v7869_v36, %v3381_v55  ;;  %vm8872_vm1 = vmmov %vm8868_vm0 }
 0x34c   : > { %v3460_v21 = vadd.f32 %v7875_v53, %v3421_v54 }
 0x34d   : > { %v3459_v61 = vadd.f32 %v7875_v53, %v3420_v62  ;;  %v3268_v1 = vpop.permute.xlu0 %3267  ;;  %v3266_v7 = vpop.permute.xlu1 %3265  ;;  %v3384_v6 = vld [vmem:[%s6821_s18 + $0x18] sm:$0xff] }
 0x34e   : > { %v3383_v4 = vld [vmem:[%s6821_s18 + $0x10] sm:$0xff]  ;;  %3356 = vst.msk [vmem:[%s6821_s18 + $0x38] sm:$0xff] %vm8871_vm6, %v3268_v1  ;;  %v3492_v15 = vmax.f32 %v3460_v21, 0.0  ;;  %v3423_v28 = vmul.f32 %v7869_v36, %v3384_v6  ;;  %vm8873_vm6 = vmmov %vm8868_vm0 }
 0x34f   : > { %3355 = vst.msk [vmem:[%s6821_s18 + $0x30] sm:$0xff] %vm8868_vm0, %v3266_v7  ;;  %v3491_v11 = vmax.f32 %v3459_v61, 0.0  ;;  %v3422_v18 = vmul.f32 %v7869_v36, %v3383_v4 }
 0x350   : > { %v3462_v37 = vadd.f32 %v7875_v53, %v3423_v28 }
 0x351   : > { %6472 = vmatprep.mubr.msk.f32.mxu0 %vm3525_vm5, %v3491_v11  ;;  %v3461_v63 = vadd.f32 %v7875_v53, %v3422_v18  ;;  %v3272_v32 = vpop.permute.xlu0 %3271  ;;  %v3270_v46 = vpop.permute.xlu1 %3269  ;;  %v3386_v33 = vld [vmem:[%s6821_s18 + $0x28] sm:$0xff] }
 0x352   : > { %6473 = vmatmul.mubr.msk.f32.vlgmr.msra.gmra.mrb[64].mxu0 %vm3525_vm5, %v3492_v15  ;;  %v3385_v17 = vld [vmem:[%s6821_s18 + $0x20] sm:$0xff]  ;;  %3358 = vst.msk [vmem:[%s6821_s18 + $0x48] sm:$0xff] %vm8872_vm1, %v3272_v32  ;;  %v3494_v2 = vmax.f32 %v3462_v37, 0.0  ;;  %v3425_v31 = vmul.f32 %v7869_v36, %v3386_v33  ;;  %vm8874_vm1 = vmmov %vm8868_vm0 }
 0x353   : > { %3357 = vst.msk [vmem:[%s6821_s18 + $0x40] sm:$0xff] %vm8873_vm6, %v3270_v46  ;;  %v3493_v29 = vmax.f32 %v3461_v63, 0.0  ;;  %v3424_v19 = vmul.f32 %v7869_v36, %v3385_v17  ;;  %vm8875_vm6 = vmmov %vm8868_vm0 }
 0x354   : > { %v3464_v41 = vadd.f32 %v7875_v53, %v3425_v31 }
 0x355   : > { %6475 = vmatprep.mubr.msk.f32.mxu0 %vm3525_vm5, %v3493_v29  ;;  %v3463_v42 = vadd.f32 %v7875_v53, %v3424_v19  ;;  %v3276_v9 = vpop.permute.xlu0 %3275  ;;  %v3274_v40 = vpop.permute.xlu1 %3273  ;;  %v3388_v55 = vld [vmem:[%s6821_s18 + $0x38] sm:$0xff] }
 0x356   : > { %6476 = vmatmul.mubr.msk.f32.gmra.mrb[66].mxu0 %vm3525_vm5, %v3494_v2  ;;  %v3387_v35 = vld [vmem:[%s6821_s18 + $0x30] sm:$0xff]  ;;  %3360 = vst.msk [vmem:[%s6821_s18 + $0x58] sm:$0xff] %vm8868_vm0, %v3276_v9  ;;  %v3496_v62 = vmax.f32 %v3464_v41, 0.0  ;;  %v3427_v61 = vmul.f32 %v7869_v36, %v3388_v55 }
 0x357   : > { %3359 = vst.msk [vmem:[%s6821_s18 + $0x50] sm:$0xff] %vm8874_vm1, %v3274_v40  ;;  %v3495_v52 = vmax.f32 %v3463_v42, 0.0  ;;  %v3426_v54 = vmul.f32 %v7869_v36, %v3387_v35  ;;  %vm8876_vm1 = vmmov %vm8868_vm0 }
 0x358   : > { %v3466_v1 = vadd.f32 %v7875_v53, %v3427_v61 }
 0x359   : > { %6478 = vmatprep.mubr.msk.f32.mxu0 %vm3525_vm5, %v3495_v52  ;;  %v3465_v21 = vadd.f32 %v7875_v53, %v3426_v54  ;;  %v3280_v7 = vpop.permute.xlu0 %3279  ;;  %v3278_v4 = vpop.permute.xlu1 %3277  ;;  %v3390_v11 = vld [vmem:[%s6821_s18 + $0x48] sm:$0xff] }
 0x35a   : > { %6479 = vmatmul.mubr.msk.f32.gmra.mrb[68].mxu0 %vm3525_vm5, %v3496_v62  ;;  %v3389_v6 = vld [vmem:[%s6821_s18 + $0x40] sm:$0xff]  ;;  %3362 = vst.msk [vmem:[%s6821_s18 + $0x68] sm:$0xff] %vm8875_vm6, %v3280_v7  ;;  %v3498_v18 = vmax.f32 %v3466_v1, 0.0  ;;  %v3429_v63 = vmul.f32 %v7869_v36, %v3390_v11  ;;  %vm8877_vm6 = vmmov %vm8868_vm0 }
 0x35b   : > { %3361 = vst.msk [vmem:[%s6821_s18 + $0x60] sm:$0xff] %vm8868_vm0, %v3278_v4  ;;  %v3497_v15 = vmax.f32 %v3465_v21, 0.0  ;;  %v3428_v28 = vmul.f32 %v7869_v36, %v3389_v6 }
 0x35c   : > { %v3468_v32 = vadd.f32 %v7875_v53, %v3429_v63 }
 0x35d   : > { %6481 = vmatprep.mubr.msk.f32.mxu0 %vm3525_vm5, %v3497_v15  ;;  %v3467_v37 = vadd.f32 %v7875_v53, %v3428_v28  ;;  %v3284_v46 = vpop.permute.xlu0 %3283  ;;  %v3282_v17 = vpop.permute.xlu1 %3281  ;;  %v3392_v29 = vld [vmem:[%s6821_s18 + $0x58] sm:$0xff] }
 0x35e   : > { %6482 = vmatmul.mubr.msk.f32.gmra.mrb[70].mxu0 %vm3525_vm5, %v3498_v18  ;;  %v3391_v33 = vld [vmem:[%s6821_s18 + $0x50] sm:$0xff]  ;;  %3364 = vst.msk [vmem:[%s6821_s18 + $0x78] sm:$0xff] %vm8876_vm1, %v3284_v46  ;;  %v3500_v19 = vmax.f32 %v3468_v32, 0.0  ;;  %v3431_v42 = vmul.f32 %v7869_v36, %v3392_v29  ;;  %vm8878_vm1 = vmmov %vm8868_vm0 }
 0x35f   : > { %3363 = vst.msk [vmem:[%s6821_s18 + $0x70] sm:$0xff] %vm8877_vm6, %v3282_v17  ;;  %v3499_v2 = vmax.f32 %v3467_v37, 0.0  ;;  %v3430_v31 = vmul.f32 %v7869_v36, %v3391_v33  ;;  %vm8879_vm6 = vmmov %vm8868_vm0 }
 0x360   : > { %v3470_v9 = vadd.f32 %v7875_v53, %v3431_v42 }
 0x361   : > { %6484 = vmatprep.mubr.msk.f32.mxu0 %vm3525_vm5, %v3499_v2  ;;  %v3469_v41 = vadd.f32 %v7875_v53, %v3430_v31  ;;  %v3288_v40 = vpop.permute.xlu0 %3287  ;;  %v3286_v35 = vpop.permute.xlu1 %3285  ;;  %v3394_v52 = vld [vmem:[%s6821_s18 + $0x68] sm:$0xff] }
 0x362   : > { %6485 = vmatmul.mubr.msk.f32.gmra.mrb[72].mxu0 %vm3525_vm5, %v3500_v19  ;;  %v3393_v55 = vld [vmem:[%s6821_s18 + $0x60] sm:$0xff]  ;;  %3366 = vst.msk [vmem:[%s6821_s18 + $0x88] sm:$0xff] %vm8868_vm0, %v3288_v40  ;;  %v3502_v54 = vmax.f32 %v3470_v9, 0.0  ;;  %v3433_v21 = vmul.f32 %v7869_v36, %v3394_v52 }
 0x363   : > { %3365 = vst.msk [vmem:[%s6821_s18 + $0x80] sm:$0xff] %vm8878_vm1, %v3286_v35  ;;  %v3501_v62 = vmax.f32 %v3469_v41, 0.0  ;;  %v3432_v61 = vmul.f32 %v7869_v36, %v3393_v55  ;;  %vm8880_vm1 = vmmov %vm8868_vm0 }
 0x364   : > { %v3472_v7 = vadd.f32 %v7875_v53, %v3433_v21 }
 0x365   : > { %6487 = vmatprep.mubr.msk.f32.mxu0 %vm3525_vm5, %v3501_v62  ;;  %v3471_v1 = vadd.f32 %v7875_v53, %v3432_v61  ;;  %v3292_v4 = vpop.permute.xlu0 %3291  ;;  %v3290_v6 = vpop.permute.xlu1 %3289  ;;  %v3396_v15 = vld [vmem:[%s6821_s18 + $0x78] sm:$0xff] }
 0x366   : > { %6488 = vmatmul.mubr.msk.f32.gmra.mrb[74].mxu0 %vm3525_vm5, %v3502_v54  ;;  %v3395_v11 = vld [vmem:[%s6821_s18 + $0x70] sm:$0xff]  ;;  %3368 = vst.msk [vmem:[%s6821_s18 + $0x98] sm:$0xff] %vm8879_vm6, %v3292_v4  ;;  %v3504_v28 = vmax.f32 %v3472_v7, 0.0  ;;  %v3435_v37 = vmul.f32 %v7869_v36, %v3396_v15  ;;  %vm8881_vm6 = vmmov %vm8868_vm0 }
 0x367   : > { %3367 = vst.msk [vmem:[%s6821_s18 + $0x90] sm:$0xff] %vm8868_vm0, %v3290_v6  ;;  %v3503_v18 = vmax.f32 %v3471_v1, 0.0  ;;  %v3434_v63 = vmul.f32 %v7869_v36, %v3395_v11 }
 0x368   : > { %v3474_v46 = vadd.f32 %v7875_v53, %v3435_v37 }
 0x369   : > { %6490 = vmatprep.mubr.msk.f32.mxu0 %vm3525_vm5, %v3503_v18  ;;  %v3473_v32 = vadd.f32 %v7875_v53, %v3434_v63  ;;  %v3296_v17 = vpop.permute.xlu0 %3295  ;;  %v3294_v33 = vpop.permute.xlu1 %3293  ;;  %v3398_v2 = vld [vmem:[%s6821_s18 + $0x88] sm:$0xff] }
 0x36a   : > { %6491 = vmatmul.mubr.msk.f32.gmra.mrb[76].mxu0 %vm3525_vm5, %v3504_v28  ;;  %v3397_v29 = vld [vmem:[%s6821_s18 + $0x80] sm:$0xff]  ;;  %3370 = vst.msk [vmem:[%s6821_s18 + $0xa8] sm:$0xff] %vm8880_vm1, %v3296_v17  ;;  %v3506_v31 = vmax.f32 %v3474_v46, 0.0  ;;  %v3437_v41 = vmul.f32 %v7869_v36, %v3398_v2  ;;  %vm8882_vm1 = vmmov %vm8868_vm0 }
 0x36b   : > { %3369 = vst.msk [vmem:[%s6821_s18 + $0xa0] sm:$0xff] %vm8881_vm6, %v3294_v33  ;;  %v3505_v19 = vmax.f32 %v3473_v32, 0.0  ;;  %v3436_v42 = vmul.f32 %v7869_v36, %v3397_v29  ;;  %vm8883_vm6 = vmmov %vm8868_vm0 }
 0x36c   : > { %v3476_v40 = vadd.f32 %v7875_v53, %v3437_v41 }
 0x36d   : > { %6493 = vmatprep.mubr.msk.f32.mxu0 %vm3525_vm5, %v3505_v19  ;;  %v3475_v9 = vadd.f32 %v7875_v53, %v3436_v42  ;;  %v3300_v35 = vpop.permute.xlu0 %3299  ;;  %v3298_v55 = vpop.permute.xlu1 %3297  ;;  %v3400_v62 = vld [vmem:[%s6821_s18 + $0x98] sm:$0xff] }
 0x36e   : > { %6494 = vmatmul.mubr.msk.f32.gmra.mrb[78].mxu0 %vm3525_vm5, %v3506_v31  ;;  %v3399_v52 = vld [vmem:[%s6821_s18 + $0x90] sm:$0xff]  ;;  %3372 = vst.msk [vmem:[%s6821_s18 + $0xb8] sm:$0xff] %vm8868_vm0, %v3300_v35  ;;  %v3508_v61 = vmax.f32 %v3476_v40, 0.0  ;;  %v3439_v1 = vmul.f32 %v7869_v36, %v3400_v62 }
 0x36f   : > { %3371 = vst.msk [vmem:[%s6821_s18 + $0xb0] sm:$0xff] %vm8882_vm1, %v3298_v55  ;;  %v3507_v54 = vmax.f32 %v3475_v9, 0.0  ;;  %v3438_v21 = vmul.f32 %v7869_v36, %v3399_v52  ;;  %vm8884_vm1 = vmmov %vm8868_vm0 }
 0x370   : > { %v3478_v4 = vadd.f32 %v7875_v53, %v3439_v1 }
 0x371   : > { %6496 = vmatprep.mubr.msk.f32.mxu0 %vm3525_vm5, %v3507_v54  ;;  %v3477_v7 = vadd.f32 %v7875_v53, %v3438_v21  ;;  %v3304_v6 = vpop.permute.xlu0 %3303  ;;  %v3302_v11 = vpop.permute.xlu1 %3301  ;;  %v3402_v18 = vld [vmem:[%s6821_s18 + $0xa8] sm:$0xff] }
 0x372   : > { %6497 = vmatmul.mubr.msk.f32.gmra.mrb[80].mxu0 %vm3525_vm5, %v3508_v61  ;;  %v3401_v15 = vld [vmem:[%s6821_s18 + $0xa0] sm:$0xff]  ;;  %3374 = vst.msk [vmem:[%s6821_s18 + $0xc8] sm:$0xff] %vm8883_vm6, %v3304_v6  ;;  %v3510_v63 = vmax.f32 %v3478_v4, 0.0  ;;  %v3441_v32 = vmul.f32 %v7869_v36, %v3402_v18  ;;  %vm8885_vm6 = vmmov %vm8868_vm0 }
 0x373   : > { %3373 = vst.msk [vmem:[%s6821_s18 + $0xc0] sm:$0xff] %vm8868_vm0, %v3302_v11  ;;  %v3509_v28 = vmax.f32 %v3477_v7, 0.0  ;;  %v3440_v37 = vmul.f32 %v7869_v36, %v3401_v15 }
 0x374   : > { %v3480_v17 = vadd.f32 %v7875_v53, %v3441_v32 }
 0x375   : > { %6499 = vmatprep.mubr.msk.f32.mxu0 %vm3525_vm5, %v3509_v28  ;;  %v3479_v46 = vadd.f32 %v7875_v53, %v3440_v37  ;;  %v3308_v33 = vpop.permute.xlu0 %3307  ;;  %v3306_v29 = vpop.permute.xlu1 %3305  ;;  %v3404_v19 = vld [vmem:[%s6821_s18 + $0xb8] sm:$0xff] }
 0x376   : > { %6500 = vmatmul.mubr.msk.f32.gmra.mrb[82].mxu0 %vm3525_vm5, %v3510_v63  ;;  %v3403_v2 = vld [vmem:[%s6821_s18 + $0xb0] sm:$0xff]  ;;  %3376 = vst.msk [vmem:[%s6821_s18 + $0xd8] sm:$0xff] %vm8884_vm1, %v3308_v33  ;;  %v3512_v42 = vmax.f32 %v3480_v17, 0.0  ;;  %v3443_v9 = vmul.f32 %v7869_v36, %v3404_v19  ;;  %vm8886_vm1 = vmmov %vm8868_vm0 }
 0x377   : > { %3375 = vst.msk [vmem:[%s6821_s18 + $0xd0] sm:$0xff] %vm8885_vm6, %v3306_v29  ;;  %v3511_v31 = vmax.f32 %v3479_v46, 0.0  ;;  %v3442_v41 = vmul.f32 %v7869_v36, %v3403_v2  ;;  %vm8887_vm6 = vmmov %vm8868_vm0 }
 0x378   : > { %v3482_v35 = vadd.f32 %v7875_v53, %v3443_v9 }
 0x379   : > { %6502 = vmatprep.mubr.msk.f32.mxu0 %vm3525_vm5, %v3511_v31  ;;  %v3481_v40 = vadd.f32 %v7875_v53, %v3442_v41  ;;  %v3312_v55 = vpop.permute.xlu0 %3311  ;;  %v3310_v52 = vpop.permute.xlu1 %3309  ;;  %v3406_v54 = vld [vmem:[%s6821_s18 + $0xc8] sm:$0xff] }
 0x37a   : > { %6503 = vmatmul.mubr.msk.f32.gmra.mrb[84].mxu0 %vm3525_vm5, %v3512_v42  ;;  %v3405_v62 = vld [vmem:[%s6821_s18 + $0xc0] sm:$0xff]  ;;  %3378 = vst.msk [vmem:[%s6821_s18 + $0xe8] sm:$0xff] %vm8868_vm0, %v3312_v55  ;;  %v3514_v21 = vmax.f32 %v3482_v35, 0.0  ;;  %v3445_v7 = vmul.f32 %v7869_v36, %v3406_v54 }
 0x37b   : > { %3377 = vst.msk [vmem:[%s6821_s18 + $0xe0] sm:$0xff] %vm8886_vm1, %v3310_v52  ;;  %v3513_v61 = vmax.f32 %v3481_v40, 0.0  ;;  %v3444_v1 = vmul.f32 %v7869_v36, %v3405_v62 }
 0x37c   : > { %v3484_v6 = vadd.f32 %v7875_v53, %v3445_v7 }
 0x37d   : > { %6505 = vmatprep.mubr.msk.f32.mxu0 %vm3525_vm5, %v3513_v61  ;;  %v3483_v4 = vadd.f32 %v7875_v53, %v3444_v1  ;;  %v3316_v11 = vpop.permute.xlu0 %3315  ;;  %v3314_v15 = vpop.permute.xlu1 %3313  ;;  %v3408_v28 = vld [vmem:[%s6821_s18 + $0xd8] sm:$0xff] }
 0x37e   : > { %6506 = vmatmul.mubr.msk.f32.gmra.mrb[86].mxu0 %vm3525_vm5, %v3514_v21  ;;  %v3407_v18 = vld [vmem:[%s6821_s18 + $0xd0] sm:$0xff]  ;;  %3380 = vst.msk [vmem:[%s6821_s18 + $0xf8] sm:$0xff] %vm8887_vm6, %v3316_v11  ;;  %v3516_v37 = vmax.f32 %v3484_v6, 0.0  ;;  %v3447_v46 = vmul.f32 %v7869_v36, %v3408_v28  ;;  %v8063_v6 = vld [vmem:[%s8770_s10] ss:$0 sm:$0xff] }
 0x37f   : > { %3379 = vst.msk [vmem:[%s6821_s18 + $0xf0] sm:$0xff] %vm8868_vm0, %v3314_v15  ;;  %v3515_v63 = vmax.f32 %v3483_v4, 0.0  ;;  %v3446_v32 = vmul.f32 %v7869_v36, %v3407_v18  ;;  %v8068_v11 = vld [vmem:[%s8771_s11] ss:$0 sm:$0xff]  ;;  %v4310_v15 = vld [vmem:[%s8772_s12 + $0x8] sm:$0xff] }
 0x380   : > { %v3486_v33 = vadd.f32 %v7875_v53, %v3447_v46  ;;  %v5906_v46 = vld [vmem:[%s8772_s12 + $0x20] sm:$0xff] }
 0x381   : > { %6508 = vmatprep.mubr.msk.f32.mxu0 %vm3525_vm5, %v3515_v63  ;;  %v3485_v17 = vadd.f32 %v7875_v53, %v3446_v32  ;;  %v3410_v2 = vld [vmem:[%s6821_s18 + $0xe8] sm:$0xff]  ;;  %v5905_v32 = vld [vmem:[%s8772_s12 + $0x18] sm:$0xff] }
 0x382   : > { %6509 = vmatmul.mubr.msk.f32.gmra.mrb[88].mxu0 %vm3525_vm5, %v3516_v37  ;;  %v3409_v29 = vld [vmem:[%s6821_s18 + $0xe0] sm:$0xff]  ;;  %v3518_v31 = vmax.f32 %v3486_v33, 0.0  ;;  %v3449_v41 = vmul.f32 %v7869_v36, %v3410_v2  ;;  %v6702_v33 = vpack.c.bf16 %v5906_v46, %v5905_v32 }
 0x383   : > { %v3517_v19 = vmax.f32 %v3485_v17, 0.0  ;;  %v3448_v42 = vmul.f32 %v7869_v36, %v3409_v29 }
 0x384   : > { %v3488_v40 = vadd.f32 %v7875_v53, %v3449_v41  ;;  %6703 = vmatprep.subr.bf16.mxu0 %v6702_v33 }
 0x385   : > { %6511 = vmatprep.mubr.msk.f32.mxu0 %vm3525_vm5, %v3517_v19  ;;  %v3487_v9 = vadd.f32 %v7875_v53, %v3448_v42  ;;  %v3412_v55 = vld [vmem:[%s6821_s18 + $0xf8] sm:$0xff]  ;;  %6705 = vmatpush3.bf16.msra.mxu0 %v6702_v33 }
 0x386   : > { %6512 = vmatmul.mubr.msk.f32.gmra.mrb[90].mxu0 %vm3525_vm5, %v3518_v31  ;;  %v3411_v35 = vld [vmem:[%s6821_s18 + $0xf0] sm:$0xff]  ;;  %v3520_v62 = vmax.f32 %v3488_v40, 0.0  ;;  %v3451_v61 = vmul.f32 %v7869_v36, %v3412_v55 }
 0x387   : > { %v3519_v52 = vmax.f32 %v3487_v9, 0.0  ;;  %v3450_v54 = vmul.f32 %v7869_v36, %v3411_v35 }
 0x388   : > { %v3490_v1 = vadd.f32 %v7875_v53, %v3451_v61 }
 0x389   : > { %6514 = vmatprep.mubr.msk.f32.mxu0 %vm3525_vm5, %v3519_v52  ;;  %v3489_v21 = vadd.f32 %v7875_v53, %v3450_v54  ;;  %v4309_v53 = vld [vmem:[%s8772_s12] sm:$0xff]  ;;  %v4311_v52 = vld [vmem:[%s8772_s12 + $0x10] sm:$0xff] }
 0x38a   : > { %6515 = vmatmul.mubr.msk.f32.gmra.mrb[92].mxu0 %vm3525_vm5, %v3520_v62  ;;  %v3522_v4 = vmax.f32 %v3490_v1, 0.0  ;;  %v6698_v63 = vpack.c.bf16 %v4310_v15, %v4309_v53  ;;  %v5907_v62 = vld [vmem:[%s8772_s12 + $0x28] sm:$0xff] }
 0x38b   : > { %v3521_v7 = vmax.f32 %v3489_v21, 0.0  ;;  %6578 = vmatprep.subr.mxu0 %v5907_v62 }
 0x38c   : > { %6699 = vmatprep.subr.bf16.mxu1 %v6698_v63  ;;  %6579 = vmatpush3.msra.mxu0 %v5907_v62 }
 0x38d   : > { %6517 = vmatprep.mubr.msk.f32.mxu0 %vm3525_vm5, %v3521_v7  ;;  %6701 = vmatpush3.bf16.msra.mxu1 %v6698_v63 }
 0x38e   : > { %6518 = vmatmul.mubr.msk.f32.gmra.mrb[94].mxu0 %vm3525_vm5, %v3522_v4  ;;  %vm8888_vm5 = vcmask 64512   ;;  %6524 = vmatprep.subr.mxu1 %v4311_v52 }
 0x38f   : > { %vm8889_vm1 = vmmov %vm8888_vm5 }
 0x390   : > { %vm8890_vm6 = vmmov %vm8889_vm1 }
 0x391   : > { %6525 = vmatpush3.msra.mxu1 %v4311_v52  ;;  %vm8891_vm0 = vmmov %vm8889_vm1 }
 0x425   : > { %v6474_v36 = vpop.f32.mrb[64].mxu0 }
 0x426   : > { %v3855_v18 = vmul.f32 %v6474_v36, %v8063_v6  ;;  %v3688_v28 = vpop.f32.mrb[65].mxu0 }
 0x427   : > { %v3854_v37 = vmul.f32 %v8063_v6, %v3688_v28 }
 0x428   : > { %v3894_v17 = vadd.f32 %v8068_v11, %v3855_v18 }
 0x429   : > { %v3893_v29 = vadd.f32 %v8068_v11, %v3854_v37  ;;  %v6477_v2 = vpop.f32.mrb[66].mxu0 }
 0x42a   : > { %v3926_v19 = vmax.f32 %v3894_v17, 0.0  ;;  %v3857_v31 = vmul.f32 %v6477_v2, %v8063_v6  ;;  %v3698_v42 = vpop.f32.mrb[67].mxu0 }
 0x42b   : > { %v8087_v41 = vmax.f32 %v3893_v29, 0.0  ;;  %v3856_v9 = vmul.f32 %v8063_v6, %v3698_v42 }
 0x42c   : > { %3958 = vst.msk [vmem:[#allocation2 + $0x30] sm:$0xff] %vm8888_vm5, %v3926_v19  ;;  %v3896_v40 = vadd.f32 %v8068_v11, %v3857_v31  ;;  %4023 = vrot.lane.b32.xlu0 %v3926_v19, %s6731_s21  ;;  %4151 = vrot.lane.b32.xlu1 %v3926_v19, %s6730_s20  ;;  %vm8892_vm5 = vmmov %vm8891_vm0 }
 0x42d   : > { %3957 = vst.msk [vmem:[#allocation2 + $0x28] sm:$0xff] %vm8889_vm1, %v8087_v41  ;;  %v3895_v35 = vadd.f32 %v8068_v11, %v3856_v9  ;;  %v6480_v55 = vpop.f32.mrb[68].mxu0  ;;  %vm8893_vm1 = vmmov %vm8891_vm0 }
 0x42e   : > { %v3928_v54 = vmax.f32 %v3896_v40, 0.0  ;;  %v3859_v61 = vmul.f32 %v6480_v55, %v8063_v6  ;;  %v3708_v21 = vpop.f32.mrb[69].mxu0 }
 0x42f   : > { %v3927_v1 = vmax.f32 %v3895_v35, 0.0  ;;  %v3858_v7 = vmul.f32 %v8063_v6, %v3708_v21 }
 0x430   : > { %3960 = vst.msk [vmem:[#allocation2 + $0x40] sm:$0xff] %vm8890_vm6, %v3928_v54  ;;  %v3898_v4 = vadd.f32 %v8068_v11, %v3859_v61  ;;  %4021 = vrot.lane.b32.xlu1 %v8087_v41, %s6731_s21  ;;  %vm8894_vm6 = vmmov %vm8891_vm0 }
 0x431   : > { %3959 = vst.msk [vmem:[#allocation2 + $0x38] sm:$0xff] %vm8891_vm0, %v3927_v1  ;;  %v3897_v36 = vadd.f32 %v8068_v11, %v3858_v7  ;;  %v6483_v53 = vpop.f32.mrb[70].mxu0  ;;  %4153 = vrot.lane.b32.xlu0 %v3927_v1, %s6730_s20 }
 0x432   : > { %v3930_v15 = vmax.f32 %v3898_v4, 0.0  ;;  %v3861_v18 = vmul.f32 %v6483_v53, %v8063_v6  ;;  %v3718_v28 = vpop.f32.mrb[71].mxu0 }
 0x433   : > { %v3929_v63 = vmax.f32 %v3897_v36, 0.0  ;;  %v3860_v37 = vmul.f32 %v8063_v6, %v3718_v28 }
 0x434   : > { %3962 = vst.msk [vmem:[#allocation2 + $0x50] sm:$0xff] %vm8892_vm5, %v3930_v15  ;;  %v3900_v32 = vadd.f32 %v8068_v11, %v3861_v18  ;;  %4155 = vrot.lane.b32.xlu1 %v3928_v54, %s6730_s20  ;;  %vm8895_vm5 = vmmov %vm8891_vm0 }
 0x435   : > { %3961 = vst.msk [vmem:[#allocation2 + $0x48] sm:$0xff] %vm8893_vm1, %v3929_v63  ;;  %v3899_v46 = vadd.f32 %v8068_v11, %v3860_v37  ;;  %v6486_v17 = vpop.f32.mrb[72].mxu0  ;;  %4025 = vrot.lane.b32.xlu0 %v3927_v1, %s6731_s21  ;;  %vm8896_vm1 = vmmov %vm8891_vm0 }
 0x436   : > { %v3932_v33 = vmax.f32 %v3900_v32, 0.0  ;;  %v3863_v29 = vmul.f32 %v6486_v17, %v8063_v6  ;;  %v3728_v2 = vpop.f32.mrb[73].mxu0 }
 0x437   : > { %v3931_v19 = vmax.f32 %v3899_v46, 0.0  ;;  %v3862_v31 = vmul.f32 %v8063_v6, %v3728_v2 }
 0x438   : > { %3964 = vst.msk [vmem:[#allocation2 + $0x60] sm:$0xff] %vm8894_vm6, %v3932_v33  ;;  %v3902_v42 = vadd.f32 %v8068_v11, %v3863_v29  ;;  %4027 = vrot.lane.b32.xlu1 %v3928_v54, %s6731_s21  ;;  %vm8897_vm6 = vmmov %vm8891_vm0 }
 0x439   : > { %3963 = vst.msk [vmem:[#allocation2 + $0x58] sm:$0xff] %vm8891_vm0, %v3931_v19  ;;  %v3901_v9 = vadd.f32 %v8068_v11, %v3862_v31  ;;  %v6489_v40 = vpop.f32.mrb[74].mxu0  ;;  %4157 = vrot.lane.b32.xlu0 %v3929_v63, %s6730_s20 }
 0x43a   : > { %v8128_v35 = vmax.f32 %v3902_v42, 0.0  ;;  %v3865_v55 = vmul.f32 %v6489_v40, %v8063_v6  ;;  %v3738_v52 = vpop.f32.mrb[75].mxu0 }
 0x43b   : > { %v3933_v62 = vmax.f32 %v3901_v9, 0.0  ;;  %v3864_v61 = vmul.f32 %v8063_v6, %v3738_v52 }
 0x43c   : > { %3966 = vst.msk [vmem:[#allocation2 + $0x70] sm:$0xff] %vm8895_vm5, %v8128_v35  ;;  %v3904_v54 = vadd.f32 %v8068_v11, %v3865_v55  ;;  %4159 = vrot.lane.b32.xlu1 %v3930_v15, %s6730_s20  ;;  %vm8898_vm5 = vmmov %vm8891_vm0 }
 0x43d   : > { %3965 = vst.msk [vmem:[#allocation2 + $0x68] sm:$0xff] %vm8896_vm1, %v3933_v62  ;;  %v3903_v21 = vadd.f32 %v8068_v11, %v3864_v61  ;;  %v6492_v1 = vpop.f32.mrb[76].mxu0  ;;  %4029 = vrot.lane.b32.xlu0 %v3929_v63, %s6731_s21  ;;  %vm8899_vm1 = vmmov %vm8891_vm0 }
 0x43e   : > { %v8139_v7 = vmax.f32 %v3904_v54, 0.0  ;;  %v3867_v4 = vmul.f32 %v6492_v1, %v8063_v6  ;;  %v3748_v36 = vpop.f32.mrb[77].mxu0 }
 0x43f   : > { %v8142_v53 = vmax.f32 %v3903_v21, 0.0  ;;  %v3866_v18 = vmul.f32 %v8063_v6, %v3748_v36 }
 0x440   : > { %3968 = vst.msk [vmem:[#allocation2 + $0x80] sm:$0xff] %vm8897_vm6, %v8139_v7  ;;  %v3906_v28 = vadd.f32 %v8068_v11, %v3867_v4  ;;  %4031 = vrot.lane.b32.xlu1 %v3930_v15, %s6731_s21  ;;  %vm8900_vm6 = vmmov %vm8891_vm0 }
 0x441   : > { %3967 = vst.msk [vmem:[#allocation2 + $0x78] sm:$0xff] %vm8891_vm0, %v8142_v53  ;;  %v3905_v63 = vadd.f32 %v8068_v11, %v3866_v18  ;;  %v6495_v37 = vpop.f32.mrb[78].mxu0  ;;  %4161 = vrot.lane.b32.xlu0 %v3931_v19, %s6730_s20 }
 0x442   : > { %v8153_v32 = vmax.f32 %v3906_v28, 0.0  ;;  %v3869_v46 = vmul.f32 %v6495_v37, %v8063_v6  ;;  %v3758_v17 = vpop.f32.mrb[79].mxu0 }
 0x443   : > { %v8156_v29 = vmax.f32 %v3905_v63, 0.0  ;;  %v3868_v2 = vmul.f32 %v8063_v6, %v3758_v17 }
 0x444   : > { %3970 = vst.msk [vmem:[#allocation2 + $0x90] sm:$0xff] %vm8898_vm5, %v8153_v32  ;;  %v3908_v15 = vadd.f32 %v8068_v11, %v3869_v46  ;;  %4163 = vrot.lane.b32.xlu1 %v3932_v33, %s6730_s20  ;;  %vm8901_vm5 = vmmov %vm8891_vm0 }
 0x445   : > { %3969 = vst.msk [vmem:[#allocation2 + $0x88] sm:$0xff] %vm8899_vm1, %v8156_v29  ;;  %v3907_v31 = vadd.f32 %v8068_v11, %v3868_v2  ;;  %v6498_v42 = vpop.f32.mrb[80].mxu0  ;;  %4033 = vrot.lane.b32.xlu0 %v3931_v19, %s6731_s21  ;;  %vm8902_vm1 = vmmov %vm8891_vm0 }
 0x446   : > { %v8167_v9 = vmax.f32 %v3908_v15, 0.0  ;;  %v3871_v40 = vmul.f32 %v6498_v42, %v8063_v6  ;;  %v3768_v55 = vpop.f32.mrb[81].mxu0 }
 0x447   : > { %v8170_v52 = vmax.f32 %v3907_v31, 0.0  ;;  %v3870_v61 = vmul.f32 %v8063_v6, %v3768_v55 }
 0x448   : > { %3972 = vst.msk [vmem:[#allocation2 + $0xa0] sm:$0xff] %vm8900_vm6, %v8167_v9  ;;  %v3910_v54 = vadd.f32 %v8068_v11, %v3871_v40  ;;  %4035 = vrot.lane.b32.xlu1 %v3932_v33, %s6731_s21  ;;  %vm8903_vm6 = vmmov %vm8891_vm0 }
 0x449   : > { %3971 = vst.msk [vmem:[#allocation2 + $0x98] sm:$0xff] %vm8891_vm0, %v8170_v52  ;;  %v3909_v19 = vadd.f32 %v8068_v11, %v3870_v61  ;;  %v6501_v21 = vpop.f32.mrb[82].mxu0  ;;  %4165 = vrot.lane.b32.xlu0 %v3933_v62, %s6730_s20 }
 0x44a   : > { %v8181_v1 = vmax.f32 %v3910_v54, 0.0  ;;  %v3873_v4 = vmul.f32 %v6501_v21, %v8063_v6  ;;  %v3778_v36 = vpop.f32.mrb[83].mxu0 }
 0x44b   : > { %v8184_v18 = vmax.f32 %v3909_v19, 0.0  ;;  %v3872_v28 = vmul.f32 %v8063_v6, %v3778_v36 }
 0x44c   : > { %3974 = vst.msk [vmem:[#allocation2 + $0xb0] sm:$0xff] %vm8901_vm5, %v8181_v1  ;;  %v3912_v33 = vadd.f32 %v8068_v11, %v3873_v4  ;;  %4167 = vrot.lane.b32.xlu1 %v8128_v35, %s6730_s20  ;;  %vm8904_vm5 = vmmov %vm8891_vm0 }
 0x44d   : > { %3973 = vst.msk [vmem:[#allocation2 + $0xa8] sm:$0xff] %vm8902_vm1, %v8184_v18  ;;  %v3911_v63 = vadd.f32 %v8068_v11, %v3872_v28  ;;  %v6504_v37 = vpop.f32.mrb[84].mxu0  ;;  %4037 = vrot.lane.b32.xlu0 %v3933_v62, %s6731_s21  ;;  %vm8905_vm1 = vmmov %vm8891_vm0 }
 0x44e   : > { %v8196_v46 = vmax.f32 %v3912_v33, 0.0  ;;  %v3875_v17 = vmul.f32 %v6504_v37, %v8063_v6  ;;  %v3788_v2 = vpop.f32.mrb[85].mxu0 }
 0x44f   : > { %v8199_v15 = vmax.f32 %v3911_v63, 0.0  ;;  %v3874_v31 = vmul.f32 %v8063_v6, %v3788_v2 }
 0x450   : > { %3976 = vst.msk [vmem:[#allocation2 + $0xc0] sm:$0xff] %vm8903_vm6, %v8196_v46  ;;  %v3914_v42 = vadd.f32 %v8068_v11, %v3875_v17  ;;  %4039 = vrot.lane.b32.xlu1 %v8128_v35, %s6731_s21  ;;  %vm8906_vm6 = vmmov %vm8891_vm0 }
 0x451   : > { %3975 = vst.msk [vmem:[#allocation2 + $0xb8] sm:$0xff] %vm8891_vm0, %v8199_v15  ;;  %v3913_v62 = vadd.f32 %v8068_v11, %v3874_v31  ;;  %v6507_v40 = vpop.f32.mrb[86].mxu0  ;;  %4169 = vrot.lane.b32.xlu0 %v8142_v53, %s6730_s20 }
 0x452   : > { %v8212_v55 = vmax.f32 %v3914_v42, 0.0  ;;  %v3877_v61 = vmul.f32 %v6507_v40, %v8063_v6  ;;  %v3798_v54 = vpop.f32.mrb[87].mxu0 }
 0x453   : > { %v8215_v19 = vmax.f32 %v3913_v62, 0.0  ;;  %v3876_v21 = vmul.f32 %v8063_v6, %v3798_v54 }
 0x454   : > { %3978 = vst.msk [vmem:[#allocation2 + $0xd0] sm:$0xff] %vm8904_vm5, %v8212_v55  ;;  %v3916_v35 = vadd.f32 %v8068_v11, %v3877_v61  ;;  %4171 = vrot.lane.b32.xlu1 %v8139_v7, %s6730_s20  ;;  %vm8907_vm5 = vmmov %vm8891_vm0 }
 0x455   : > { %3977 = vst.msk [vmem:[#allocation2 + $0xc8] sm:$0xff] %vm8905_vm1, %v8215_v19  ;;  %v3915_v4 = vadd.f32 %v8068_v11, %v3876_v21  ;;  %v6510_v36 = vpop.f32.mrb[88].mxu0  ;;  %4041 = vrot.lane.b32.xlu0 %v8142_v53, %s6731_s21  ;;  %vm8908_vm1 = vmmov %vm8891_vm0 }
 0x456   : > { %v8228_v28 = vmax.f32 %v3916_v35, 0.0  ;;  %v3879_v33 = vmul.f32 %v6510_v36, %v8063_v6  ;;  %v3808_v63 = vpop.f32.mrb[89].mxu0 }
 0x457   : > { %v8231_v37 = vmax.f32 %v3915_v4, 0.0  ;;  %v3878_v17 = vmul.f32 %v8063_v6, %v3808_v63 }
 0x458   : > { %3980 = vst.msk [vmem:[#allocation2 + $0xe0] sm:$0xff] %vm8906_vm6, %v8228_v28  ;;  %v3918_v2 = vadd.f32 %v8068_v11, %v3879_v33  ;;  %4043 = vrot.lane.b32.xlu1 %v8139_v7, %s6731_s21  ;;  %vm8909_vm6 = vmmov %vm8891_vm0 }
 0x459   : > { %3979 = vst.msk [vmem:[#allocation2 + $0xd8] sm:$0xff] %vm8891_vm0, %v8231_v37  ;;  %v3917_v53 = vadd.f32 %v8068_v11, %v3878_v17  ;;  %v6513_v31 = vpop.f32.mrb[90].mxu0  ;;  %4173 = vrot.lane.b32.xlu0 %v8156_v29, %s6730_s20 }
 0x45a   : > { %v3950_v42 = vmax.f32 %v3918_v2, 0.0  ;;  %v3881_v62 = vmul.f32 %v6513_v31, %v8063_v6  ;;  %v3818_v40 = vpop.f32.mrb[91].mxu0 }
 0x45b   : > { %v3949_v61 = vmax.f32 %v3917_v53, 0.0  ;;  %v3880_v54 = vmul.f32 %v8063_v6, %v3818_v40 }
 0x45c   : > { %3982 = vst.msk [vmem:[#allocation2 + $0xf0] sm:$0xff] %vm8907_vm5, %v3950_v42  ;;  %v3920_v7 = vadd.f32 %v8068_v11, %v3881_v62  ;;  %4175 = vrot.lane.b32.xlu1 %v8153_v32, %s6730_s20  ;;  %vm8910_vm5 = vmmov %vm8891_vm0 }
 0x45d   : > { %3981 = vst.msk [vmem:[#allocation2 + $0xe8] sm:$0xff] %vm8908_vm1, %v3949_v61  ;;  %v3919_v21 = vadd.f32 %v8068_v11, %v3880_v54  ;;  %v6516_v35 = vpop.f32.mrb[92].mxu0  ;;  %4045 = vrot.lane.b32.xlu0 %v8156_v29, %s6731_s21  ;;  %vm8911_vm1 = vmmov %vm8891_vm0 }
 0x45e   : > { %v3952_v4 = vmax.f32 %v3920_v7, 0.0  ;;  %v3883_v36 = vmul.f32 %v6516_v35, %v8063_v6  ;;  %v3828_v33 = vpop.f32.mrb[93].mxu0  ;;  %v5941_v35 = vld [vmem:[%s8772_s12 + $0x38] sm:$0xff] }
 0x45f   : > { %v3951_v63 = vmax.f32 %v3919_v21, 0.0  ;;  %v3882_v17 = vmul.f32 %v8063_v6, %v3828_v33 }
 0x460   : > { %3984 = vst.msk [vmem:[#allocation2 + $0x100] sm:$0xff] %vm8909_vm6, %v3952_v4  ;;  %v3922_v2 = vadd.f32 %v8068_v11, %v3883_v36  ;;  %4047 = vrot.lane.b32.xlu1 %v8153_v32, %s6731_s21  ;;  %v5940_v32 = vld [vmem:[%s8772_s12 + $0x30] sm:$0xff]  ;;  %vm8912_vm6 = vmmov %vm8891_vm0 }
 0x461   : > { %3983 = vst.msk [vmem:[#allocation2 + $0xf8] sm:$0xff] %vm8891_vm0, %v3951_v63  ;;  %v3921_v53 = vadd.f32 %v8068_v11, %v3882_v17  ;;  %4177 = vrot.lane.b32.xlu0 %v8170_v52, %s6730_s20  ;;  %v6519_v29 = vpop.f32.mrb[94].mxu0  ;;  %vm8913_vm0 = vcmask 130112  }
 0x462   : > { %v3954_v31 = vmax.f32 %v3922_v2, 0.0  ;;  %v3885_v62 = vmul.f32 %v6519_v29, %v8063_v6  ;;  %v3838_v40 = vpop.f32.mrb[95].mxu0 }
 0x463   : > { %v3953_v54 = vmax.f32 %v3921_v53, 0.0  ;;  %v3884_v7 = vmul.f32 %v8063_v6, %v3838_v40  ;;  %v8280_v6 = vpack.c.bf16 %v5941_v35, %v5940_v32 }
 0x464   : > { %3986 = vst.msk [vmem:[#allocation2 + $0x110] sm:$0xff] %vm8910_vm5, %v3954_v31  ;;  %v3924_v21 = vadd.f32 %v8068_v11, %v3885_v62  ;;  %4179 = vrot.lane.b32.xlu1 %v8167_v9, %s6730_s20  ;;  %vm8914_vm5 = vcmask 195712  }
 0x465   : > { %3985 = vst.msk [vmem:[#allocation2 + $0x108] sm:$0xff] %vm8911_vm1, %v3953_v54  ;;  %v3923_v36 = vadd.f32 %v8068_v11, %v3884_v7  ;;  %4049 = vrot.lane.b32.xlu0 %v8170_v52, %s6731_s21  ;;  %6707 = vmatprep.subr.bf16.mxu1 %v8280_v6  ;;  %vm8915_vm1 = vmmov %vm8913_vm0 }
 0x466   : > { %v3956_v33 = vmax.f32 %v3924_v21, 0.0  ;;  %vm8917_vm4 = vmmov %vm8914_vm5 }
 0x467   : > { %v3955_v17 = vmax.f32 %v3923_v36, 0.0 }
 0x468   : > { %4051 = vrot.lane.b32.xlu1 %v8167_v9, %s6731_s21 }
 0x469   : > { %3987 = vst.msk [vmem:[#allocation2 + $0x118] sm:$0xff] %vm8912_vm6, %v3955_v17  ;;  %4181 = vrot.lane.b32.xlu0 %v8184_v18, %s6730_s20  ;;  %vm8916_vm6 = vmmov %vm8914_vm5 }
 0x46c   : > { %4183 = vrot.lane.b32.xlu1 %v8181_v1, %s6730_s20 }
 0x46d   : > { %4053 = vrot.lane.b32.xlu0 %v8184_v18, %s6731_s21 }
 0x470   : > { %4055 = vrot.lane.b32.xlu1 %v8181_v1, %s6731_s21 }
 0x471   : > { %4185 = vrot.lane.b32.xlu0 %v8199_v15, %s6730_s20 }
 0x474   : > { %4187 = vrot.lane.b32.xlu1 %v8196_v46, %s6730_s20 }
 0x475   : > { %4057 = vrot.lane.b32.xlu0 %v8199_v15, %s6731_s21 }
 0x478   : > { %4059 = vrot.lane.b32.xlu1 %v8196_v46, %s6731_s21 }
 0x479   : > { %4189 = vrot.lane.b32.xlu0 %v8215_v19, %s6730_s20 }
 0x47c   : > { %4191 = vrot.lane.b32.xlu1 %v8212_v55, %s6730_s20 }
 0x47d   : > { %4061 = vrot.lane.b32.xlu0 %v8215_v19, %s6731_s21 }
 0x480   : > { %4063 = vrot.lane.b32.xlu1 %v8212_v55, %s6731_s21 }
 0x481   : > { %4193 = vrot.lane.b32.xlu0 %v8231_v37, %s6730_s20 }
 0x484   : > { %4195 = vrot.lane.b32.xlu1 %v8228_v28, %s6730_s20 }
 0x485   : > { %4065 = vrot.lane.b32.xlu0 %v8231_v37, %s6731_s21 }
 0x488   : > { %4067 = vrot.lane.b32.xlu1 %v8228_v28, %s6731_s21 }
 0x489   : > { %4197 = vrot.lane.b32.xlu0 %v3949_v61, %s6730_s20 }
 0x48c   : > { %4199 = vrot.lane.b32.xlu1 %v3950_v42, %s6730_s20 }
 0x48d   : > { %4069 = vrot.lane.b32.xlu0 %v3949_v61, %s6731_s21 }
 0x490   : > { %4071 = vrot.lane.b32.xlu1 %v3950_v42, %s6731_s21 }
 0x491   : > { %4201 = vrot.lane.b32.xlu0 %v3951_v63, %s6730_s20 }
 0x494   : > { %4203 = vrot.lane.b32.xlu1 %v3952_v4, %s6730_s20 }
 0x495   : > { %4073 = vrot.lane.b32.xlu0 %v3951_v63, %s6731_s21 }
 0x498   : > { %4075 = vrot.lane.b32.xlu1 %v3952_v4, %s6731_s21 }
 0x499   : > { %4205 = vrot.lane.b32.xlu0 %v3953_v54, %s6730_s20 }
 0x49c   : > { %4207 = vrot.lane.b32.xlu1 %v3954_v31, %s6730_s20 }
 0x49d   : > { %4077 = vrot.lane.b32.xlu0 %v3953_v54, %s6731_s21 }
 0x49e   : > { %v4024_v11 = vpop.permute.xlu0 %4023  ;;  %v4152_v9 = vpop.permute.xlu1 %4151 }
 0x49f   : > { %4118 = vst.msk [vmem:[#allocation2 + $0x20] sm:$0xff] %vm8913_vm0, %v4024_v11 }
 0x4a0   : > { %4246 = vst.msk [vmem:[#allocation2 + $0x10] sm:$0xff] %vm8914_vm5, %v4152_v9  ;;  %4079 = vrot.lane.b32.xlu1 %v3954_v31, %s6731_s21  ;;  %vm8918_vm5 = vmmov %vm8913_vm0 }
 0x4a1   : > { %4209 = vrot.lane.b32.xlu0 %v3955_v17, %s6730_s20 }
 0x4a2   : > { %v4022_v52 = vpop.permute.xlu1 %4021 }
 0x4a3   : > { %4117 = vst.msk [vmem:[#allocation2 + $0x18] sm:$0xff] %vm8915_vm1, %v4022_v52  ;;  %v4154_v1 = vpop.permute.xlu0 %4153  ;;  %vm8919_vm1 = vmmov %vm8917_vm4 }
 0x4a4   : > { %4247 = vst.msk [vmem:[#allocation2 + $0x18] sm:$0xff] %vm8916_vm6, %v4154_v1  ;;  %4211 = vrot.lane.b32.xlu1 %v3956_v33, %s6730_s20 }
 0x4a5   : > { %4081 = vrot.lane.b32.xlu0 %v3955_v17, %s6731_s21 }
 0x4a6   : > { %v4156_v18 = vpop.permute.xlu1 %4155 }
 0x4a7   : > { %4248 = vst.msk [vmem:[#allocation2 + $0x20] sm:$0xff] %vm8917_vm4, %v4156_v18  ;;  %v4026_v46 = vpop.permute.xlu0 %4025  ;;  %vm8920_vm4 = vcmask 195584  }
 0x4a8   : > { %4119 = vst.msk [vmem:[#allocation2 + $0x28] sm:$0xff] %vm8913_vm0, %v4026_v46  ;;  %4083 = vrot.lane.b32.xlu1 %v3956_v33, %s6731_s21  ;;  %vm8921_vm6 = vmmov %vm8920_vm4 }
 0x4a9   : > { %1766 = vrot.lane.b32.xlu0 %v7088_v56, %s6730_s20  ;;  %v5942_v56 = vld [vmem:[%s8772_s12 + $0x40] sm:$0xff]  ;;  %vm8922_vm0 = vmmov %vm8919_vm1 }
 0x4aa   : > { %v4028_v15 = vpop.permute.xlu1 %4027 }
 0x4ab   : > { %4120 = vst.msk [vmem:[#allocation2 + $0x30] sm:$0xff] %vm8918_vm5, %v4028_v15  ;;  %v4158_v55 = vpop.permute.xlu0 %4157  ;;  %v4277_v19 = vld [vmem:[#allocation2 + $0x17] sm:$0xff]  ;;  %vm8923_vm5 = vmmov %vm8920_vm4 }
 0x4ac   : > { %v4665_v28 = vld [vmem:[#allocation2 + $0x18] sm:$0xff]  ;;  %4249 = vst.msk [vmem:[#allocation2 + $0x28] sm:$0xff] %vm8919_vm1, %v4158_v55  ;;  %4149 = vrot.lane.b32.xlu1 %v8087_v41, %s6730_s20  ;;  %6526 = vmatprep.mubr.msk.f32.mxu1 %vm8920_vm4, %v4277_v19  ;;  %vm8924_vm1 = vmmov %vm8920_vm4 }
 0x4ad   : > { %6580 = vmatprep.mubr.msk.f32.mxu0 %vm8921_vm6, %v4665_v28  ;;  %vm8926_vm4 = vmmov %vm8925_vm3 }
 0x4ae   : > { %v4160_v37 = vpop.permute.xlu1 %4159  ;;  %v4278_v42 = vld [vmem:[#allocation2 + $0x1f] sm:$0xff]  ;;  %vm8927_vm6 = vmmov %vm8922_vm0 }
 0x4af   : > { %v4666_v61 = vld [vmem:[#allocation2 + $0x20] sm:$0xff]  ;;  %4250 = vst.msk [vmem:[#allocation2 + $0x30] sm:$0xff] %vm8922_vm0, %v4160_v37  ;;  %v4030_v4 = vpop.permute.xlu0 %4029  ;;  %6527 = vmatmul.mubr.msk.f32.vlgmr.msra.gmra.mrb[64].mxu1 %vm8923_vm5, %v4278_v42  ;;  %vm8928_vm2 = vmmov %vm8924_vm1 }
 0x4b0   : > { %6581 = vmatmul.mubr.msk.f32.vlgmr.msra.gmra.mrb[96].mxu0 %vm8924_vm1, %v4666_v61  ;;  %4121 = vst.msk [vmem:[#allocation2 + $0x38] sm:$0xff] %vm8925_vm3, %v4030_v4  ;;  %6709 = vmatpush3.bf16.msra.mxu1 %v8280_v6  ;;  %vm8929_vm0 = vmmov %vm8924_vm1 }
 0x4b1   : > { %6632 = vmatprep.subr.mxu1 %v5942_v56  ;;  %vm8930_vm3 = vmmov %vm8927_vm6 }
 0x4b2   : > { %v4032_v41 = vpop.permute.xlu1 %4031  ;;  %vm8931_vm5 = vmmov %vm8929_vm0 }
 0x4b3   : > { %4122 = vst.msk [vmem:[#allocation2 + $0x40] sm:$0xff] %vm8926_vm4, %v4032_v41  ;;  %v4162_v63 = vpop.permute.xlu0 %4161  ;;  %v4279_v2 = vld [vmem:[#allocation2 + $0x27] sm:$0xff]  ;;  %vm8932_vm1 = vmmov %vm8929_vm0 }
 0x4b4   : > { %v4667_v53 = vld [vmem:[#allocation2 + $0x28] sm:$0xff]  ;;  %4251 = vst.msk [vmem:[#allocation2 + $0x38] sm:$0xff] %vm8927_vm6, %v4162_v63  ;;  %6529 = vmatprep.mubr.msk.f32.mxu1 %vm8928_vm2, %v4279_v2  ;;  %6633 = vmatpush3.msra.mxu1 %v5942_v56  ;;  %vm8933_vm15 = vmmov %vm8926_vm4 }
 0x4b5   : > { %6583 = vmatprep.mubr.msk.f32.mxu0 %vm8929_vm0, %v4667_v53  ;;  %vm8934_vm2 = vmmov %vm8930_vm3 }
 0x4b6   : > { %v4164_v29 = vpop.permute.xlu1 %4163  ;;  %v4280_v31 = vld [vmem:[#allocation2 + $0x2f] sm:$0xff]  ;;  %vm8935_vm6 = vmmov %vm8929_vm0 }
 0x4b7   : > { %v4668_v62 = vld [vmem:[#allocation2 + $0x30] sm:$0xff]  ;;  %4252 = vst.msk [vmem:[#allocation2 + $0x40] sm:$0xff] %vm8930_vm3, %v4164_v29  ;;  %v4034_v40 = vpop.permute.xlu0 %4033  ;;  %6530 = vmatmul.mubr.msk.f32.gmra.mrb[66].mxu1 %vm8931_vm5, %v4280_v31  ;;  %vm8936_vm3 = vmmov %vm8934_vm2 }
 0x4b8   : > { %6584 = vmatmul.mubr.msk.f32.gmra.mrb[98].mxu0 %vm8932_vm1, %v4668_v62  ;;  %4123 = vst.msk [vmem:[#allocation2 + $0x48] sm:$0xff] %vm8926_vm4, %v4034_v40  ;;  %vm8937_vm5 = vmmov %vm8929_vm0 }
 0x4b9   : > { %vm8938_vm1 = vmmov %vm8929_vm0 }
 0x4ba   : > { %v4036_v54 = vpop.permute.xlu1 %4035 }
 0x4bb   : > { %4124 = vst.msk [vmem:[#allocation2 + $0x50] sm:$0xff] %vm8933_vm15, %v4036_v54  ;;  %v4166_v7 = vpop.permute.xlu0 %4165  ;;  %v4281_v21 = vld [vmem:[#allocation2 + $0x37] sm:$0xff]  ;;  %vm8939_vm15 = vmmov %vm8926_vm4 }
 0x4bc   : > { %v4669_v32 = vld [vmem:[#allocation2 + $0x38] sm:$0xff]  ;;  %4253 = vst.msk [vmem:[#allocation2 + $0x48] sm:$0xff] %vm8934_vm2, %v4166_v7  ;;  %6532 = vmatprep.mubr.msk.f32.mxu1 %vm8935_vm6, %v4281_v21  ;;  %vm8940_vm6 = vmmov %vm8929_vm0 }
 0x4bd   : > { %6586 = vmatprep.mubr.msk.f32.mxu0 %vm8929_vm0, %v4669_v32 }
 0x4be   : > { %v4168_v35 = vpop.permute.xlu1 %4167  ;;  %v4282_v36 = vld [vmem:[#allocation2 + $0x3f] sm:$0xff] }
 0x4bf   : > { %v4670_v6 = vld [vmem:[#allocation2 + $0x40] sm:$0xff]  ;;  %4254 = vst.msk [vmem:[#allocation2 + $0x50] sm:$0xff] %vm8936_vm3, %v4168_v35  ;;  %v4038_v33 = vpop.permute.xlu0 %4037  ;;  %6533 = vmatmul.mubr.msk.f32.gmra.mrb[68].mxu1 %vm8937_vm5, %v4282_v36  ;;  %vm8941_vm3 = vmmov %vm8934_vm2 }
 0x4c0   : > { %6587 = vmatmul.mubr.msk.f32.gmra.mrb[100].mxu0 %vm8938_vm1, %v4670_v6  ;;  %4125 = vst.msk [vmem:[#allocation2 + $0x58] sm:$0xff] %vm8939_vm15, %v4038_v33  ;;  %vm8942_vm5 = vmmov %vm8929_vm0 }
 0x4c1   : > { %vm8943_vm1 = vmmov %vm8929_vm0 }
 0x4c2   : > { %v4040_v17 = vpop.permute.xlu1 %4039  ;;  %vm8944_vm15 = vmmov %vm8926_vm4 }
 0x4c3   : > { %4126 = vst.msk [vmem:[#allocation2 + $0x60] sm:$0xff] %vm8926_vm4, %v4040_v17  ;;  %v4170_v11 = vpop.permute.xlu0 %4169  ;;  %v4283_v9 = vld [vmem:[#allocation2 + $0x47] sm:$0xff] }
 0x4c4   : > { %v4671_v52 = vld [vmem:[#allocation2 + $0x48] sm:$0xff]  ;;  %4255 = vst.msk [vmem:[#allocation2 + $0x58] sm:$0xff] %vm8934_vm2, %v4170_v11  ;;  %6535 = vmatprep.mubr.msk.f32.mxu1 %vm8940_vm6, %v4283_v9  ;;  %vm8945_vm6 = vmmov %vm8929_vm0 }
 0x4c5   : > { %6589 = vmatprep.mubr.msk.f32.mxu0 %vm8929_vm0, %v4671_v52 }
 0x4c6   : > { %v4172_v1 = vpop.permute.xlu1 %4171  ;;  %v4284_v18 = vld [vmem:[#allocation2 + $0x4f] sm:$0xff] }
 0x4c7   : > { %v4672_v46 = vld [vmem:[#allocation2 + $0x50] sm:$0xff]  ;;  %4256 = vst.msk [vmem:[#allocation2 + $0x60] sm:$0xff] %vm8941_vm3, %v4172_v1  ;;  %v4042_v15 = vpop.permute.xlu0 %4041  ;;  %6536 = vmatmul.mubr.msk.f32.gmra.mrb[70].mxu1 %vm8942_vm5, %v4284_v18  ;;  %vm8946_vm3 = vmmov %vm8934_vm2 }
 0x4c8   : > { %6590 = vmatmul.mubr.msk.f32.gmra.mrb[102].mxu0 %vm8943_vm1, %v4672_v46  ;;  %4127 = vst.msk [vmem:[#allocation2 + $0x68] sm:$0xff] %vm8944_vm15, %v4042_v15  ;;  %vm8947_vm5 = vmmov %vm8929_vm0 }
 0x4c9   : > { %vm8948_vm1 = vmmov %vm8929_vm0 }
 0x4ca   : > { %v4044_v55 = vpop.permute.xlu1 %4043  ;;  %vm8949_vm15 = vmmov %vm8926_vm4 }
 0x4cb   : > { %4128 = vst.msk [vmem:[#allocation2 + $0x70] sm:$0xff] %vm8926_vm4, %v4044_v55  ;;  %v4174_v19 = vpop.permute.xlu0 %4173  ;;  %v4285_v28 = vld [vmem:[#allocation2 + $0x57] sm:$0xff] }
 0x4cc   : > { %v4673_v37 = vld [vmem:[#allocation2 + $0x58] sm:$0xff]  ;;  %4257 = vst.msk [vmem:[#allocation2 + $0x68] sm:$0xff] %vm8934_vm2, %v4174_v19  ;;  %6538 = vmatprep.mubr.msk.f32.mxu1 %vm8945_vm6, %v4285_v28  ;;  %vm8950_vm6 = vmmov %vm8929_vm0 }
 0x4cd   : > { %6592 = vmatprep.mubr.msk.f32.mxu0 %vm8929_vm0, %v4673_v37 }
 0x4ce   : > { %v4176_v42 = vpop.permute.xlu1 %4175  ;;  %v4286_v61 = vld [vmem:[#allocation2 + $0x5f] sm:$0xff] }
 0x4cf   : > { %v4674_v56 = vld [vmem:[#allocation2 + $0x60] sm:$0xff]  ;;  %4258 = vst.msk [vmem:[#allocation2 + $0x70] sm:$0xff] %vm8946_vm3, %v4176_v42  ;;  %v4046_v4 = vpop.permute.xlu0 %4045  ;;  %6539 = vmatmul.mubr.msk.f32.gmra.mrb[72].mxu1 %vm8947_vm5, %v4286_v61  ;;  %vm8951_vm3 = vmmov %vm8934_vm2 }
 0x4d0   : > { %6593 = vmatmul.mubr.msk.f32.gmra.mrb[104].mxu0 %vm8948_vm1, %v4674_v56  ;;  %4129 = vst.msk [vmem:[#allocation2 + $0x78] sm:$0xff] %vm8949_vm15, %v4046_v4  ;;  %vm8952_vm5 = vmmov %vm8929_vm0 }
 0x4d1   : > { %vm8953_vm1 = vmmov %vm8929_vm0 }
 0x4d2   : > { %v4048_v41 = vpop.permute.xlu1 %4047  ;;  %vm8954_vm15 = vmmov %vm8926_vm4 }
 0x4d3   : > { %4130 = vst.msk [vmem:[#allocation2 + $0x80] sm:$0xff] %vm8926_vm4, %v4048_v41  ;;  %v4178_v63 = vpop.permute.xlu0 %4177  ;;  %v4287_v2 = vld [vmem:[#allocation2 + $0x67] sm:$0xff] }
 0x4d4   : > { %v4675_v53 = vld [vmem:[#allocation2 + $0x68] sm:$0xff]  ;;  %4259 = vst.msk [vmem:[#allocation2 + $0x78] sm:$0xff] %vm8934_vm2, %v4178_v63  ;;  %6541 = vmatprep.mubr.msk.f32.mxu1 %vm8950_vm6, %v4287_v2  ;;  %vm8955_vm6 = vmmov %vm8929_vm0 }
 0x4d5   : > { %6595 = vmatprep.mubr.msk.f32.mxu0 %vm8929_vm0, %v4675_v53 }
 0x4d6   : > { %v4180_v29 = vpop.permute.xlu1 %4179  ;;  %v4288_v31 = vld [vmem:[#allocation2 + $0x6f] sm:$0xff] }
 0x4d7   : > { %v4676_v62 = vld [vmem:[#allocation2 + $0x70] sm:$0xff]  ;;  %4260 = vst.msk [vmem:[#allocation2 + $0x80] sm:$0xff] %vm8951_vm3, %v4180_v29  ;;  %v4050_v40 = vpop.permute.xlu0 %4049  ;;  %6542 = vmatmul.mubr.msk.f32.gmra.mrb[74].mxu1 %vm8952_vm5, %v4288_v31  ;;  %vm8956_vm3 = vmmov %vm8934_vm2 }
 0x4d8   : > { %6596 = vmatmul.mubr.msk.f32.gmra.mrb[106].mxu0 %vm8953_vm1, %v4676_v62  ;;  %4131 = vst.msk [vmem:[#allocation2 + $0x88] sm:$0xff] %vm8954_vm15, %v4050_v40  ;;  %vm8957_vm5 = vmmov %vm8929_vm0 }
 0x4d9   : > { %vm8958_vm1 = vmmov %vm8929_vm0 }
 0x4da   : > { %v4052_v54 = vpop.permute.xlu1 %4051  ;;  %vm8959_vm15 = vmmov %vm8926_vm4 }
 0x4db   : > { %4132 = vst.msk [vmem:[#allocation2 + $0x90] sm:$0xff] %vm8926_vm4, %v4052_v54  ;;  %v4182_v7 = vpop.permute.xlu0 %4181  ;;  %v4289_v21 = vld [vmem:[#allocation2 + $0x77] sm:$0xff] }
 0x4dc   : > { %v4677_v32 = vld [vmem:[#allocation2 + $0x78] sm:$0xff]  ;;  %4261 = vst.msk [vmem:[#allocation2 + $0x88] sm:$0xff] %vm8934_vm2, %v4182_v7  ;;  %6544 = vmatprep.mubr.msk.f32.mxu1 %vm8955_vm6, %v4289_v21  ;;  %vm8960_vm6 = vmmov %vm8929_vm0 }
 0x4dd   : > { %6598 = vmatprep.mubr.msk.f32.mxu0 %vm8929_vm0, %v4677_v32 }
 0x4de   : > { %v4184_v35 = vpop.permute.xlu1 %4183  ;;  %v4290_v36 = vld [vmem:[#allocation2 + $0x7f] sm:$0xff] }
 0x4df   : > { %v4678_v6 = vld [vmem:[#allocation2 + $0x80] sm:$0xff]  ;;  %4262 = vst.msk [vmem:[#allocation2 + $0x90] sm:$0xff] %vm8956_vm3, %v4184_v35  ;;  %v4054_v33 = vpop.permute.xlu0 %4053  ;;  %6545 = vmatmul.mubr.msk.f32.gmra.mrb[76].mxu1 %vm8957_vm5, %v4290_v36  ;;  %vm8961_vm3 = vmmov %vm8934_vm2 }
 0x4e0   : > { %6599 = vmatmul.mubr.msk.f32.gmra.mrb[108].mxu0 %vm8958_vm1, %v4678_v6  ;;  %4133 = vst.msk [vmem:[#allocation2 + $0x98] sm:$0xff] %vm8959_vm15, %v4054_v33  ;;  %vm8962_vm5 = vmmov %vm8929_vm0 }
 0x4e1   : > { %vm8963_vm1 = vmmov %vm8929_vm0 }
 0x4e2   : > { %v4056_v17 = vpop.permute.xlu1 %4055  ;;  %vm8964_vm15 = vmmov %vm8926_vm4 }
 0x4e3   : > { %4134 = vst.msk [vmem:[#allocation2 + $0xa0] sm:$0xff] %vm8926_vm4, %v4056_v17  ;;  %v4186_v11 = vpop.permute.xlu0 %4185  ;;  %v4291_v9 = vld [vmem:[#allocation2 + $0x87] sm:$0xff] }
 0x4e4   : > { %v4679_v52 = vld [vmem:[#allocation2 + $0x88] sm:$0xff]  ;;  %4263 = vst.msk [vmem:[#allocation2 + $0x98] sm:$0xff] %vm8934_vm2, %v4186_v11  ;;  %6547 = vmatprep.mubr.msk.f32.mxu1 %vm8960_vm6, %v4291_v9  ;;  %vm8965_vm6 = vmmov %vm8929_vm0 }
 0x4e5   : > { %6601 = vmatprep.mubr.msk.f32.mxu0 %vm8929_vm0, %v4679_v52 }
 0x4e6   : > { %v4188_v1 = vpop.permute.xlu1 %4187  ;;  %v4292_v18 = vld [vmem:[#allocation2 + $0x8f] sm:$0xff] }
 0x4e7   : > { %v4680_v46 = vld [vmem:[#allocation2 + $0x90] sm:$0xff]  ;;  %4264 = vst.msk [vmem:[#allocation2 + $0xa0] sm:$0xff] %vm8961_vm3, %v4188_v1  ;;  %v4058_v15 = vpop.permute.xlu0 %4057  ;;  %6548 = vmatmul.mubr.msk.f32.gmra.mrb[78].mxu1 %vm8962_vm5, %v4292_v18  ;;  %vm8966_vm3 = vmmov %vm8934_vm2 }
 0x4e8   : > { %6602 = vmatmul.mubr.msk.f32.gmra.mrb[110].mxu0 %vm8963_vm1, %v4680_v46  ;;  %4135 = vst.msk [vmem:[#allocation2 + $0xa8] sm:$0xff] %vm8964_vm15, %v4058_v15  ;;  %vm8967_vm5 = vmmov %vm8929_vm0 }
 0x4e9   : > { %vm8968_vm1 = vmmov %vm8929_vm0 }
 0x4ea   : > { %v4060_v55 = vpop.permute.xlu1 %4059  ;;  %vm8969_vm15 = vmmov %vm8926_vm4 }
 0x4eb   : > { %4136 = vst.msk [vmem:[#allocation2 + $0xb0] sm:$0xff] %vm8926_vm4, %v4060_v55  ;;  %v4190_v19 = vpop.permute.xlu0 %4189  ;;  %v4293_v28 = vld [vmem:[#allocation2 + $0x97] sm:$0xff] }
 0x4ec   : > { %v4681_v37 = vld [vmem:[#allocation2 + $0x98] sm:$0xff]  ;;  %4265 = vst.msk [vmem:[#allocation2 + $0xa8] sm:$0xff] %vm8934_vm2, %v4190_v19  ;;  %6550 = vmatprep.mubr.msk.f32.mxu1 %vm8965_vm6, %v4293_v28  ;;  %vm8970_vm6 = vmmov %vm8929_vm0 }
 0x4ed   : > { %6604 = vmatprep.mubr.msk.f32.mxu0 %vm8929_vm0, %v4681_v37 }
 0x4ee   : > { %v4192_v42 = vpop.permute.xlu1 %4191  ;;  %v4294_v61 = vld [vmem:[#allocation2 + $0x9f] sm:$0xff] }
 0x4ef   : > { %v4682_v56 = vld [vmem:[#allocation2 + $0xa0] sm:$0xff]  ;;  %4266 = vst.msk [vmem:[#allocation2 + $0xb0] sm:$0xff] %vm8966_vm3, %v4192_v42  ;;  %v4062_v4 = vpop.permute.xlu0 %4061  ;;  %6551 = vmatmul.mubr.msk.f32.gmra.mrb[80].mxu1 %vm8967_vm5, %v4294_v61  ;;  %vm8971_vm3 = vmmov %vm8934_vm2 }
 0x4f0   : > { %6605 = vmatmul.mubr.msk.f32.gmra.mrb[112].mxu0 %vm8968_vm1, %v4682_v56  ;;  %4137 = vst.msk [vmem:[#allocation2 + $0xb8] sm:$0xff] %vm8969_vm15, %v4062_v4  ;;  %vm8972_vm5 = vmmov %vm8929_vm0 }
 0x4f1   : > { %vm8973_vm1 = vmmov %vm8929_vm0 }
 0x4f2   : > { %v4064_v41 = vpop.permute.xlu1 %4063  ;;  %vm8974_vm15 = vmmov %vm8926_vm4 }
 0x4f3   : > { %4138 = vst.msk [vmem:[#allocation2 + $0xc0] sm:$0xff] %vm8926_vm4, %v4064_v41  ;;  %v4194_v63 = vpop.permute.xlu0 %4193  ;;  %v4295_v2 = vld [vmem:[#allocation2 + $0xa7] sm:$0xff] }
 0x4f4   : > { %v4683_v53 = vld [vmem:[#allocation2 + $0xa8] sm:$0xff]  ;;  %4267 = vst.msk [vmem:[#allocation2 + $0xb8] sm:$0xff] %vm8934_vm2, %v4194_v63  ;;  %6553 = vmatprep.mubr.msk.f32.mxu1 %vm8970_vm6, %v4295_v2  ;;  %vm8975_vm6 = vmmov %vm8929_vm0 }
 0x4f5   : > { %6607 = vmatprep.mubr.msk.f32.mxu0 %vm8929_vm0, %v4683_v53 }
 0x4f6   : > { %v4196_v29 = vpop.permute.xlu1 %4195  ;;  %v4296_v31 = vld [vmem:[#allocation2 + $0xaf] sm:$0xff] }
 0x4f7   : > { %v4684_v62 = vld [vmem:[#allocation2 + $0xb0] sm:$0xff]  ;;  %4268 = vst.msk [vmem:[#allocation2 + $0xc0] sm:$0xff] %vm8971_vm3, %v4196_v29  ;;  %v4066_v40 = vpop.permute.xlu0 %4065  ;;  %6554 = vmatmul.mubr.msk.f32.gmra.mrb[82].mxu1 %vm8972_vm5, %v4296_v31  ;;  %vm8976_vm3 = vmmov %vm8934_vm2 }
 0x4f8   : > { %6608 = vmatmul.mubr.msk.f32.gmra.mrb[114].mxu0 %vm8973_vm1, %v4684_v62  ;;  %4139 = vst.msk [vmem:[#allocation2 + $0xc8] sm:$0xff] %vm8974_vm15, %v4066_v40  ;;  %vm8977_vm5 = vmmov %vm8929_vm0 }
 0x4f9   : > { %vm8978_vm1 = vmmov %vm8929_vm0 }
 0x4fa   : > { %v4068_v54 = vpop.permute.xlu1 %4067  ;;  %vm8979_vm15 = vmmov %vm8926_vm4 }
 0x4fb   : > { %4140 = vst.msk [vmem:[#allocation2 + $0xd0] sm:$0xff] %vm8926_vm4, %v4068_v54  ;;  %v4198_v7 = vpop.permute.xlu0 %4197  ;;  %v4297_v21 = vld [vmem:[#allocation2 + $0xb7] sm:$0xff] }
 0x4fc   : > { %v4685_v32 = vld [vmem:[#allocation2 + $0xb8] sm:$0xff]  ;;  %4269 = vst.msk [vmem:[#allocation2 + $0xc8] sm:$0xff] %vm8934_vm2, %v4198_v7  ;;  %6556 = vmatprep.mubr.msk.f32.mxu1 %vm8975_vm6, %v4297_v21  ;;  %vm8980_vm6 = vmmov %vm8929_vm0 }
 0x4fd   : > { %6610 = vmatprep.mubr.msk.f32.mxu0 %vm8929_vm0, %v4685_v32 }
 0x4fe   : > { %v4200_v35 = vpop.permute.xlu1 %4199  ;;  %v4298_v36 = vld [vmem:[#allocation2 + $0xbf] sm:$0xff] }
 0x4ff   : > { %v4686_v6 = vld [vmem:[#allocation2 + $0xc0] sm:$0xff]  ;;  %4270 = vst.msk [vmem:[#allocation2 + $0xd0] sm:$0xff] %vm8976_vm3, %v4200_v35  ;;  %v4070_v33 = vpop.permute.xlu0 %4069  ;;  %6557 = vmatmul.mubr.msk.f32.gmra.mrb[84].mxu1 %vm8977_vm5, %v4298_v36  ;;  %vm8981_vm3 = vmmov %vm8934_vm2 }
 0x500   : > { %6611 = vmatmul.mubr.msk.f32.gmra.mrb[116].mxu0 %vm8978_vm1, %v4686_v6  ;;  %4141 = vst.msk [vmem:[#allocation2 + $0xd8] sm:$0xff] %vm8979_vm15, %v4070_v33  ;;  %vm8982_vm5 = vmmov %vm8929_vm0 }
 0x501   : > { %vm8983_vm1 = vmmov %vm8929_vm0 }
 0x502   : > { %v4072_v17 = vpop.permute.xlu1 %4071  ;;  %vm8984_vm15 = vmmov %vm8926_vm4 }
 0x503   : > { %4142 = vst.msk [vmem:[#allocation2 + $0xe0] sm:$0xff] %vm8926_vm4, %v4072_v17  ;;  %v4202_v11 = vpop.permute.xlu0 %4201  ;;  %v4299_v9 = vld [vmem:[#allocation2 + $0xc7] sm:$0xff] }
 0x504   : > { %v4687_v52 = vld [vmem:[#allocation2 + $0xc8] sm:$0xff]  ;;  %4271 = vst.msk [vmem:[#allocation2 + $0xd8] sm:$0xff] %vm8934_vm2, %v4202_v11  ;;  %6559 = vmatprep.mubr.msk.f32.mxu1 %vm8980_vm6, %v4299_v9  ;;  %vm8985_vm6 = vmmov %vm8929_vm0 }
 0x505   : > { %6613 = vmatprep.mubr.msk.f32.mxu0 %vm8929_vm0, %v4687_v52  ;;  %v5054_v52 = vld [vmem:[#allocation2 + $0x19] sm:$0xff] }
 0x506   : > { %v4204_v1 = vpop.permute.xlu1 %4203  ;;  %v4300_v18 = vld [vmem:[#allocation2 + $0xcf] sm:$0xff] }
 0x507   : > { %v4688_v46 = vld [vmem:[#allocation2 + $0xd0] sm:$0xff]  ;;  %4272 = vst.msk [vmem:[#allocation2 + $0xe0] sm:$0xff] %vm8981_vm3, %v4204_v1  ;;  %v4074_v15 = vpop.permute.xlu0 %4073  ;;  %6560 = vmatmul.mubr.msk.f32.gmra.mrb[86].mxu1 %vm8982_vm5, %v4300_v18  ;;  %vm8986_vm3 = vmmov %vm8934_vm2  ;;  %v5055_v1 = vld [vmem:[#allocation2 + $0x21] sm:$0xff] }
 0x508   : > { %6614 = vmatmul.mubr.msk.f32.gmra.mrb[118].mxu0 %vm8983_vm1, %v4688_v46  ;;  %4143 = vst.msk [vmem:[#allocation2 + $0xe8] sm:$0xff] %vm8984_vm15, %v4074_v15  ;;  %vm8987_vm5 = vmmov %vm8929_vm0  ;;  %v5056_v18 = vld [vmem:[#allocation2 + $0x29] sm:$0xff]  ;;  %v5057_v46 = vld [vmem:[#allocation2 + $0x31] sm:$0xff] }
 0x509   : > { %vm8988_vm1 = vmmov %vm8929_vm0  ;;  %v5058_v15 = vld [vmem:[#allocation2 + $0x39] sm:$0xff] }
 0x50a   : > { %v4076_v55 = vpop.permute.xlu1 %4075  ;;  %vm8989_vm15 = vmmov %vm8926_vm4 }
 0x50b   : > { %4144 = vst.msk [vmem:[#allocation2 + $0xf0] sm:$0xff] %vm8926_vm4, %v4076_v55  ;;  %v4206_v19 = vpop.permute.xlu0 %4205  ;;  %v4301_v28 = vld [vmem:[#allocation2 + $0xd7] sm:$0xff]  ;;  %v5059_v55 = vld [vmem:[#allocation2 + $0x41] sm:$0xff] }
 0x50c   : > { %v4689_v37 = vld [vmem:[#allocation2 + $0xd8] sm:$0xff]  ;;  %4273 = vst.msk [vmem:[#allocation2 + $0xe8] sm:$0xff] %vm8934_vm2, %v4206_v19  ;;  %6562 = vmatprep.mubr.msk.f32.mxu1 %vm8985_vm6, %v4301_v28  ;;  %vm8990_vm6 = vmmov %vm8929_vm0  ;;  %v5060_v19 = vld [vmem:[#allocation2 + $0x49] sm:$0xff] }
 0x50d   : > { %6616 = vmatprep.mubr.msk.f32.mxu0 %vm8929_vm0, %v4689_v37  ;;  %v5061_v28 = vld [vmem:[#allocation2 + $0x51] sm:$0xff]  ;;  %v5062_v37 = vld [vmem:[#allocation2 + $0x59] sm:$0xff] }
 0x50e   : > { %v4208_v42 = vpop.permute.xlu1 %4207  ;;  %v4302_v61 = vld [vmem:[#allocation2 + $0xdf] sm:$0xff] }
 0x50f   : > { %v4690_v56 = vld [vmem:[#allocation2 + $0xe0] sm:$0xff]  ;;  %4274 = vst.msk [vmem:[#allocation2 + $0xf0] sm:$0xff] %vm8986_vm3, %v4208_v42  ;;  %v4078_v4 = vpop.permute.xlu0 %4077  ;;  %6563 = vmatmul.mubr.msk.f32.gmra.mrb[88].mxu1 %vm8987_vm5, %v4302_v61  ;;  %vm8991_vm3 = vmmov %vm8934_vm2  ;;  %v5064_v61 = vld [vmem:[#allocation2 + $0x69] sm:$0xff] }
 0x510   : > { %6617 = vmatmul.mubr.msk.f32.gmra.mrb[120].mxu0 %vm8988_vm1, %v4690_v56  ;;  %4145 = vst.msk [vmem:[#allocation2 + $0xf8] sm:$0xff] %vm8989_vm15, %v4078_v4  ;;  %vm8992_vm5 = vmmov %vm8929_vm0  ;;  %v5063_v42 = vld [vmem:[#allocation2 + $0x61] sm:$0xff]  ;;  %v5065_v56 = vld [vmem:[#allocation2 + $0x71] sm:$0xff] }
 0x511   : > { %vm8993_vm1 = vmmov %vm8929_vm0  ;;  %v5066_v4 = vld [vmem:[#allocation2 + $0x79] sm:$0xff] }
 0x512   : > { %v4080_v41 = vpop.permute.xlu1 %4079  ;;  %vm8994_vm15 = vmmov %vm8926_vm4 }
 0x513   : > { %4146 = vst.msk [vmem:[#allocation2 + $0x100] sm:$0xff] %vm8926_vm4, %v4080_v41  ;;  %v4210_v63 = vpop.permute.xlu0 %4209  ;;  %v4303_v2 = vld [vmem:[#allocation2 + $0xe7] sm:$0xff] }
 0x514   : > { %v4691_v53 = vld [vmem:[#allocation2 + $0xe8] sm:$0xff]  ;;  %4275 = vst.msk [vmem:[#allocation2 + $0xf8] sm:$0xff] %vm8934_vm2, %v4210_v63  ;;  %6565 = vmatprep.mubr.msk.f32.mxu1 %vm8990_vm6, %v4303_v2  ;;  %vm8995_vm2 = vmmov %vm8929_vm0  ;;  %v5069_v2 = vld [vmem:[#allocation2 + $0x91] sm:$0xff] }
 0x515   : > { %6619 = vmatprep.mubr.msk.f32.mxu0 %vm8929_vm0, %v4691_v53  ;;  %vm8996_vm6 = vmmov %vm8929_vm0  ;;  %v5067_v41 = vld [vmem:[#allocation2 + $0x81] sm:$0xff]  ;;  %v5068_v63 = vld [vmem:[#allocation2 + $0x89] sm:$0xff] }
 0x516   : > { %v4212_v29 = vpop.permute.xlu1 %4211  ;;  %v4304_v31 = vld [vmem:[#allocation2 + $0xef] sm:$0xff]  ;;  %v5070_v53 = vld [vmem:[#allocation2 + $0x99] sm:$0xff] }
 0x517   : > { %v4692_v62 = vld [vmem:[#allocation2 + $0xf0] sm:$0xff]  ;;  %4276 = vst.msk [vmem:[#allocation2 + $0x100] sm:$0xff] %vm8991_vm3, %v4212_v29  ;;  %v4082_v40 = vpop.permute.xlu0 %4081  ;;  %6566 = vmatmul.mubr.msk.f32.gmra.mrb[90].mxu1 %vm8992_vm5, %v4304_v31  ;;  %vm8997_vm3 = vmmov %vm8929_vm0  ;;  %v5071_v29 = vld [vmem:[#allocation2 + $0xa1] sm:$0xff] }
 0x518   : > { %6620 = vmatmul.mubr.msk.f32.gmra.mrb[122].mxu0 %vm8993_vm1, %v4692_v62  ;;  %4147 = vst.msk [vmem:[#allocation2 + $0x108] sm:$0xff] %vm8994_vm15, %v4082_v40  ;;  %vm8998_vm5 = vmmov %vm8929_vm0  ;;  %v5072_v31 = vld [vmem:[#allocation2 + $0xa9] sm:$0xff]  ;;  %v5073_v62 = vld [vmem:[#allocation2 + $0xb1] sm:$0xff] }
 0x519   : > { %vm8999_vm1 = vmmov %vm8929_vm0  ;;  %v5074_v40 = vld [vmem:[#allocation2 + $0xb9] sm:$0xff] }
 0x51a   : > { %v4084_v54 = vpop.permute.xlu1 %4083  ;;  %vm9000_vm15 = vmmov %vm8929_vm0 }
 0x51b   : > { %4148 = vst.msk [vmem:[#allocation2 + $0x110] sm:$0xff] %vm8926_vm4, %v4084_v54  ;;  %v1767_v7 = vpop.permute.xlu0 %1766  ;;  %v4305_v21 = vld [vmem:[#allocation2 + $0xf7] sm:$0xff]  ;;  %vm9001_vm4 = vmmov %vm8929_vm0  ;;  %v5075_v54 = vld [vmem:[#allocation2 + $0xc1] sm:$0xff] }
 0x51c   : > { %v4693_v32 = vld [vmem:[#allocation2 + $0xf8] sm:$0xff]  ;;  %6568 = vmatprep.mubr.msk.f32.mxu1 %vm8995_vm2, %v4305_v21  ;;  %vm9002_vm2 = vmmov %vm8929_vm0  ;;  %v5076_v7 = vld [vmem:[#allocation2 + $0xc9] sm:$0xff] }
 0x51d   : > { %6622 = vmatprep.mubr.msk.f32.mxu0 %vm8996_vm6, %v4693_v32  ;;  %vm9003_vm6 = vmmov %vm8929_vm0  ;;  %v5077_v21 = vld [vmem:[#allocation2 + $0xd1] sm:$0xff]  ;;  %v5078_v32 = vld [vmem:[#allocation2 + $0xd9] sm:$0xff] }
 0x51e   : > { %v4150_v35 = vpop.permute.xlu1 %4149  ;;  %v4306_v36 = vld [vmem:[#allocation2 + $0xff] sm:$0xff] }
 0x51f   : > { %v4694_v6 = vld [vmem:[#allocation2 + $0x100] sm:$0xff]  ;;  %6569 = vmatmul.mubr.msk.f32.gmra.mrb[92].mxu1 %vm8929_vm0, %v4306_v36  ;;  %v4695_v17 = vld [vmem:[#allocation2 + $0x108] sm:$0xff] }
 0x520   : > { %6623 = vmatmul.mubr.msk.f32.gmra.mrb[124].mxu0 %vm8997_vm3, %v4694_v6  ;;  %v4307_v33 = vld [vmem:[#allocation2 + $0x107] sm:$0xff]  ;;  %vm9004_vm3 = vmmov %vm8929_vm0  ;;  %v5081_v6 = vld [vmem:[#allocation2 + $0xf1] sm:$0xff] }
 0x521   : > { %6571 = vmatprep.mubr.msk.f32.mxu1 %vm8998_vm5, %v4307_v33  ;;  %6625 = vmatprep.mubr.msk.f32.mxu0 %vm8999_vm1, %v4695_v17  ;;  %vm9005_vm5 = vmmov %vm8929_vm0  ;;  %v5079_v35 = vld [vmem:[#allocation2 + $0xe1] sm:$0xff]  ;;  %v5080_v36 = vld [vmem:[#allocation2 + $0xe9] sm:$0xff] }
 0x522   : > { %v4308_v11 = vld [vmem:[#allocation2 + $0x10f] sm:$0xff]  ;;  %vm9006_vm1 = vmmov %vm8929_vm0  ;;  %v5082_v33 = vld [vmem:[#allocation2 + $0xf9] sm:$0xff] }
 0x523   : > { %v4696_v9 = vld [vmem:[#allocation2 + $0x110] sm:$0xff]  ;;  %6572 = vmatmul.mubr.msk.f32.gmra.mrb[94].mxu1 %vm9000_vm15, %v4308_v11  ;;  %vm9007_vm15 = vmmov %vm8929_vm0  ;;  %v5083_v17 = vld [vmem:[#allocation2 + $0x101] sm:$0xff] }
 0x524   : > { %6626 = vmatmul.mubr.msk.f32.gmra.mrb[126].mxu0 %vm9001_vm4, %v4696_v9  ;;  %6634 = vmatprep.mubr.msk.f32.mxu1 %vm9002_vm2, %v5054_v52  ;;  %vm9008_vm4 = vmmov %vm8929_vm0  ;;  %v5084_v11 = vld [vmem:[#allocation2 + $0x109] sm:$0xff]  ;;  %v5085_v9 = vld [vmem:[#allocation2 + $0x111] sm:$0xff] }
 0x525   : > { %vm9009_vm2 = vmmov %vm8929_vm0 }
 0x527   : > { %6635 = vmatmul.mubr.msk.f32.vlgmr.msra.gmra.mrb[96].mxu1 %vm9003_vm6, %v5055_v1  ;;  %vm9010_vm6 = vmmov %vm8929_vm0 }
 0x528   : > { %6637 = vmatprep.mubr.msk.f32.mxu1 %vm8929_vm0, %v5056_v18 }
 0x52b   : > { %6638 = vmatmul.mubr.msk.f32.gmra.mrb[98].mxu1 %vm9004_vm3, %v5057_v46  ;;  %vm9011_vm3 = vmmov %vm8929_vm0 }
 0x52c   : > { %6640 = vmatprep.mubr.msk.f32.mxu1 %vm9005_vm5, %v5058_v15  ;;  %vm9012_vm5 = vmmov %vm8929_vm0 }
 0x52f   : > { %6641 = vmatmul.mubr.msk.f32.gmra.mrb[100].mxu1 %vm9006_vm1, %v5059_v55  ;;  %vm9013_vm1 = vmmov %vm8929_vm0 }
 0x530   : > { %6643 = vmatprep.mubr.msk.f32.mxu1 %vm9007_vm15, %v5060_v19  ;;  %vm9014_vm15 = vmmov %vm8929_vm0 }
 0x533   : > { %6644 = vmatmul.mubr.msk.f32.gmra.mrb[102].mxu1 %vm9008_vm4, %v5061_v28  ;;  %vm9015_vm4 = vmmov %vm8929_vm0 }
 0x534   : > { %6646 = vmatprep.mubr.msk.f32.mxu1 %vm9009_vm2, %v5062_v37  ;;  %vm9016_vm2 = vmmov %vm8929_vm0 }
 0x537   : > { %6647 = vmatmul.mubr.msk.f32.gmra.mrb[104].mxu1 %vm9010_vm6, %v5063_v42  ;;  %vm9017_vm6 = vmmov %vm8929_vm0 }
 0x538   : > { %6649 = vmatprep.mubr.msk.f32.mxu1 %vm8929_vm0, %v5064_v61 }
 0x53b   : > { %6650 = vmatmul.mubr.msk.f32.gmra.mrb[106].mxu1 %vm9011_vm3, %v5065_v56  ;;  %vm9018_vm3 = vmmov %vm8929_vm0 }
 0x53c   : > { %6652 = vmatprep.mubr.msk.f32.mxu1 %vm9012_vm5, %v5066_v4  ;;  %vm9019_vm5 = vmmov %vm8929_vm0 }
 0x53f   : > { %6653 = vmatmul.mubr.msk.f32.gmra.mrb[108].mxu1 %vm9013_vm1, %v5067_v41  ;;  %vm9020_vm1 = vmmov %vm8929_vm0 }
 0x540   : > { %6655 = vmatprep.mubr.msk.f32.mxu1 %vm9014_vm15, %v5068_v63  ;;  %vm9021_vm15 = vmmov %vm8929_vm0 }
 0x543   : > { %6656 = vmatmul.mubr.msk.f32.gmra.mrb[110].mxu1 %vm9015_vm4, %v5069_v2  ;;  %vm9022_vm4 = vmmov %vm8929_vm0 }
 0x544   : > { %6658 = vmatprep.mubr.msk.f32.mxu1 %vm9016_vm2, %v5070_v53  ;;  %vm9023_vm2 = vmmov %vm8929_vm0 }
 0x547   : > { %6659 = vmatmul.mubr.msk.f32.gmra.mrb[112].mxu1 %vm9017_vm6, %v5071_v29  ;;  %vm9024_vm6 = vmmov %vm8929_vm0 }
 0x548   : > { %6661 = vmatprep.mubr.msk.f32.mxu1 %vm8929_vm0, %v5072_v31 }
 0x54b   : > { %6662 = vmatmul.mubr.msk.f32.gmra.mrb[114].mxu1 %vm9018_vm3, %v5073_v62  ;;  %vm9025_vm3 = vmmov %vm8929_vm0 }
 0x54c   : > { %6664 = vmatprep.mubr.msk.f32.mxu1 %vm9019_vm5, %v5074_v40  ;;  %vm9026_vm5 = vmmov %vm8929_vm0 }
 0x54f   : > { %6665 = vmatmul.mubr.msk.f32.gmra.mrb[116].mxu1 %vm9020_vm1, %v5075_v54  ;;  %vm9027_vm1 = vmmov %vm8929_vm0 }
 0x550   : > { %6667 = vmatprep.mubr.msk.f32.mxu1 %vm9021_vm15, %v5076_v7  ;;  %vm9028_vm15 = vmmov %vm8929_vm0 }
 0x553   : > { %6668 = vmatmul.mubr.msk.f32.gmra.mrb[118].mxu1 %vm9022_vm4, %v5077_v21  ;;  %vm9029_vm4 = vmmov %vm8929_vm0 }
 0x554   : > { %6670 = vmatprep.mubr.msk.f32.mxu1 %vm9023_vm2, %v5078_v32  ;;  %vm9038_vm2 = vnez %v8835_v58 }
 0x557   : > { %6671 = vmatmul.mubr.msk.f32.gmra.mrb[120].mxu1 %vm9024_vm6, %v5079_v35  ;;  %vm9039_vm6 = vnez %v8837_v12 }
 0x558   : > { %6673 = vmatprep.mubr.msk.f32.mxu1 %vm8929_vm0, %v5080_v36  ;;  %vm9040_vm0 = vnez %v8839_v38 }
 0x55b   : > { %6674 = vmatmul.mubr.msk.f32.gmra.mrb[122].mxu1 %vm9025_vm3, %v5081_v6  ;;  %vm9041_vm3 = vnez %v8841_v50 }
 0x55c   : > { %6676 = vmatprep.mubr.msk.f32.mxu1 %vm9026_vm5, %v5082_v33  ;;  %vm9042_vm5 = vnez %v8843_v48 }
 0x55f   : > { %6677 = vmatmul.mubr.msk.f32.gmra.mrb[124].mxu1 %vm9027_vm1, %v5083_v17  ;;  %vm9043_vm1 = vnez %v8845_v3 }
 0x560   : > { %6679 = vmatprep.mubr.msk.f32.mxu1 %vm9028_vm15, %v5084_v11  ;;  %vm9044_vm15 = vnez %v8847_v14 }
 0x563   : > { %6680 = vmatmul.mubr.msk.f32.gmra.mrb[126].mxu1 %vm9029_vm4, %v5085_v9  ;;  %vm9045_vm4 = vnez %v8849_v20 }
 0x582   : > { %v6528_v52 = vpop.f32.mrb[64].mxu1 }
 0x583   : > { %v6582_v1 = vpop.f32.mrb[96].mxu0  ;;  %v4474_v46 = vpop.f32.mrb[65].mxu1 }
 0x584   : > { %v8501_v18 = vadd.f32 %v6582_v1, %v6528_v52  ;;  %v4863_v15 = vpop.f32.mrb[97].mxu0  ;;  %v4633_v55 = vsel %vm7501_vm7, %v4474_v46, 0.0  ;;  %vm9030_vm7 = vnez %v8819_v60 }
 0x585   : > { %v8505_v19 = vadd.f32 %v4863_v15, %v4633_v55 }
 0x58a   : > { %v6531_v28 = vpop.f32.mrb[66].mxu1 }
 0x58b   : > { %v6585_v37 = vpop.f32.mrb[98].mxu0  ;;  %v4484_v61 = vpop.f32.mrb[67].mxu1 }
 0x58c   : > { %v8507_v42 = vadd.f32 %v6585_v37, %v6531_v28  ;;  %v4873_v56 = vpop.f32.mrb[99].mxu0  ;;  %v4635_v4 = vsel %vm7512_vm8, %v4484_v61, 0.0  ;;  %vm9031_vm8 = vnez %v8821_v10 }
 0x58d   : > { %v8511_v41 = vadd.f32 %v4873_v56, %v4635_v4 }
 0x592   : > { %v6534_v63 = vpop.f32.mrb[68].mxu1 }
 0x593   : > { %v6588_v2 = vpop.f32.mrb[100].mxu0  ;;  %v4494_v29 = vpop.f32.mrb[69].mxu1 }
 0x594   : > { %v8513_v53 = vadd.f32 %v6588_v2, %v6534_v63  ;;  %v4883_v30 = vpop.f32.mrb[101].mxu0  ;;  %v4637_v31 = vsel %vm7523_vm9, %v4494_v29, 0.0  ;;  %vm9032_vm9 = vnez %v8823_v26 }
 0x595   : > { %v8517_v62 = vadd.f32 %v4883_v30, %v4637_v31 }
 0x59a   : > { %v6537_v40 = vpop.f32.mrb[70].mxu1 }
 0x59b   : > { %v6591_v54 = vpop.f32.mrb[102].mxu0  ;;  %v4504_v21 = vpop.f32.mrb[71].mxu1 }
 0x59c   : > { %v8519_v7 = vadd.f32 %v6591_v54, %v6537_v40  ;;  %v4893_v39 = vpop.f32.mrb[103].mxu0  ;;  %v4639_v32 = vsel %vm7534_vm10, %v4504_v21, 0.0  ;;  %vm9033_vm10 = vnez %v8825_v47 }
 0x59d   : > { %v8523_v35 = vadd.f32 %v4893_v39, %v4639_v32 }
 0x5a2   : > { %v6540_v36 = vpop.f32.mrb[72].mxu1 }
 0x5a3   : > { %v6594_v6 = vpop.f32.mrb[104].mxu0  ;;  %v4514_v17 = vpop.f32.mrb[73].mxu1 }
 0x5a4   : > { %v8525_v33 = vadd.f32 %v6594_v6, %v6540_v36  ;;  %v4903_v51 = vpop.f32.mrb[105].mxu0  ;;  %v4641_v11 = vsel %vm7545_vm11, %v4514_v17, 0.0  ;;  %vm9034_vm11 = vnez %v8827_v0 }
 0x5a5   : > { %v8529_v9 = vadd.f32 %v4903_v51, %v4641_v11 }
 0x5aa   : > { %v6543_v52 = vpop.f32.mrb[74].mxu1 }
 0x5ab   : > { %v6597_v1 = vpop.f32.mrb[106].mxu0  ;;  %v4524_v15 = vpop.f32.mrb[75].mxu1 }
 0x5ac   : > { %v8531_v46 = vadd.f32 %v6597_v1, %v6543_v52  ;;  %v4913_v59 = vpop.f32.mrb[107].mxu0  ;;  %v4643_v55 = vsel %vm7556_vm12, %v4524_v15, 0.0  ;;  %vm9035_vm12 = vnez %v8829_v22 }
 0x5ad   : > { %v8535_v28 = vadd.f32 %v4913_v59, %v4643_v55 }
 0x5b2   : > { %v6546_v37 = vpop.f32.mrb[76].mxu1 }
 0x5b3   : > { %v6600_v61 = vpop.f32.mrb[108].mxu0  ;;  %v4534_v4 = vpop.f32.mrb[77].mxu1 }
 0x5b4   : > { %v8537_v56 = vadd.f32 %v6600_v61, %v6546_v37  ;;  %v4923_v5 = vpop.f32.mrb[109].mxu0  ;;  %v4645_v63 = vsel %vm7567_vm13, %v4534_v4, 0.0  ;;  %vm9036_vm13 = vnez %v8831_v57 }
 0x5b5   : > { %v8541_v2 = vadd.f32 %v4923_v5, %v4645_v63 }
 0x5ba   : > { %v6549_v29 = vpop.f32.mrb[78].mxu1 }
 0x5bb   : > { %v6603_v30 = vpop.f32.mrb[110].mxu0  ;;  %v4544_v40 = vpop.f32.mrb[79].mxu1 }
 0x5bc   : > { %v8543_v31 = vadd.f32 %v6603_v30, %v6549_v29  ;;  %v4933_v16 = vpop.f32.mrb[111].mxu0  ;;  %v4647_v54 = vsel %vm7578_vm14, %v4544_v40, 0.0  ;;  %vm9037_vm14 = vnez %v8833_v24 }
 0x5bd   : > { %v8547_v21 = vadd.f32 %v4933_v16, %v4647_v54 }
 0x5c2   : > { %v6552_v39 = vpop.f32.mrb[80].mxu1 }
 0x5c3   : > { %v6606_v32 = vpop.f32.mrb[112].mxu0  ;;  %v4554_v6 = vpop.f32.mrb[81].mxu1 }
 0x5c4   : > { %v8549_v36 = vadd.f32 %v6606_v32, %v6552_v39  ;;  %v4943_v27 = vpop.f32.mrb[113].mxu0  ;;  %v4649_v17 = vsel %vm9030_vm7, %v4554_v6, 0.0  ;;  %vm9046_vm7 = vnez %v8851_v13 }
 0x5c5   : > { %v8553_v51 = vadd.f32 %v4943_v27, %v4649_v17 }
 0x5ca   : > { %v6555_v11 = vpop.f32.mrb[82].mxu1 }
 0x5cb   : > { %v6609_v52 = vpop.f32.mrb[114].mxu0  ;;  %v4564_v15 = vpop.f32.mrb[83].mxu1 }
 0x5cc   : > { %v8555_v1 = vadd.f32 %v6609_v52, %v6555_v11  ;;  %v4953_v43 = vpop.f32.mrb[115].mxu0  ;;  %v4651_v59 = vsel %vm9031_vm8, %v4564_v15, 0.0  ;;  %vm9047_vm8 = vnez %v8853_v49 }
 0x5cd   : > { %v8559_v55 = vadd.f32 %v4953_v43, %v4651_v59 }
 0x5d2   : > { %v6558_v37 = vpop.f32.mrb[84].mxu1 }
 0x5d3   : > { %v6612_v61 = vpop.f32.mrb[116].mxu0  ;;  %v4574_v5 = vpop.f32.mrb[85].mxu1 }
 0x5d4   : > { %v8561_v4 = vadd.f32 %v6612_v61, %v6558_v37  ;;  %v4963_v60 = vpop.f32.mrb[117].mxu0  ;;  %v4653_v63 = vsel %vm9032_vm9, %v4574_v5, 0.0  ;;  %vm9048_vm9 = vnez %v8855_v25 }
 0x5d5   : > { %v8565_v29 = vadd.f32 %v4963_v60, %v4653_v63 }
 0x5da   : > { %v6561_v30 = vpop.f32.mrb[86].mxu1 }
 0x5db   : > { %v6615_v40 = vpop.f32.mrb[118].mxu0  ;;  %v4584_v54 = vpop.f32.mrb[87].mxu1 }
 0x5dc   : > { %v8567_v16 = vadd.f32 %v6615_v40, %v6561_v30  ;;  %v4973_v10 = vpop.f32.mrb[119].mxu0  ;;  %v4655_v39 = vsel %vm9033_vm10, %v4584_v54, 0.0  ;;  %vm9049_vm10 = vnez %v8857_v23 }
 0x5dd   : > { %v8571_v32 = vadd.f32 %v4973_v10, %v4655_v39 }
 0x5e2   : > { %v6564_v6 = vpop.f32.mrb[88].mxu1 }
 0x5e3   : > { %v6618_v27 = vpop.f32.mrb[120].mxu0  ;;  %v4594_v11 = vpop.f32.mrb[89].mxu1 }
 0x5e4   : > { %v8573_v17 = vadd.f32 %v6618_v27, %v6564_v6  ;;  %v4983_v26 = vpop.f32.mrb[121].mxu0  ;;  %v4657_v52 = vsel %vm9034_vm11, %v4594_v11, 0.0  ;;  %vm9050_vm11 = vnez %v8859_v44 }
 0x5e5   : > { %v8577_v15 = vadd.f32 %v4983_v26, %v4657_v52 }
 0x5ea   : > { %v6567_v43 = vpop.f32.mrb[90].mxu1 }
 0x5eb   : > { %v6621_v59 = vpop.f32.mrb[122].mxu0  ;;  %v4604_v61 = vpop.f32.mrb[91].mxu1 }
 0x5ec   : > { %v8579_v37 = vadd.f32 %v6621_v59, %v6567_v43  ;;  %v4993_v47 = vpop.f32.mrb[123].mxu0  ;;  %v4659_v5 = vsel %vm9035_vm12, %v4604_v61, 0.0  ;;  %vm9051_vm12 = vnez %v8861_v34 }
 0x5ed   : > { %v8583_v60 = vadd.f32 %v4993_v47, %v4659_v5 }
 0x5f2   : > { %v6570_v63 = vpop.f32.mrb[92].mxu1 }
 0x5f3   : > { %v6624_v30 = vpop.f32.mrb[124].mxu0  ;;  %v4614_v54 = vpop.f32.mrb[93].mxu1 }
 0x5f4   : > { %v8585_v40 = vadd.f32 %v6624_v30, %v6570_v63  ;;  %v5003_v0 = vpop.f32.mrb[125].mxu0  ;;  %v4661_v10 = vsel %vm9036_vm13, %v4614_v54, 0.0  ;;  %vm9052_vm13 = vnez %v8863_v8 }
 0x5f5   : > { %v8589_v39 = vadd.f32 %v5003_v0, %v4661_v10 }
 0x5f6   : > { %v6573_v6 = vpop.f32.mrb[94].mxu1 }
 0x5f7   : > { %v6627_v27 = vpop.f32.mrb[126].mxu0  ;;  %v4624_v26 = vpop.f32.mrb[95].mxu1 }
 0x5f8   : > { %v8591_v11 = vadd.f32 %v6627_v27, %v6573_v6  ;;  %v5013_v22 = vpop.f32.mrb[127].mxu0  ;;  %v4663_v52 = vsel %vm9037_vm14, %v4624_v26, 0.0  ;;  %vm9053_vm14 = vnez %v8865_v45 }
 0x5f9   : > { %v8595_v43 = vadd.f32 %v5013_v22, %v4663_v52 }
 0x5fa   : > { %v6636_v59 = vpop.f32.mrb[96].mxu1 }
 0x5fb   : > { %v5412_v61 = vsel %vm9038_vm2, %v6636_v59, 0.0  ;;  %v5252_v47 = vpop.f32.mrb[97].mxu1  ;;  %vm9054_vm2 = vcmask 195712  }
 0x5fc   : > { %v5444_v57 = vadd.f32 %v5412_v61, %v8501_v18  ;;  %v5443_v5 = vadd.f32 %v5252_v47, %v8505_v19 }
 0x5fe   : > { %5509 = vrot.lane.b32.xlu1 %v5444_v57, %s6730_s20  ;;  %5507 = vrot.lane.b32.xlu0 %v5443_v5, %s6730_s20  ;;  %v6639_v63 = vpop.f32.mrb[98].mxu1 }
 0x5ff   : > { %v5414_v24 = vsel %vm9039_vm6, %v6639_v63, 0.0  ;;  %v5262_v30 = vpop.f32.mrb[99].mxu1  ;;  %vm9055_vm6 = vmmov %vm9054_vm2 }
 0x600   : > { %v5446_v54 = vadd.f32 %v5414_v24, %v8507_v42  ;;  %v5445_v0 = vadd.f32 %v5262_v30, %v8511_v41 }
 0x602   : > { %5513 = vrot.lane.b32.xlu1 %v5446_v54, %s6730_s20  ;;  %5511 = vrot.lane.b32.xlu0 %v5445_v0, %s6730_s20  ;;  %v6642_v58 = vpop.f32.mrb[100].mxu1 }
 0x603   : > { %v5416_v18 = vsel %vm9040_vm0, %v6642_v58, 0.0  ;;  %v5272_v19 = vpop.f32.mrb[101].mxu1  ;;  %vm9056_vm0 = vmmov %vm9054_vm2 }
 0x604   : > { %v5448_v10 = vadd.f32 %v5416_v18, %v8513_v53  ;;  %v5447_v6 = vadd.f32 %v5272_v19, %v8517_v62 }
 0x606   : > { %5517 = vrot.lane.b32.xlu1 %v5448_v10, %s6730_s20  ;;  %5515 = vrot.lane.b32.xlu0 %v5447_v6, %s6730_s20  ;;  %v6645_v12 = vpop.f32.mrb[102].mxu1 }
 0x607   : > { %v5418_v42 = vsel %vm9041_vm3, %v6645_v12, 0.0  ;;  %v5282_v41 = vpop.f32.mrb[103].mxu1  ;;  %vm9057_vm3 = vmmov %vm9056_vm0 }
 0x608   : > { %v5450_v27 = vadd.f32 %v5418_v42, %v8519_v7  ;;  %v5449_v26 = vadd.f32 %v5282_v41, %v8523_v35 }
 0x60a   : > { %5521 = vrot.lane.b32.xlu1 %v5450_v27, %s6730_s20  ;;  %5519 = vrot.lane.b32.xlu0 %v5449_v26, %s6730_s20  ;;  %v6648_v38 = vpop.f32.mrb[104].mxu1 }
 0x60b   : > { %v5420_v53 = vsel %vm9042_vm5, %v6648_v38, 0.0  ;;  %v5292_v62 = vpop.f32.mrb[105].mxu1  ;;  %vm9058_vm5 = vmmov %vm9056_vm0 }
 0x60c   : > { %v5452_v22 = vadd.f32 %v5420_v53, %v8525_v33  ;;  %v5451_v52 = vadd.f32 %v5292_v62, %v8529_v9 }
 0x60e   : > { %5525 = vrot.lane.b32.xlu1 %v5452_v22, %s6730_s20  ;;  %5523 = vrot.lane.b32.xlu0 %v5451_v52, %s6730_s20  ;;  %v6651_v50 = vpop.f32.mrb[106].mxu1 }
 0x60f   : > { %v5422_v7 = vsel %vm9043_vm1, %v6651_v50, 0.0  ;;  %v5302_v35 = vpop.f32.mrb[107].mxu1  ;;  %vm9059_vm1 = vmmov %vm9056_vm0 }
 0x610   : > { %v5454_v59 = vadd.f32 %v5422_v7, %v8531_v46  ;;  %v5453_v61 = vadd.f32 %v5302_v35, %v8535_v28 }
 0x612   : > { %5529 = vrot.lane.b32.xlu1 %v5454_v59, %s6730_s20  ;;  %5527 = vrot.lane.b32.xlu0 %v5453_v61, %s6730_s20  ;;  %v6654_v48 = vpop.f32.mrb[108].mxu1 }
 0x613   : > { %v5424_v33 = vsel %vm9044_vm15, %v6654_v48, 0.0  ;;  %v5312_v9 = vpop.f32.mrb[109].mxu1  ;;  %vm9060_vm15 = vmmov %vm9056_vm0 }
 0x614   : > { %v5456_v47 = vadd.f32 %v5424_v33, %v8537_v56  ;;  %v5455_v57 = vadd.f32 %v5312_v9, %v8541_v2 }
 0x616   : > { %5533 = vrot.lane.b32.xlu1 %v5456_v47, %s6730_s20  ;;  %5531 = vrot.lane.b32.xlu0 %v5455_v57, %s6730_s20  ;;  %v6657_v3 = vpop.f32.mrb[110].mxu1 }
 0x617   : > { %v5426_v46 = vsel %vm9045_vm4, %v6657_v3, 0.0  ;;  %v5322_v28 = vpop.f32.mrb[111].mxu1  ;;  %vm9061_vm4 = vmmov %vm9056_vm0 }
 0x618   : > { %v5458_v5 = vadd.f32 %v5426_v46, %v8543_v31  ;;  %v5457_v63 = vadd.f32 %v5322_v28, %v8547_v21 }
 0x61a   : > { %5537 = vrot.lane.b32.xlu1 %v5458_v5, %s6730_s20  ;;  %5535 = vrot.lane.b32.xlu0 %v5457_v63, %s6730_s20  ;;  %v6660_v14 = vpop.f32.mrb[112].mxu1 }
 0x61b   : > { %v5428_v56 = vsel %vm9046_vm7, %v6660_v14, 0.0  ;;  %v5332_v2 = vpop.f32.mrb[113].mxu1  ;;  %vm9062_vm7 = vmmov %vm9056_vm0 }
 0x61c   : > { %v5460_v24 = vadd.f32 %v5428_v56, %v8549_v36  ;;  %v5459_v30 = vadd.f32 %v5332_v2, %v8553_v51 }
 0x61e   : > { %5541 = vrot.lane.b32.xlu1 %v5460_v24, %s6730_s20  ;;  %5539 = vrot.lane.b32.xlu0 %v5459_v30, %s6730_s20  ;;  %v6663_v20 = vpop.f32.mrb[114].mxu1 }
 0x61f   : > { %v5430_v31 = vsel %vm9047_vm8, %v6663_v20, 0.0  ;;  %v5342_v21 = vpop.f32.mrb[115].mxu1  ;;  %vm9063_vm8 = vmmov %vm9056_vm0 }
 0x620   : > { %v5462_v54 = vadd.f32 %v5430_v31, %v8555_v1  ;;  %v5461_v0 = vadd.f32 %v5342_v21, %v8559_v55 }
 0x622   : > { %5545 = vrot.lane.b32.xlu1 %v5462_v54, %s6730_s20  ;;  %5543 = vrot.lane.b32.xlu0 %v5461_v0, %s6730_s20  ;;  %v6666_v13 = vpop.f32.mrb[116].mxu1 }
 0x623   : > { %v5432_v36 = vsel %vm9048_vm9, %v6666_v13, 0.0  ;;  %v5352_v51 = vpop.f32.mrb[117].mxu1  ;;  %vm9064_vm9 = vmmov %vm9056_vm0 }
 0x624   : > { %v5464_v58 = vadd.f32 %v5432_v36, %v8561_v4  ;;  %v5463_v18 = vadd.f32 %v5352_v51, %v8565_v29 }
 0x626   : > { %5549 = vrot.lane.b32.xlu1 %v5464_v58, %s6730_s20  ;;  %5547 = vrot.lane.b32.xlu0 %v5463_v18, %s6730_s20  ;;  %v6669_v49 = vpop.f32.mrb[118].mxu1 }
 0x627   : > { %v5434_v1 = vsel %vm9049_vm10, %v6669_v49, 0.0  ;;  %v5362_v55 = vpop.f32.mrb[119].mxu1  ;;  %vm9065_vm10 = vmmov %vm9056_vm0 }
 0x628   : > { %v5466_v19 = vadd.f32 %v5434_v1, %v8567_v16  ;;  %v5465_v10 = vadd.f32 %v5362_v55, %v8571_v32 }
 0x62a   : > { %5553 = vrot.lane.b32.xlu1 %v5466_v19, %s6730_s20  ;;  %5551 = vrot.lane.b32.xlu0 %v5465_v10, %s6730_s20  ;;  %v6672_v25 = vpop.f32.mrb[120].mxu1 }
 0x62b   : > { %v5436_v4 = vsel %vm9050_vm11, %v6672_v25, 0.0  ;;  %v5372_v29 = vpop.f32.mrb[121].mxu1  ;;  %vm9066_vm11 = vmmov %vm9056_vm0 }
 0x62c   : > { %v5468_v6 = vadd.f32 %v5436_v4, %v8573_v17  ;;  %v5467_v12 = vadd.f32 %v5372_v29, %v8577_v15 }
 0x62e   : > { %5557 = vrot.lane.b32.xlu1 %v5468_v6, %s6730_s20  ;;  %5555 = vrot.lane.b32.xlu0 %v5467_v12, %s6730_s20  ;;  %v6675_v23 = vpop.f32.mrb[122].mxu1 }
 0x62f   : > { %v5438_v16 = vsel %vm9051_vm12, %v6675_v23, 0.0  ;;  %v5382_v32 = vpop.f32.mrb[123].mxu1  ;;  %vm9067_vm12 = vmmov %vm9056_vm0 }
 0x630   : > { %v5470_v42 = vadd.f32 %v5438_v16, %v8579_v37  ;;  %v5469_v41 = vadd.f32 %v5382_v32, %v8583_v60 }
 0x632   : > { %5561 = vrot.lane.b32.xlu1 %v5470_v42, %s6730_s20  ;;  %5559 = vrot.lane.b32.xlu0 %v5469_v41, %s6730_s20  ;;  %v6678_v44 = vpop.f32.mrb[124].mxu1 }
 0x633   : > { %v5440_v17 = vsel %vm9052_vm13, %v6678_v44, 0.0  ;;  %v5392_v15 = vpop.f32.mrb[125].mxu1  ;;  %vm9068_vm13 = vmmov %vm9056_vm0 }
 0x634   : > { %v5472_v27 = vadd.f32 %v5440_v17, %v8585_v40  ;;  %v5471_v34 = vadd.f32 %v5392_v15, %v8589_v39 }
 0x636   : > { %5565 = vrot.lane.b32.xlu1 %v5472_v27, %s6730_s20  ;;  %5563 = vrot.lane.b32.xlu0 %v5471_v34, %s6730_s20  ;;  %v6681_v37 = vpop.f32.mrb[126].mxu1 }
 0x637   : > { %v5442_v60 = vsel %vm9053_vm14, %v6681_v37, 0.0  ;;  %v5402_v8 = vpop.f32.mrb[127].mxu1  ;;  %vm9069_vm14 = vmmov %vm9056_vm0 }
 0x638   : > { %v5474_v26 = vadd.f32 %v5442_v60, %v8591_v11  ;;  %v5473_v38 = vadd.f32 %v5402_v8, %v8595_v43 }
 0x63a   : > { %5569 = vrot.lane.b32.xlu1 %v5474_v26, %s6730_s20  ;;  %5567 = vrot.lane.b32.xlu0 %v5473_v38, %s6730_s20 }
 0x670   : > { %v5508_v40 = vpop.permute.xlu0 %5507  ;;  %v5510_v39 = vpop.permute.xlu1 %5509 }
 0x671   : > { %5603 = vst.msk [vmem:[%s6821_s18] sm:$0xff] %vm9054_vm2, %v5508_v40  ;;  %vm9070_vm2 = vmmov %vm9056_vm0 }
 0x672   : > { %5604 = vst.msk [vmem:[%s6821_s18 + $0x8] sm:$0xff] %vm9055_vm6, %v5510_v39  ;;  %vm9071_vm6 = vmmov %vm9056_vm0 }
 0x674   : > { %v5512_v45 = vpop.permute.xlu0 %5511  ;;  %v5514_v53 = vpop.permute.xlu1 %5513 }
 0x675   : > { %5605 = vst.msk [vmem:[%s6821_s18 + $0x10] sm:$0xff] %vm9056_vm0, %v5512_v45 }
 0x676   : > { %5606 = vst.msk [vmem:[%s6821_s18 + $0x18] sm:$0xff] %vm9057_vm3, %v5514_v53  ;;  %vm9072_vm3 = vmmov %vm9056_vm0 }
 0x678   : > { %v5516_v11 = vpop.permute.xlu0 %5515  ;;  %v5518_v43 = vpop.permute.xlu1 %5517 }
 0x679   : > { %5607 = vst.msk [vmem:[%s6821_s18 + $0x20] sm:$0xff] %vm9058_vm5, %v5516_v11  ;;  %vm9073_vm5 = vmmov %vm9056_vm0 }
 0x67a   : > { %5608 = vst.msk [vmem:[%s6821_s18 + $0x28] sm:$0xff] %vm9059_vm1, %v5518_v43  ;;  %vm9074_vm1 = vmmov %vm9056_vm0 }
 0x67c   : > { %v5520_v62 = vpop.permute.xlu0 %5519  ;;  %v5522_v22 = vpop.permute.xlu1 %5521 }
 0x67d   : > { %5609 = vst.msk [vmem:[%s6821_s18 + $0x30] sm:$0xff] %vm9060_vm15, %v5520_v62  ;;  %vm9075_vm15 = vmmov %vm9056_vm0 }
 0x67e   : > { %5610 = vst.msk [vmem:[%s6821_s18 + $0x38] sm:$0xff] %vm9061_vm4, %v5522_v22  ;;  %vm9076_vm4 = vmmov %vm9056_vm0 }
 0x680   : > { %v5524_v52 = vpop.permute.xlu0 %5523  ;;  %v5526_v50 = vpop.permute.xlu1 %5525 }
 0x681   : > { %5611 = vst.msk [vmem:[%s6821_s18 + $0x40] sm:$0xff] %vm9062_vm7, %v5524_v52  ;;  %vm9077_vm7 = vmmov %vm9056_vm0 }
 0x682   : > { %5612 = vst.msk [vmem:[%s6821_s18 + $0x48] sm:$0xff] %vm9063_vm8, %v5526_v50  ;;  %vm9078_vm8 = vmmov %vm9056_vm0 }
 0x684   : > { %v5528_v7 = vpop.permute.xlu0 %5527  ;;  %v5530_v35 = vpop.permute.xlu1 %5529 }
 0x685   : > { %5613 = vst.msk [vmem:[%s6821_s18 + $0x50] sm:$0xff] %vm9064_vm9, %v5528_v7  ;;  %vm9079_vm9 = vmmov %vm9056_vm0 }
 0x686   : > { %5614 = vst.msk [vmem:[%s6821_s18 + $0x58] sm:$0xff] %vm9065_vm10, %v5530_v35  ;;  %vm9080_vm10 = vmmov %vm9056_vm0 }
 0x688   : > { %v5532_v59 = vpop.permute.xlu0 %5531  ;;  %v5534_v61 = vpop.permute.xlu1 %5533 }
 0x689   : > { %5615 = vst.msk [vmem:[%s6821_s18 + $0x60] sm:$0xff] %vm9066_vm11, %v5532_v59  ;;  %vm9081_vm11 = vmmov %vm9056_vm0 }
 0x68a   : > { %5616 = vst.msk [vmem:[%s6821_s18 + $0x68] sm:$0xff] %vm9067_vm12, %v5534_v61  ;;  %vm9082_vm12 = vmmov %vm9056_vm0 }
 0x68c   : > { %v5536_v48 = vpop.permute.xlu0 %5535  ;;  %v5538_v33 = vpop.permute.xlu1 %5537 }
 0x68d   : > { %5617 = vst.msk [vmem:[%s6821_s18 + $0x70] sm:$0xff] %vm9068_vm13, %v5536_v48  ;;  %vm9083_vm13 = vmmov %vm9056_vm0 }
 0x68e   : > { %5618 = vst.msk [vmem:[%s6821_s18 + $0x78] sm:$0xff] %vm9069_vm14, %v5538_v33  ;;  %vm9084_vm14 = vmmov %vm9056_vm0 }
 0x690   : > { %v5540_v9 = vpop.permute.xlu0 %5539  ;;  %v5542_v47 = vpop.permute.xlu1 %5541 }
 0x691   : > { %5619 = vst.msk [vmem:[%s6821_s18 + $0x80] sm:$0xff] %vm9070_vm2, %v5540_v9 }
 0x692   : > { %5620 = vst.msk [vmem:[%s6821_s18 + $0x88] sm:$0xff] %vm9071_vm6, %v5542_v47 }
 0x694   : > { %v5544_v57 = vpop.permute.xlu0 %5543  ;;  %v5546_v3 = vpop.permute.xlu1 %5545 }
 0x695   : > { %5621 = vst.msk [vmem:[%s6821_s18 + $0x90] sm:$0xff] %vm9056_vm0, %v5544_v57 }
 0x696   : > { %5622 = vst.msk [vmem:[%s6821_s18 + $0x98] sm:$0xff] %vm9072_vm3, %v5546_v3 }
 0x698   : > { %v5548_v46 = vpop.permute.xlu0 %5547  ;;  %v5550_v28 = vpop.permute.xlu1 %5549 }
 0x699   : > { %5623 = vst.msk [vmem:[%s6821_s18 + $0xa0] sm:$0xff] %vm9073_vm5, %v5548_v46 }
 0x69a   : > { %5624 = vst.msk [vmem:[%s6821_s18 + $0xa8] sm:$0xff] %vm9074_vm1, %v5550_v28 }
 0x69c   : > { %v5552_v5 = vpop.permute.xlu0 %5551  ;;  %v5554_v63 = vpop.permute.xlu1 %5553 }
 0x69d   : > { %5625 = vst.msk [vmem:[%s6821_s18 + $0xb0] sm:$0xff] %vm9075_vm15, %v5552_v5 }
 0x69e   : > { %5626 = vst.msk [vmem:[%s6821_s18 + $0xb8] sm:$0xff] %vm9076_vm4, %v5554_v63 }
 0x6a0   : > { %v5556_v14 = vpop.permute.xlu0 %5555  ;;  %v5558_v56 = vpop.permute.xlu1 %5557 }
 0x6a1   : > { %5627 = vst.msk [vmem:[%s6821_s18 + $0xc0] sm:$0xff] %vm9077_vm7, %v5556_v14 }
 0x6a2   : > { %5628 = vst.msk [vmem:[%s6821_s18 + $0xc8] sm:$0xff] %vm9078_vm8, %v5558_v56 }
 0x6a4   : > { %v5560_v2 = vpop.permute.xlu0 %5559  ;;  %v5562_v24 = vpop.permute.xlu1 %5561 }
 0x6a5   : > { %5629 = vst.msk [vmem:[%s6821_s18 + $0xd0] sm:$0xff] %vm9079_vm9, %v5560_v2 }
 0x6a6   : > { %5630 = vst.msk [vmem:[%s6821_s18 + $0xd8] sm:$0xff] %vm9080_vm10, %v5562_v24 }
 0x6a8   : > { %v5564_v30 = vpop.permute.xlu0 %5563  ;;  %v5566_v20 = vpop.permute.xlu1 %5565 }
 0x6a9   : > { %5631 = vst.msk [vmem:[%s6821_s18 + $0xe0] sm:$0xff] %vm9081_vm11, %v5564_v30 }
 0x6aa   : > { %5632 = vst.msk [vmem:[%s6821_s18 + $0xe8] sm:$0xff] %vm9082_vm12, %v5566_v20 }
 0x6ac   : > { %v5568_v31 = vpop.permute.xlu0 %5567  ;;  %v5570_v21 = vpop.permute.xlu1 %5569 }
 0x6ad   : > { %5633 = vst.msk [vmem:[%s6821_s18 + $0xf0] sm:$0xff] %vm9083_vm13, %v5568_v31 }
 0x6ae   : > { %5634 = vst.msk [vmem:[%s6821_s18 + $0xf8] sm:$0xff] %vm9084_vm14, %v5570_v21 }
 0x6af PF: > { %s23_s25 = sadd.s32 1, %s6727_s25  }
 0x6b0   : > { %p20_p4 = scmp.ge.s32.totalorder %s23_s25, 4  }
 0x6b2   :  { %22 = sbr.rel (!%p20_p4) target bundleno = 1 (0x1), region = 106 }

</bundles_post_ra>
